<compile_context>
chip_gen: v6e
topology: v6e:2x2x1
jax: 0.10.0
libtpu: 0.0.40
codegen_flags: <defaults>
</compile_context>

<pallas_src>
import functools

import jax
import jax.numpy as jnp
from jax.experimental import pallas as pl
from jax.experimental.pallas import tpu as pltpu

NC, NDF, NGF = 3, 8, 8  # nc, ndf, ngf globals used by the PyTorch module
BN_EPS = 1e-5


# ------------------------- Pallas kernels -------------------------

def _full_spec(shape):
    """Whole-array block (single grid step)."""
    return pl.BlockSpec(shape, lambda i: (0,) * len(shape))


def _apply_act(y, act):
    if act == "leaky_relu":
        return jnp.where(y >= 0, y, 0.2 * y)
    if act == "relu":
        return jnp.maximum(y, 0.0)
    if act == "tanh":
        return jnp.tanh(y)
    return y


def _conv_bn_body(a_ref, w_ref, gamma_ref, beta_ref, r_ref, o_ref, *, act, count):
    """matmul (bf16 -> f32 acc) + per-column BatchNorm(train) + affine (+res) + act."""
    y = jnp.dot(a_ref[...], w_ref[...], preferred_element_type=jnp.float32)  # [M, C]
    inv = 1.0 / count
    mean = jnp.sum(y, axis=0, keepdims=True) * inv                           # [1, C]
    d = y - mean
    var = jnp.sum(d * d, axis=0, keepdims=True) * inv                        # [1, C]
    out = d * (gamma_ref[...] * jax.lax.rsqrt(var + BN_EPS)) + beta_ref[...]
    if r_ref is not None:
        out = out + r_ref[...]
    o_ref[...] = _apply_act(out, act)


def _conv_bn_kernel(a_ref, w_ref, gamma_ref, beta_ref, o_ref, *, act, count):
    _conv_bn_body(a_ref, w_ref, gamma_ref, beta_ref, None, o_ref, act=act, count=count)


def _conv_bn_res_kernel(a_ref, w_ref, gamma_ref, beta_ref, r_ref, o_ref, *, act, count):
    _conv_bn_body(a_ref, w_ref, gamma_ref, beta_ref, r_ref, o_ref, act=act, count=count)


def _deconv_bn_kernel(a_ref, w_ref, g_ref, gt_ref, gamma_ref, beta_ref, o_ref,
                      *, act, count):
    """Sub-pixel deconv matmul + BN with 4-way sub-position grouping + act."""
    y = jnp.dot(a_ref[...], w_ref[...], preferred_element_type=jnp.float32)  # [M, 4*Cout]

    g = g_ref[...]    # [Cf, Cbn] 0/1 grouping matrix
    gt = gt_ref[...]  # [Cbn, Cf] its transpose (broadcast back to full columns)
    inv = 1.0 / count

    s = jnp.sum(y, axis=0, keepdims=True)                                    # [1, Cf]
    mean_c = jnp.dot(s, g, preferred_element_type=jnp.float32) * inv         # [1, Cbn]
    mean_f = jnp.dot(mean_c, gt, preferred_element_type=jnp.float32)         # [1, Cf]
    d = y - mean_f
    var_c = jnp.dot(jnp.sum(d * d, axis=0, keepdims=True), g,
                    preferred_element_type=jnp.float32) * inv                # [1, Cbn]

    scale_c = gamma_ref[...] * jax.lax.rsqrt(var_c + BN_EPS)                 # [1, Cbn]
    scale_f = jnp.dot(scale_c, gt, preferred_element_type=jnp.float32)       # [1, Cf]
    beta_f = jnp.dot(beta_ref[...], gt, preferred_element_type=jnp.float32)  # [1, Cf]

    o_ref[...] = _apply_act(d * scale_f + beta_f, act)


def _matmul_tanh_kernel(a_ref, w_ref, o_ref):
    y = jnp.dot(a_ref[...], w_ref[...], preferred_element_type=jnp.float32)
    o_ref[...] = jnp.tanh(y)


# ------------------------- pallas_call wrappers -------------------------

def fused_conv_bn_act(a, wmat, gamma2d, beta2d, *, act, residual=None):
    """[M,K]@[K,C] -> BN(train) per column -> act, one pallas_call (group=1)."""
    M, K = a.shape
    C = wmat.shape[1]
    count = float(M)

    args = [a.astype(jnp.bfloat16), wmat, gamma2d, beta2d]
    in_specs = [_full_spec((M, K)), _full_spec((K, C)),
                _full_spec((1, C)), _full_spec((1, C))]
    if residual is None:
        kern = functools.partial(_conv_bn_kernel, act=act, count=count)
    else:
        kern = functools.partial(_conv_bn_res_kernel, act=act, count=count)
        args.append(residual)
        in_specs.append(_full_spec((M, C)))

    return pl.pallas_call(
        kern,
        out_shape=jax.ShapeDtypeStruct((M, C), jnp.float32),
        grid=(1,),
        in_specs=in_specs,
        out_specs=_full_spec((M, C)),
        compiler_params=pltpu.CompilerParams(dimension_semantics=("arbitrary",)),
    )(*args)


def fused_deconv_bn_act(a, wmat, g, gt, gamma2d, beta2d, *, act):
    """[M,K]@[K,4*Cout] -> BN(train) grouped over 4 sub-positions -> act."""
    M, K = a.shape
    Cf = wmat.shape[1]
    Cbn = g.shape[1]
    count = float(M * (Cf // Cbn))

    kern = functools.partial(_deconv_bn_kernel, act=act, count=count)
    return pl.pallas_call(
        kern,
        out_shape=jax.ShapeDtypeStruct((M, Cf), jnp.float32),
        grid=(1,),
        in_specs=[_full_spec((M, K)), _full_spec((K, Cf)), _full_spec((Cf, Cbn)),
                  _full_spec((Cbn, Cf)), _full_spec((1, Cbn)), _full_spec((1, Cbn))],
        out_specs=_full_spec((M, Cf)),
        compiler_params=pltpu.CompilerParams(dimension_semantics=("arbitrary",)),
    )(a.astype(jnp.bfloat16), wmat, g, gt, gamma2d, beta2d)


def matmul_tanh(a, wmat):
    M, K = a.shape
    Cf = wmat.shape[1]
    return pl.pallas_call(
        _matmul_tanh_kernel,
        out_shape=jax.ShapeDtypeStruct((M, Cf), jnp.float32),
        grid=(1,),
        in_specs=[_full_spec((M, K)), _full_spec((K, Cf))],
        out_specs=_full_spec((M, Cf)),
        compiler_params=pltpu.CompilerParams(dimension_semantics=("arbitrary",)),
    )(a.astype(jnp.bfloat16), wmat)


# ------------------------- JAX glue (layout only) -------------------------

def _im2col(x, kh, kw, stride, pad):
    """NHWC -> [N*Ho*Wo, kh*kw*C] patch matrix (K ordered as (tap, Cin))."""
    N, H, W, C = x.shape
    xp = jnp.pad(x, ((0, 0), (pad, pad), (pad, pad), (0, 0)))
    Ho = (H + 2 * pad - kh) // stride + 1
    Wo = (W + 2 * pad - kw) // stride + 1
    cols = []
    for i in range(kh):
        for j in range(kw):
            cols.append(xp[:, i:i + stride * Ho:stride, j:j + stride * Wo:stride, :])
    patches = jnp.stack(cols, axis=3)  # [N, Ho, Wo, kh*kw, C]
    return patches.reshape(N * Ho * Wo, kh * kw * C), N, Ho, Wo


def _depth_to_space(y, N, H, W, cout):
    y = y.reshape(N, H, W, 2, 2, cout)
    y = jnp.transpose(y, (0, 1, 3, 2, 4, 5))
    return y.reshape(N, 2 * H, 2 * W, cout)


def conv_bn_act(x, wmat, gamma2d, beta2d, *, act, kh, kw, stride, pad, residual=None):
    cols, N, Ho, Wo = _im2col(x, kh, kw, stride, pad)
    cout = wmat.shape[1]
    if residual is not None:
        residual = residual.reshape(N * Ho * Wo, cout)
    y = fused_conv_bn_act(cols, wmat, gamma2d, beta2d, act=act, residual=residual)
    return y.reshape(N, Ho, Wo, cout)


def deconv_bn_act(x, wmat, g, gt, gamma2d, beta2d, *, act):
    cols, N, Ho, Wo = _im2col(x, 3, 3, 1, 1)
    cout = g.shape[1]
    y = fused_deconv_bn_act(cols, wmat, g, gt, gamma2d, beta2d, act=act)
    return _depth_to_space(y, N, Ho, Wo, cout)


def deconv_tanh(x, wmat, cout):
    cols, N, Ho, Wo = _im2col(x, 3, 3, 1, 1)
    y = matmul_tanh(cols, wmat)
    return _depth_to_space(y, N, Ho, Wo, cout)


# ------------------------- Parameter preprocessing -------------------------

# ConvTranspose2d(4,2,1) pixel-shuffle decomposition: each 2x2 output sub-position is a
# stride-1 2x2 conv over the input.  Taps live inside a 3x3 window of the (pad=1) input;
# mapping: output sub-row dy, patch row ti -> transposed-kernel row ki.
_DECONV_ROWMAP = ({0: 3, 1: 1}, {1: 2, 2: 0})


def _conv_wmat(w_pt):
    """PyTorch Conv2d weight [Cout,Cin,kh,kw] -> bf16 [kh*kw*Cin, Cout]."""
    cout, cin, kh, kw = w_pt.shape
    return jnp.transpose(w_pt, (2, 3, 1, 0)).reshape(kh * kw * cin, cout).astype(jnp.bfloat16)


def _deconv_wmat(w_t):
    """PyTorch ConvT weight [Cin, Cout, 4, 4] -> bf16 [9*Cin, 4*Cout] sub-pixel matrix."""
    cin, cout = w_t.shape[:2]
    wm = jnp.zeros((9, cin, 4, cout), jnp.float32)
    for dy in (0, 1):
        for dx in (0, 1):
            for ti, ki in _DECONV_ROWMAP[dy].items():
                for tj, kj in _DECONV_ROWMAP[dx].items():
                    wm = wm.at[ti * 3 + tj, :, dy * 2 + dx, :].set(w_t[:, :, ki, kj])
    return wm.reshape(9 * cin, 4 * cout).astype(jnp.bfloat16)


def _group_mats(cout, group=4):
    eye = jnp.eye(cout, dtype=jnp.float32)
    g = jnp.tile(eye, (group, 1))   # [group*Cout, Cout]
    gt = jnp.tile(eye, (1, group))  # [Cout, group*Cout]
    return g, gt


def prepare_params(p):
    """One-time: flatten weights to matmul form (bf16), BN params to [1,C] f32."""
    prep = {
        "conv1_w": _conv_wmat(p["conv1_w"]),
        "conv2_w": _conv_wmat(p["conv2_w"]),
        "res_w1": _conv_wmat(p["res_w1"]),
        "res_w2": _conv_wmat(p["res_w2"]),
        "deconv1_w": _deconv_wmat(p["deconv1_w"]),
        "deconv2_w": _deconv_wmat(p["deconv2_w"]),
        "deconv3_w": _deconv_wmat(p["deconv3_w"]),
    }
    prep["g1"], prep["gt1"] = _group_mats(NGF * 2)
    prep["g2"], prep["gt2"] = _group_mats(NGF)
    for name in ("bn1", "bn2", "res_bn1", "res_bn2", "bn3", "bn4"):
        prep[name + "_g"] = p[name + "_g"].reshape(1, -1).astype(jnp.float32)
        prep[name + "_b"] = p[name + "_b"].reshape(1, -1).astype(jnp.float32)
    return prep


def init_params(key):
    ks = jax.random.split(key, 7)

    def w(k, shape):
        return (0.05 * jax.random.normal(k, shape)).astype(jnp.float32)

    params = {
        "conv1_w":   w(ks[0], (NDF * 2, NC, 4, 4)),        # Conv2d(nc, ndf*2, 4, 2, 1)
        "conv2_w":   w(ks[1], (NDF * 4, NDF * 2, 4, 4)),    # Conv2d(ndf*2, ndf*4, 4, 2, 1)
        "res_w1":    w(ks[2], (NDF * 4, NDF * 4, 3, 3)),    # ResBlock conv3x3 #1
        "res_w2":    w(ks[3], (NDF * 4, NDF * 4, 3, 3)),    # ResBlock conv3x3 #2
        "deconv1_w": w(ks[4], (NGF * 4, NGF * 2, 4, 4)),    # ConvT(ngf*4, ngf*2, 4, 2, 1)
        "deconv2_w": w(ks[5], (NGF * 2, NGF, 4, 4)),        # ConvT(ngf*2, ngf, 4, 2, 1)
        "deconv3_w": w(ks[6], (NGF, NC, 4, 4)),             # ConvT(ngf, nc, 4, 2, 1)
    }
    for name, c in [("bn1", NDF * 2), ("bn2", NDF * 4), ("res_bn1", NDF * 4),
                    ("res_bn2", NDF * 4), ("bn3", NGF * 2), ("bn4", NGF)]:
        params[name + "_g"] = jnp.ones((c,), jnp.float32)   # PyTorch BN default gamma=1
        params[name + "_b"] = jnp.zeros((c,), jnp.float32)  # PyTorch BN default beta=0
    return params


# ------------------------- Forward -------------------------

def generator_stage2(x_nchw, p):
    x = jnp.transpose(x_nchw, (0, 2, 3, 1)).astype(jnp.float32)  # NCHW -> NHWC

    # Conv(nc -> ndf*2, 4, 2, 1) + BN + LeakyReLU(0.2)
    x = conv_bn_act(x, p["conv1_w"], p["bn1_g"], p["bn1_b"],
                    act="leaky_relu", kh=4, kw=4, stride=2, pad=1)
    # Conv(ndf*2 -> ndf*4, 4, 2, 1) + BN + LeakyReLU(0.2)
    x = conv_bn_act(x, p["conv2_w"], p["bn2_g"], p["bn2_b"],
                    act="leaky_relu", kh=4, kw=4, stride=2, pad=1)

    # ResBlock(ndf*4): conv3x3+BN+ReLU, conv3x3+BN, +residual, ReLU
    res = x
    x = conv_bn_act(x, p["res_w1"], p["res_bn1_g"], p["res_bn1_b"],
                    act="relu", kh=3, kw=3, stride=1, pad=1)
    x = conv_bn_act(x, p["res_w2"], p["res_bn2_g"], p["res_bn2_b"],
                    act="relu", kh=3, kw=3, stride=1, pad=1, residual=res)

    # ConvT(ngf*4 -> ngf*2, 4, 2, 1) + BN + ReLU
    x = deconv_bn_act(x, p["deconv1_w"], p["g1"], p["gt1"],
                      p["bn3_g"], p["bn3_b"], act="relu")
    # ConvT(ngf*2 -> ngf, 4, 2, 1) + BN + ReLU
    x = deconv_bn_act(x, p["deconv2_w"], p["g2"], p["gt2"],
                      p["bn4_g"], p["bn4_b"], act="relu")
    # ConvT(ngf -> nc, 4, 2, 1) + Tanh
    x = deconv_tanh(x, p["deconv3_w"], NC)

    return jnp.transpose(x, (0, 3, 1, 2))  # NHWC -> NCHW


if __name__ == "__main__":
    key = jax.random.PRNGKey(0)
    kx, kp = jax.random.split(key)
    x = jax.random.normal(kx, (2, NC, 16, 16), jnp.float32)  # NCHW input
    params = init_params(kp)
    prep = prepare_params(params)   # one-time weight flattening / bf16 cast

    fwd = jax.jit(generator_stage2)
    out = jax.block_until_ready(fwd(x, prep))

    assert out.shape == (2, NC, 32, 32), out.shape
    assert bool(jnp.all(jnp.isfinite(out)))
    assert bool(jnp.all(jnp.abs(out) <= 1.0 + 1e-6))  # tanh range
    print("KERNEL_OK")
</pallas_src>

<mosaic_0001>
module attributes {stable_mosaic.version = 11 : i64} {
  func.func @_conv_bn_kernel(%arg0: i32, %arg1: memref<128x48xbf16, #tpu.memory_space<vmem>>, %arg2: memref<48x16xbf16, #tpu.memory_space<vmem>>, %arg3: memref<1x16xf32, #tpu.memory_space<vmem>>, %arg4: memref<1x16xf32, #tpu.memory_space<vmem>>, %arg5: memref<128x16xf32, #tpu.memory_space<vmem>>) attributes {dimension_semantics = [#tpu.dimension_semantics<arbitrary>], iteration_bounds = array<i64: 1>, scalar_prefetch = 0 : i64, scratch_operands = 0 : i64, tpu.core_type = #tpu.core_type<tc>, window_params = [{pipeline_mode = #tpu.pipeline_mode<synchronous>, transform_indices = @transform_0, window_bounds = array<i64: 128, 48>}, {pipeline_mode = #tpu.pipeline_mode<synchronous>, transform_indices = @transform_1, window_bounds = array<i64: 48, 16>}, {pipeline_mode = #tpu.pipeline_mode<synchronous>, transform_indices = @transform_2, window_bounds = array<i64: 1, 16>}, {pipeline_mode = #tpu.pipeline_mode<synchronous>, transform_indices = @transform_3, window_bounds = array<i64: 1, 16>}, {pipeline_mode = #tpu.pipeline_mode<synchronous>, transform_indices = @transform_4, window_bounds = array<i64: 128, 16>}]} {
    %c0 = arith.constant 0 : index
    %c0_0 = arith.constant 0 : index
    %0 = vector.load %arg1[%c0, %c0_0] : memref<128x48xbf16, #tpu.memory_space<vmem>>, vector<128x48xbf16>
    %c0_1 = arith.constant 0 : index
    %c0_2 = arith.constant 0 : index
    %1 = vector.load %arg2[%c0_1, %c0_2] : memref<48x16xbf16, #tpu.memory_space<vmem>>, vector<48x16xbf16>
    %cst = arith.constant dense<0.000000e+00> : vector<128x16xf32>
    %2 = tpu.matmul %0, %1, %cst {dimension_numbers = #tpu.dot_dimension_numbers<[1], [0], [0], [1], [0, 0, 1, 1], [], []>} : vector<128x48xbf16>, vector<48x16xbf16>, vector<128x16xf32> -> vector<128x16xf32>
    %cst_3 = arith.constant dense<0.000000e+00> : vector<16xf32>
    %3 = vector.multi_reduction <add>, %2, %cst_3 [0] : vector<128x16xf32> to vector<16xf32>
    %4 = vector.shape_cast %3 : vector<16xf32> to vector<1x16xf32>
    %cst_4 = arith.constant 7.812500e-03 : f32
    %5 = vector.broadcast %cst_4 : f32 to vector<1x16xf32>
    %6 = arith.mulf %4, %5 : vector<1x16xf32>
    %7 = vector.broadcast %6 : vector<1x16xf32> to vector<128x16xf32>
    %8 = arith.subf %2, %7 : vector<128x16xf32>
    %9 = arith.mulf %8, %8 : vector<128x16xf32>
    %cst_5 = arith.constant dense<0.000000e+00> : vector<16xf32>
    %10 = vector.multi_reduction <add>, %9, %cst_5 [0] : vector<128x16xf32> to vector<16xf32>
    %11 = vector.shape_cast %10 : vector<16xf32> to vector<1x16xf32>
    %cst_6 = arith.constant 7.812500e-03 : f32
    %12 = vector.broadcast %cst_6 : f32 to vector<1x16xf32>
    %13 = arith.mulf %11, %12 : vector<1x16xf32>
    %c0_7 = arith.constant 0 : index
    %c0_8 = arith.constant 0 : index
    %14 = vector.load %arg3[%c0_7, %c0_8] : memref<1x16xf32, #tpu.memory_space<vmem>>, vector<1x16xf32>
    %cst_9 = arith.constant 9.99999974E-6 : f32
    %15 = vector.broadcast %cst_9 : f32 to vector<1x16xf32>
    %16 = arith.addf %13, %15 : vector<1x16xf32>
    %17 = math.rsqrt %16 : vector<1x16xf32>
    %18 = arith.mulf %14, %17 : vector<1x16xf32>
    %19 = vector.broadcast %18 : vector<1x16xf32> to vector<128x16xf32>
    %20 = arith.mulf %8, %19 : vector<128x16xf32>
    %c0_10 = arith.constant 0 : index
    %c0_11 = arith.constant 0 : index
    %21 = vector.load %arg4[%c0_10, %c0_11] : memref<1x16xf32, #tpu.memory_space<vmem>>, vector<1x16xf32>
    %22 = vector.broadcast %21 : vector<1x16xf32> to vector<128x16xf32>
    %23 = arith.addf %20, %22 : vector<128x16xf32>
    %cst_12 = arith.constant 0.000000e+00 : f32
    %24 = vector.broadcast %cst_12 : f32 to vector<128x16xf32>
    %25 = arith.cmpf oge, %23, %24 : vector<128x16xf32>
    %cst_13 = arith.constant 2.000000e-01 : f32
    %26 = vector.broadcast %cst_13 : f32 to vector<128x16xf32>
    %27 = arith.mulf %26, %23 : vector<128x16xf32>
    %28 = arith.select %25, %23, %27 : vector<128x16xi1>, vector<128x16xf32>
    %c0_14 = arith.constant 0 : index
    %c0_15 = arith.constant 0 : index
    %29 = vector.load %arg5[%c0_14, %c0_15] : memref<128x16xf32, #tpu.memory_space<vmem>>, vector<128x16xf32>
    tpu.vector_store %arg5[%c0_14, %c0_15], %28 {strides = array<i32>} : memref<128x16xf32, #tpu.memory_space<vmem>>, vector<128x16xf32>,
    return
  }
  func.func @transform_0(%arg0: i32) -> (i32, i32) {
    %c0_i32 = arith.constant 0 : i32
    %c0_i32_0 = arith.constant 0 : i32
    %c0_i32_1 = arith.constant 0 : i32
    return %c0_i32, %c0_i32_0 : i32, i32
  }
  func.func @transform_1(%arg0: i32) -> (i32, i32) {
    %c0_i32 = arith.constant 0 : i32
    %c0_i32_0 = arith.constant 0 : i32
    %c0_i32_1 = arith.constant 0 : i32
    return %c0_i32, %c0_i32_0 : i32, i32
  }
  func.func @transform_2(%arg0: i32) -> (i32, i32) {
    %c0_i32 = arith.constant 0 : i32
    %c0_i32_0 = arith.constant 0 : i32
    %c0_i32_1 = arith.constant 0 : i32
    return %c0_i32, %c0_i32_0 : i32, i32
  }
  func.func @transform_3(%arg0: i32) -> (i32, i32) {
    %c0_i32 = arith.constant 0 : i32
    %c0_i32_0 = arith.constant 0 : i32
    %c0_i32_1 = arith.constant 0 : i32
    return %c0_i32, %c0_i32_0 : i32, i32
  }
  func.func @transform_4(%arg0: i32) -> (i32, i32) {
    %c0_i32 = arith.constant 0 : i32
    %c0_i32_0 = arith.constant 0 : i32
    %c0_i32_1 = arith.constant 0 : i32
    return %c0_i32, %c0_i32_0 : i32, i32
  }
}

module attributes {stable_mosaic.version = 11 : i64} {
  func.func @_conv_bn_kernel(%arg0: i32, %arg1: memref<32x256xbf16, #tpu.memory_space<vmem>>, %arg2: memref<256x32xbf16, #tpu.memory_space<vmem>>, %arg3: memref<1x32xf32, #tpu.memory_space<vmem>>, %arg4: memref<1x32xf32, #tpu.memory_space<vmem>>, %arg5: memref<32x32xf32, #tpu.memory_space<vmem>>) attributes {dimension_semantics = [#tpu.dimension_semantics<arbitrary>], iteration_bounds = array<i64: 1>, scalar_prefetch = 0 : i64, scratch_operands = 0 : i64, tpu.core_type = #tpu.core_type<tc>, window_params = [{pipeline_mode = #tpu.pipeline_mode<synchronous>, transform_indices = @transform_0, window_bounds = array<i64: 32, 256>}, {pipeline_mode = #tpu.pipeline_mode<synchronous>, transform_indices = @transform_1, window_bounds = array<i64: 256, 32>}, {pipeline_mode = #tpu.pipeline_mode<synchronous>, transform_indices = @transform_2, window_bounds = array<i64: 1, 32>}, {pipeline_mode = #tpu.pipeline_mode<synchronous>, transform_indices = @transform_3, window_bounds = array<i64: 1, 32>}, {pipeline_mode = #tpu.pipeline_mode<synchronous>, transform_indices = @transform_4, window_bounds = array<i64: 32, 32>}]} {
    %c0 = arith.constant 0 : index
    %c0_0 = arith.constant 0 : index
    %0 = vector.load %arg1[%c0, %c0_0] : memref<32x256xbf16, #tpu.memory_space<vmem>>, vector<32x256xbf16>
    %c0_1 = arith.constant 0 : index
    %c0_2 = arith.constant 0 : index
    %1 = vector.load %arg2[%c0_1, %c0_2] : memref<256x32xbf16, #tpu.memory_space<vmem>>, vector<256x32xbf16>
    %cst = arith.constant dense<0.000000e+00> : vector<32x32xf32>
    %2 = tpu.matmul %0, %1, %cst {dimension_numbers = #tpu.dot_dimension_numbers<[1], [0], [0], [1], [0, 0, 1, 1], [], []>} : vector<32x256xbf16>, vector<256x32xbf16>, vector<32x32xf32> -> vector<32x32xf32>
    %cst_3 = arith.constant dense<0.000000e+00> : vector<32xf32>
    %3 = vector.multi_reduction <add>, %2, %cst_3 [0] : vector<32x32xf32> to vector<32xf32>
    %4 = vector.shape_cast %3 : vector<32xf32> to vector<1x32xf32>
    %cst_4 = arith.constant 3.125000e-02 : f32
    %5 = vector.broadcast %cst_4 : f32 to vector<1x32xf32>
    %6 = arith.mulf %4, %5 : vector<1x32xf32>
    %7 = vector.broadcast %6 : vector<1x32xf32> to vector<32x32xf32>
    %8 = arith.subf %2, %7 : vector<32x32xf32>
    %9 = arith.mulf %8, %8 : vector<32x32xf32>
    %cst_5 = arith.constant dense<0.000000e+00> : vector<32xf32>
    %10 = vector.multi_reduction <add>, %9, %cst_5 [0] : vector<32x32xf32> to vector<32xf32>
    %11 = vector.shape_cast %10 : vector<32xf32> to vector<1x32xf32>
    %cst_6 = arith.constant 3.125000e-02 : f32
    %12 = vector.broadcast %cst_6 : f32 to vector<1x32xf32>
    %13 = arith.mulf %11, %12 : vector<1x32xf32>
    %c0_7 = arith.constant 0 : index
    %c0_8 = arith.constant 0 : index
    %14 = vector.load %arg3[%c0_7, %c0_8] : memref<1x32xf32, #tpu.memory_space<vmem>>, vector<1x32xf32>
    %cst_9 = arith.constant 9.99999974E-6 : f32
    %15 = vector.broadcast %cst_9 : f32 to vector<1x32xf32>
    %16 = arith.addf %13, %15 : vector<1x32xf32>
    %17 = math.rsqrt %16 : vector<1x32xf32>
    %18 = arith.mulf %14, %17 : vector<1x32xf32>
    %19 = vector.broadcast %18 : vector<1x32xf32> to vector<32x32xf32>
    %20 = arith.mulf %8, %19 : vector<32x32xf32>
    %c0_10 = arith.constant 0 : index
    %c0_11 = arith.constant 0 : index
    %21 = vector.load %arg4[%c0_10, %c0_11] : memref<1x32xf32, #tpu.memory_space<vmem>>, vector<1x32xf32>
    %22 = vector.broadcast %21 : vector<1x32xf32> to vector<32x32xf32>
    %23 = arith.addf %20, %22 : vector<32x32xf32>
    %cst_12 = arith.constant 0.000000e+00 : f32
    %24 = vector.broadcast %cst_12 : f32 to vector<32x32xf32>
    %25 = arith.cmpf oge, %23, %24 : vector<32x32xf32>
    %cst_13 = arith.constant 2.000000e-01 : f32
    %26 = vector.broadcast %cst_13 : f32 to vector<32x32xf32>
    %27 = arith.mulf %26, %23 : vector<32x32xf32>
    %28 = arith.select %25, %23, %27 : vector<32x32xi1>, vector<32x32xf32>
    %c0_14 = arith.constant 0 : index
    %c0_15 = arith.constant 0 : index
    %29 = vector.load %arg5[%c0_14, %c0_15] : memref<32x32xf32, #tpu.memory_space<vmem>>, vector<32x32xf32>
    tpu.vector_store %arg5[%c0_14, %c0_15], %28 {strides = array<i32>} : memref<32x32xf32, #tpu.memory_space<vmem>>, vector<32x32xf32>,
    return
  }
  func.func @transform_0(%arg0: i32) -> (i32, i32) {
    %c0_i32 = arith.constant 0 : i32
    %c0_i32_0 = arith.constant 0 : i32
    %c0_i32_1 = arith.constant 0 : i32
    return %c0_i32, %c0_i32_0 : i32, i32
  }
  func.func @transform_1(%arg0: i32) -> (i32, i32) {
    %c0_i32 = arith.constant 0 : i32
    %c0_i32_0 = arith.constant 0 : i32
    %c0_i32_1 = arith.constant 0 : i32
    return %c0_i32, %c0_i32_0 : i32, i32
  }
  func.func @transform_2(%arg0: i32) -> (i32, i32) {
    %c0_i32 = arith.constant 0 : i32
    %c0_i32_0 = arith.constant 0 : i32
    %c0_i32_1 = arith.constant 0 : i32
    return %c0_i32, %c0_i32_0 : i32, i32
  }
  func.func @transform_3(%arg0: i32) -> (i32, i32) {
    %c0_i32 = arith.constant 0 : i32
    %c0_i32_0 = arith.constant 0 : i32
    %c0_i32_1 = arith.constant 0 : i32
    return %c0_i32, %c0_i32_0 : i32, i32
  }
  func.func @transform_4(%arg0: i32) -> (i32, i32) {
    %c0_i32 = arith.constant 0 : i32
    %c0_i32_0 = arith.constant 0 : i32
    %c0_i32_1 = arith.constant 0 : i32
    return %c0_i32, %c0_i32_0 : i32, i32
  }
}

module attributes {stable_mosaic.version = 11 : i64} {
  func.func @_conv_bn_kernel(%arg0: i32, %arg1: memref<32x288xbf16, #tpu.memory_space<vmem>>, %arg2: memref<288x32xbf16, #tpu.memory_space<vmem>>, %arg3: memref<1x32xf32, #tpu.memory_space<vmem>>, %arg4: memref<1x32xf32, #tpu.memory_space<vmem>>, %arg5: memref<32x32xf32, #tpu.memory_space<vmem>>) attributes {dimension_semantics = [#tpu.dimension_semantics<arbitrary>], iteration_bounds = array<i64: 1>, scalar_prefetch = 0 : i64, scratch_operands = 0 : i64, tpu.core_type = #tpu.core_type<tc>, window_params = [{pipeline_mode = #tpu.pipeline_mode<synchronous>, transform_indices = @transform_0, window_bounds = array<i64: 32, 288>}, {pipeline_mode = #tpu.pipeline_mode<synchronous>, transform_indices = @transform_1, window_bounds = array<i64: 288, 32>}, {pipeline_mode = #tpu.pipeline_mode<synchronous>, transform_indices = @transform_2, window_bounds = array<i64: 1, 32>}, {pipeline_mode = #tpu.pipeline_mode<synchronous>, transform_indices = @transform_3, window_bounds = array<i64: 1, 32>}, {pipeline_mode = #tpu.pipeline_mode<synchronous>, transform_indices = @transform_4, window_bounds = array<i64: 32, 32>}]} {
    %c0 = arith.constant 0 : index
    %c0_0 = arith.constant 0 : index
    %0 = vector.load %arg1[%c0, %c0_0] : memref<32x288xbf16, #tpu.memory_space<vmem>>, vector<32x288xbf16>
    %c0_1 = arith.constant 0 : index
    %c0_2 = arith.constant 0 : index
    %1 = vector.load %arg2[%c0_1, %c0_2] : memref<288x32xbf16, #tpu.memory_space<vmem>>, vector<288x32xbf16>
    %cst = arith.constant dense<0.000000e+00> : vector<32x32xf32>
    %2 = tpu.matmul %0, %1, %cst {dimension_numbers = #tpu.dot_dimension_numbers<[1], [0], [0], [1], [0, 0, 1, 1], [], []>} : vector<32x288xbf16>, vector<288x32xbf16>, vector<32x32xf32> -> vector<32x32xf32>
    %cst_3 = arith.constant dense<0.000000e+00> : vector<32xf32>
    %3 = vector.multi_reduction <add>, %2, %cst_3 [0] : vector<32x32xf32> to vector<32xf32>
    %4 = vector.shape_cast %3 : vector<32xf32> to vector<1x32xf32>
    %cst_4 = arith.constant 3.125000e-02 : f32
    %5 = vector.broadcast %cst_4 : f32 to vector<1x32xf32>
    %6 = arith.mulf %4, %5 : vector<1x32xf32>
    %7 = vector.broadcast %6 : vector<1x32xf32> to vector<32x32xf32>
    %8 = arith.subf %2, %7 : vector<32x32xf32>
    %9 = arith.mulf %8, %8 : vector<32x32xf32>
    %cst_5 = arith.constant dense<0.000000e+00> : vector<32xf32>
    %10 = vector.multi_reduction <add>, %9, %cst_5 [0] : vector<32x32xf32> to vector<32xf32>
    %11 = vector.shape_cast %10 : vector<32xf32> to vector<1x32xf32>
    %cst_6 = arith.constant 3.125000e-02 : f32
    %12 = vector.broadcast %cst_6 : f32 to vector<1x32xf32>
    %13 = arith.mulf %11, %12 : vector<1x32xf32>
    %c0_7 = arith.constant 0 : index
    %c0_8 = arith.constant 0 : index
    %14 = vector.load %arg3[%c0_7, %c0_8] : memref<1x32xf32, #tpu.memory_space<vmem>>, vector<1x32xf32>
    %cst_9 = arith.constant 9.99999974E-6 : f32
    %15 = vector.broadcast %cst_9 : f32 to vector<1x32xf32>
    %16 = arith.addf %13, %15 : vector<1x32xf32>
    %17 = math.rsqrt %16 : vector<1x32xf32>
    %18 = arith.mulf %14, %17 : vector<1x32xf32>
    %19 = vector.broadcast %18 : vector<1x32xf32> to vector<32x32xf32>
    %20 = arith.mulf %8, %19 : vector<32x32xf32>
    %c0_10 = arith.constant 0 : index
    %c0_11 = arith.constant 0 : index
    %21 = vector.load %arg4[%c0_10, %c0_11] : memref<1x32xf32, #tpu.memory_space<vmem>>, vector<1x32xf32>
    %22 = vector.broadcast %21 : vector<1x32xf32> to vector<32x32xf32>
    %23 = arith.addf %20, %22 : vector<32x32xf32>
    %cst_12 = arith.constant 0.000000e+00 : f32
    %24 = vector.broadcast %cst_12 : f32 to vector<32x32xf32>
    %25 = arith.maximumf %23, %24 : vector<32x32xf32>
    %c0_13 = arith.constant 0 : index
    %c0_14 = arith.constant 0 : index
    %26 = vector.load %arg5[%c0_13, %c0_14] : memref<32x32xf32, #tpu.memory_space<vmem>>, vector<32x32xf32>
    tpu.vector_store %arg5[%c0_13, %c0_14], %25 {strides = array<i32>} : memref<32x32xf32, #tpu.memory_space<vmem>>, vector<32x32xf32>,
    return
  }
  func.func @transform_0(%arg0: i32) -> (i32, i32) {
    %c0_i32 = arith.constant 0 : i32
    %c0_i32_0 = arith.constant 0 : i32
    %c0_i32_1 = arith.constant 0 : i32
    return %c0_i32, %c0_i32_0 : i32, i32
  }
  func.func @transform_1(%arg0: i32) -> (i32, i32) {
    %c0_i32 = arith.constant 0 : i32
    %c0_i32_0 = arith.constant 0 : i32
    %c0_i32_1 = arith.constant 0 : i32
    return %c0_i32, %c0_i32_0 : i32, i32
  }
  func.func @transform_2(%arg0: i32) -> (i32, i32) {
    %c0_i32 = arith.constant 0 : i32
    %c0_i32_0 = arith.constant 0 : i32
    %c0_i32_1 = arith.constant 0 : i32
    return %c0_i32, %c0_i32_0 : i32, i32
  }
  func.func @transform_3(%arg0: i32) -> (i32, i32) {
    %c0_i32 = arith.constant 0 : i32
    %c0_i32_0 = arith.constant 0 : i32
    %c0_i32_1 = arith.constant 0 : i32
    return %c0_i32, %c0_i32_0 : i32, i32
  }
  func.func @transform_4(%arg0: i32) -> (i32, i32) {
    %c0_i32 = arith.constant 0 : i32
    %c0_i32_0 = arith.constant 0 : i32
    %c0_i32_1 = arith.constant 0 : i32
    return %c0_i32, %c0_i32_0 : i32, i32
  }
}

module attributes {stable_mosaic.version = 11 : i64} {
  func.func @_conv_bn_res_kernel(%arg0: i32, %arg1: memref<32x288xbf16, #tpu.memory_space<vmem>>, %arg2: memref<288x32xbf16, #tpu.memory_space<vmem>>, %arg3: memref<1x32xf32, #tpu.memory_space<vmem>>, %arg4: memref<1x32xf32, #tpu.memory_space<vmem>>, %arg5: memref<32x32xf32, #tpu.memory_space<vmem>>, %arg6: memref<32x32xf32, #tpu.memory_space<vmem>>) attributes {dimension_semantics = [#tpu.dimension_semantics<arbitrary>], iteration_bounds = array<i64: 1>, scalar_prefetch = 0 : i64, scratch_operands = 0 : i64, tpu.core_type = #tpu.core_type<tc>, window_params = [{pipeline_mode = #tpu.pipeline_mode<synchronous>, transform_indices = @transform_0, window_bounds = array<i64: 32, 288>}, {pipeline_mode = #tpu.pipeline_mode<synchronous>, transform_indices = @transform_1, window_bounds = array<i64: 288, 32>}, {pipeline_mode = #tpu.pipeline_mode<synchronous>, transform_indices = @transform_2, window_bounds = array<i64: 1, 32>}, {pipeline_mode = #tpu.pipeline_mode<synchronous>, transform_indices = @transform_3, window_bounds = array<i64: 1, 32>}, {pipeline_mode = #tpu.pipeline_mode<synchronous>, transform_indices = @transform_4, window_bounds = array<i64: 32, 32>}, {pipeline_mode = #tpu.pipeline_mode<synchronous>, transform_indices = @transform_5, window_bounds = array<i64: 32, 32>}]} {
    %c0 = arith.constant 0 : index
    %c0_0 = arith.constant 0 : index
    %0 = vector.load %arg1[%c0, %c0_0] : memref<32x288xbf16, #tpu.memory_space<vmem>>, vector<32x288xbf16>
    %c0_1 = arith.constant 0 : index
    %c0_2 = arith.constant 0 : index
    %1 = vector.load %arg2[%c0_1, %c0_2] : memref<288x32xbf16, #tpu.memory_space<vmem>>, vector<288x32xbf16>
    %cst = arith.constant dense<0.000000e+00> : vector<32x32xf32>
    %2 = tpu.matmul %0, %1, %cst {dimension_numbers = #tpu.dot_dimension_numbers<[1], [0], [0], [1], [0, 0, 1, 1], [], []>} : vector<32x288xbf16>, vector<288x32xbf16>, vector<32x32xf32> -> vector<32x32xf32>
    %cst_3 = arith.constant dense<0.000000e+00> : vector<32xf32>
    %3 = vector.multi_reduction <add>, %2, %cst_3 [0] : vector<32x32xf32> to vector<32xf32>
    %4 = vector.shape_cast %3 : vector<32xf32> to vector<1x32xf32>
    %cst_4 = arith.constant 3.125000e-02 : f32
    %5 = vector.broadcast %cst_4 : f32 to vector<1x32xf32>
    %6 = arith.mulf %4, %5 : vector<1x32xf32>
    %7 = vector.broadcast %6 : vector<1x32xf32> to vector<32x32xf32>
    %8 = arith.subf %2, %7 : vector<32x32xf32>
    %9 = arith.mulf %8, %8 : vector<32x32xf32>
    %cst_5 = arith.constant dense<0.000000e+00> : vector<32xf32>
    %10 = vector.multi_reduction <add>, %9, %cst_5 [0] : vector<32x32xf32> to vector<32xf32>
    %11 = vector.shape_cast %10 : vector<32xf32> to vector<1x32xf32>
    %cst_6 = arith.constant 3.125000e-02 : f32
    %12 = vector.broadcast %cst_6 : f32 to vector<1x32xf32>
    %13 = arith.mulf %11, %12 : vector<1x32xf32>
    %c0_7 = arith.constant 0 : index
    %c0_8 = arith.constant 0 : index
    %14 = vector.load %arg3[%c0_7, %c0_8] : memref<1x32xf32, #tpu.memory_space<vmem>>, vector<1x32xf32>
    %cst_9 = arith.constant 9.99999974E-6 : f32
    %15 = vector.broadcast %cst_9 : f32 to vector<1x32xf32>
    %16 = arith.addf %13, %15 : vector<1x32xf32>
    %17 = math.rsqrt %16 : vector<1x32xf32>
    %18 = arith.mulf %14, %17 : vector<1x32xf32>
    %19 = vector.broadcast %18 : vector<1x32xf32> to vector<32x32xf32>
    %20 = arith.mulf %8, %19 : vector<32x32xf32>
    %c0_10 = arith.constant 0 : index
    %c0_11 = arith.constant 0 : index
    %21 = vector.load %arg4[%c0_10, %c0_11] : memref<1x32xf32, #tpu.memory_space<vmem>>, vector<1x32xf32>
    %22 = vector.broadcast %21 : vector<1x32xf32> to vector<32x32xf32>
    %23 = arith.addf %20, %22 : vector<32x32xf32>
    %c0_12 = arith.constant 0 : index
    %c0_13 = arith.constant 0 : index
    %24 = vector.load %arg5[%c0_12, %c0_13] : memref<32x32xf32, #tpu.memory_space<vmem>>, vector<32x32xf32>
    %25 = arith.addf %23, %24 : vector<32x32xf32>
    %cst_14 = arith.constant 0.000000e+00 : f32
    %26 = vector.broadcast %cst_14 : f32 to vector<32x32xf32>
    %27 = arith.maximumf %25, %26 : vector<32x32xf32>
    %c0_15 = arith.constant 0 : index
    %c0_16 = arith.constant 0 : index
    %28 = vector.load %arg6[%c0_15, %c0_16] : memref<32x32xf32, #tpu.memory_space<vmem>>, vector<32x32xf32>
    tpu.vector_store %arg6[%c0_15, %c0_16], %27 {strides = array<i32>} : memref<32x32xf32, #tpu.memory_space<vmem>>, vector<32x32xf32>,
    return
  }
  func.func @transform_0(%arg0: i32) -> (i32, i32) {
    %c0_i32 = arith.constant 0 : i32
    %c0_i32_0 = arith.constant 0 : i32
    %c0_i32_1 = arith.constant 0 : i32
    return %c0_i32, %c0_i32_0 : i32, i32
  }
  func.func @transform_1(%arg0: i32) -> (i32, i32) {
    %c0_i32 = arith.constant 0 : i32
    %c0_i32_0 = arith.constant 0 : i32
    %c0_i32_1 = arith.constant 0 : i32
    return %c0_i32, %c0_i32_0 : i32, i32
  }
  func.func @transform_2(%arg0: i32) -> (i32, i32) {
    %c0_i32 = arith.constant 0 : i32
    %c0_i32_0 = arith.constant 0 : i32
    %c0_i32_1 = arith.constant 0 : i32
    return %c0_i32, %c0_i32_0 : i32, i32
  }
  func.func @transform_3(%arg0: i32) -> (i32, i32) {
    %c0_i32 = arith.constant 0 : i32
    %c0_i32_0 = arith.constant 0 : i32
    %c0_i32_1 = arith.constant 0 : i32
    return %c0_i32, %c0_i32_0 : i32, i32
  }
  func.func @transform_4(%arg0: i32) -> (i32, i32) {
    %c0_i32 = arith.constant 0 : i32
    %c0_i32_0 = arith.constant 0 : i32
    %c0_i32_1 = arith.constant 0 : i32
    return %c0_i32, %c0_i32_0 : i32, i32
  }
  func.func @transform_5(%arg0: i32) -> (i32, i32) {
    %c0_i32 = arith.constant 0 : i32
    %c0_i32_0 = arith.constant 0 : i32
    %c0_i32_1 = arith.constant 0 : i32
    return %c0_i32, %c0_i32_0 : i32, i32
  }
}

module attributes {stable_mosaic.version = 11 : i64} {
  func.func @_deconv_bn_kernel(%arg0: i32, %arg1: memref<32x288xbf16, #tpu.memory_space<vmem>>, %arg2: memref<288x64xbf16, #tpu.memory_space<vmem>>, %arg3: memref<64x16xf32, #tpu.memory_space<vmem>>, %arg4: memref<16x64xf32, #tpu.memory_space<vmem>>, %arg5: memref<1x16xf32, #tpu.memory_space<vmem>>, %arg6: memref<1x16xf32, #tpu.memory_space<vmem>>, %arg7: memref<32x64xf32, #tpu.memory_space<vmem>>) attributes {dimension_semantics = [#tpu.dimension_semantics<arbitrary>], iteration_bounds = array<i64: 1>, scalar_prefetch = 0 : i64, scratch_operands = 0 : i64, tpu.core_type = #tpu.core_type<tc>, window_params = [{pipeline_mode = #tpu.pipeline_mode<synchronous>, transform_indices = @transform_0, window_bounds = array<i64: 32, 288>}, {pipeline_mode = #tpu.pipeline_mode<synchronous>, transform_indices = @transform_1, window_bounds = array<i64: 288, 64>}, {pipeline_mode = #tpu.pipeline_mode<synchronous>, transform_indices = @transform_2, window_bounds = array<i64: 64, 16>}, {pipeline_mode = #tpu.pipeline_mode<synchronous>, transform_indices = @transform_3, window_bounds = array<i64: 16, 64>}, {pipeline_mode = #tpu.pipeline_mode<synchronous>, transform_indices = @transform_4, window_bounds = array<i64: 1, 16>}, {pipeline_mode = #tpu.pipeline_mode<synchronous>, transform_indices = @transform_5, window_bounds = array<i64: 1, 16>}, {pipeline_mode = #tpu.pipeline_mode<synchronous>, transform_indices = @transform_6, window_bounds = array<i64: 32, 64>}]} {
    %c0 = arith.constant 0 : index
    %c0_0 = arith.constant 0 : index
    %0 = vector.load %arg1[%c0, %c0_0] : memref<32x288xbf16, #tpu.memory_space<vmem>>, vector<32x288xbf16>
    %c0_1 = arith.constant 0 : index
    %c0_2 = arith.constant 0 : index
    %1 = vector.load %arg2[%c0_1, %c0_2] : memref<288x64xbf16, #tpu.memory_space<vmem>>, vector<288x64xbf16>
    %cst = arith.constant dense<0.000000e+00> : vector<32x64xf32>
    %2 = tpu.matmul %0, %1, %cst {dimension_numbers = #tpu.dot_dimension_numbers<[1], [0], [0], [1], [0, 0, 1, 1], [], []>} : vector<32x288xbf16>, vector<288x64xbf16>, vector<32x64xf32> -> vector<32x64xf32>
    %c0_3 = arith.constant 0 : index
    %c0_4 = arith.constant 0 : index
    %3 = vector.load %arg3[%c0_3, %c0_4] : memref<64x16xf32, #tpu.memory_space<vmem>>, vector<64x16xf32>
    %c0_5 = arith.constant 0 : index
    %c0_6 = arith.constant 0 : index
    %4 = vector.load %arg4[%c0_5, %c0_6] : memref<16x64xf32, #tpu.memory_space<vmem>>, vector<16x64xf32>
    %cst_7 = arith.constant dense<0.000000e+00> : vector<64xf32>
    %5 = vector.multi_reduction <add>, %2, %cst_7 [0] : vector<32x64xf32> to vector<64xf32>
    %6 = vector.shape_cast %5 : vector<64xf32> to vector<1x64xf32>
    %cst_8 = arith.constant dense<0.000000e+00> : vector<1x16xf32>
    %7 = tpu.matmul %6, %3, %cst_8 {dimension_numbers = #tpu.dot_dimension_numbers<[1], [0], [0], [1], [0, 0, 1, 1], [], []>} : vector<1x64xf32>, vector<64x16xf32>, vector<1x16xf32> -> vector<1x16xf32>
    %cst_9 = arith.constant 7.812500e-03 : f32
    %8 = vector.broadcast %cst_9 : f32 to vector<1x16xf32>
    %9 = arith.mulf %7, %8 : vector<1x16xf32>
    %cst_10 = arith.constant dense<0.000000e+00> : vector<1x64xf32>
    %10 = tpu.matmul %9, %4, %cst_10 {dimension_numbers = #tpu.dot_dimension_numbers<[1], [0], [0], [1], [0, 0, 1, 1], [], []>} : vector<1x16xf32>, vector<16x64xf32>, vector<1x64xf32> -> vector<1x64xf32>
    %11 = vector.broadcast %10 : vector<1x64xf32> to vector<32x64xf32>
    %12 = arith.subf %2, %11 : vector<32x64xf32>
    %13 = arith.mulf %12, %12 : vector<32x64xf32>
    %cst_11 = arith.constant dense<0.000000e+00> : vector<64xf32>
    %14 = vector.multi_reduction <add>, %13, %cst_11 [0] : vector<32x64xf32> to vector<64xf32>
    %15 = vector.shape_cast %14 : vector<64xf32> to vector<1x64xf32>
    %cst_12 = arith.constant dense<0.000000e+00> : vector<1x16xf32>
    %16 = tpu.matmul %15, %3, %cst_12 {dimension_numbers = #tpu.dot_dimension_numbers<[1], [0], [0], [1], [0, 0, 1, 1], [], []>} : vector<1x64xf32>, vector<64x16xf32>, vector<1x16xf32> -> vector<1x16xf32>
    %cst_13 = arith.constant 7.812500e-03 : f32
    %17 = vector.broadcast %cst_13 : f32 to vector<1x16xf32>
    %18 = arith.mulf %16, %17 : vector<1x16xf32>
    %c0_14 = arith.constant 0 : index
    %c0_15 = arith.constant 0 : index
    %19 = vector.load %arg5[%c0_14, %c0_15] : memref<1x16xf32, #tpu.memory_space<vmem>>, vector<1x16xf32>
    %cst_16 = arith.constant 9.99999974E-6 : f32
    %20 = vector.broadcast %cst_16 : f32 to vector<1x16xf32>
    %21 = arith.addf %18, %20 : vector<1x16xf32>
    %22 = math.rsqrt %21 : vector<1x16xf32>
    %23 = arith.mulf %19, %22 : vector<1x16xf32>
    %cst_17 = arith.constant dense<0.000000e+00> : vector<1x64xf32>
    %24 = tpu.matmul %23, %4, %cst_17 {dimension_numbers = #tpu.dot_dimension_numbers<[1], [0], [0], [1], [0, 0, 1, 1], [], []>} : vector<1x16xf32>, vector<16x64xf32>, vector<1x64xf32> -> vector<1x64xf32>
    %c0_18 = arith.constant 0 : index
    %c0_19 = arith.constant 0 : index
    %25 = vector.load %arg6[%c0_18, %c0_19] : memref<1x16xf32, #tpu.memory_space<vmem>>, vector<1x16xf32>
    %cst_20 = arith.constant dense<0.000000e+00> : vector<1x64xf32>
    %26 = tpu.matmul %25, %4, %cst_20 {dimension_numbers = #tpu.dot_dimension_numbers<[1], [0], [0], [1], [0, 0, 1, 1], [], []>} : vector<1x16xf32>, vector<16x64xf32>, vector<1x64xf32> -> vector<1x64xf32>
    %27 = vector.broadcast %24 : vector<1x64xf32> to vector<32x64xf32>
    %28 = arith.mulf %12, %27 : vector<32x64xf32>
    %29 = vector.broadcast %26 : vector<1x64xf32> to vector<32x64xf32>
    %30 = arith.addf %28, %29 : vector<32x64xf32>
    %cst_21 = arith.constant 0.000000e+00 : f32
    %31 = vector.broadcast %cst_21 : f32 to vector<32x64xf32>
    %32 = arith.maximumf %30, %31 : vector<32x64xf32>
    %c0_22 = arith.constant 0 : index
    %c0_23 = arith.constant 0 : index
    %33 = vector.load %arg7[%c0_22, %c0_23] : memref<32x64xf32, #tpu.memory_space<vmem>>, vector<32x64xf32>
    tpu.vector_store %arg7[%c0_22, %c0_23], %32 {strides = array<i32>} : memref<32x64xf32, #tpu.memory_space<vmem>>, vector<32x64xf32>,
    return
  }
  func.func @transform_0(%arg0: i32) -> (i32, i32) {
    %c0_i32 = arith.constant 0 : i32
    %c0_i32_0 = arith.constant 0 : i32
    %c0_i32_1 = arith.constant 0 : i32
    return %c0_i32, %c0_i32_0 : i32, i32
  }
  func.func @transform_1(%arg0: i32) -> (i32, i32) {
    %c0_i32 = arith.constant 0 : i32
    %c0_i32_0 = arith.constant 0 : i32
    %c0_i32_1 = arith.constant 0 : i32
    return %c0_i32, %c0_i32_0 : i32, i32
  }
  func.func @transform_2(%arg0: i32) -> (i32, i32) {
    %c0_i32 = arith.constant 0 : i32
    %c0_i32_0 = arith.constant 0 : i32
    %c0_i32_1 = arith.constant 0 : i32
    return %c0_i32, %c0_i32_0 : i32, i32
  }
  func.func @transform_3(%arg0: i32) -> (i32, i32) {
    %c0_i32 = arith.constant 0 : i32
    %c0_i32_0 = arith.constant 0 : i32
    %c0_i32_1 = arith.constant 0 : i32
    return %c0_i32, %c0_i32_0 : i32, i32
  }
  func.func @transform_4(%arg0: i32) -> (i32, i32) {
    %c0_i32 = arith.constant 0 : i32
    %c0_i32_0 = arith.constant 0 : i32
    %c0_i32_1 = arith.constant 0 : i32
    return %c0_i32, %c0_i32_0 : i32, i32
  }
  func.func @transform_5(%arg0: i32) -> (i32, i32) {
    %c0_i32 = arith.constant 0 : i32
    %c0_i32_0 = arith.constant 0 : i32
    %c0_i32_1 = arith.constant 0 : i32
    return %c0_i32, %c0_i32_0 : i32, i32
  }
  func.func @transform_6(%arg0: i32) -> (i32, i32) {
    %c0_i32 = arith.constant 0 : i32
    %c0_i32_0 = arith.constant 0 : i32
    %c0_i32_1 = arith.constant 0 : i32
    return %c0_i32, %c0_i32_0 : i32, i32
  }
}

module attributes {stable_mosaic.version = 11 : i64} {
  func.func @_deconv_bn_kernel(%arg0: i32, %arg1: memref<128x144xbf16, #tpu.memory_space<vmem>>, %arg2: memref<144x32xbf16, #tpu.memory_space<vmem>>, %arg3: memref<32x8xf32, #tpu.memory_space<vmem>>, %arg4: memref<8x32xf32, #tpu.memory_space<vmem>>, %arg5: memref<1x8xf32, #tpu.memory_space<vmem>>, %arg6: memref<1x8xf32, #tpu.memory_space<vmem>>, %arg7: memref<128x32xf32, #tpu.memory_space<vmem>>) attributes {dimension_semantics = [#tpu.dimension_semantics<arbitrary>], iteration_bounds = array<i64: 1>, scalar_prefetch = 0 : i64, scratch_operands = 0 : i64, tpu.core_type = #tpu.core_type<tc>, window_params = [{pipeline_mode = #tpu.pipeline_mode<synchronous>, transform_indices = @transform_0, window_bounds = array<i64: 128, 144>}, {pipeline_mode = #tpu.pipeline_mode<synchronous>, transform_indices = @transform_1, window_bounds = array<i64: 144, 32>}, {pipeline_mode = #tpu.pipeline_mode<synchronous>, transform_indices = @transform_2, window_bounds = array<i64: 32, 8>}, {pipeline_mode = #tpu.pipeline_mode<synchronous>, transform_indices = @transform_3, window_bounds = array<i64: 8, 32>}, {pipeline_mode = #tpu.pipeline_mode<synchronous>, transform_indices = @transform_4, window_bounds = array<i64: 1, 8>}, {pipeline_mode = #tpu.pipeline_mode<synchronous>, transform_indices = @transform_5, window_bounds = array<i64: 1, 8>}, {pipeline_mode = #tpu.pipeline_mode<synchronous>, transform_indices = @transform_6, window_bounds = array<i64: 128, 32>}]} {
    %c0 = arith.constant 0 : index
    %c0_0 = arith.constant 0 : index
    %0 = vector.load %arg1[%c0, %c0_0] : memref<128x144xbf16, #tpu.memory_space<vmem>>, vector<128x144xbf16>
    %c0_1 = arith.constant 0 : index
    %c0_2 = arith.constant 0 : index
    %1 = vector.load %arg2[%c0_1, %c0_2] : memref<144x32xbf16, #tpu.memory_space<vmem>>, vector<144x32xbf16>
    %cst = arith.constant dense<0.000000e+00> : vector<128x32xf32>
    %2 = tpu.matmul %0, %1, %cst {dimension_numbers = #tpu.dot_dimension_numbers<[1], [0], [0], [1], [0, 0, 1, 1], [], []>} : vector<128x144xbf16>, vector<144x32xbf16>, vector<128x32xf32> -> vector<128x32xf32>
    %c0_3 = arith.constant 0 : index
    %c0_4 = arith.constant 0 : index
    %3 = vector.load %arg3[%c0_3, %c0_4] : memref<32x8xf32, #tpu.memory_space<vmem>>, vector<32x8xf32>
    %c0_5 = arith.constant 0 : index
    %c0_6 = arith.constant 0 : index
    %4 = vector.load %arg4[%c0_5, %c0_6] : memref<8x32xf32, #tpu.memory_space<vmem>>, vector<8x32xf32>
    %cst_7 = arith.constant dense<0.000000e+00> : vector<32xf32>
    %5 = vector.multi_reduction <add>, %2, %cst_7 [0] : vector<128x32xf32> to vector<32xf32>
    %6 = vector.shape_cast %5 : vector<32xf32> to vector<1x32xf32>
    %cst_8 = arith.constant dense<0.000000e+00> : vector<1x8xf32>
    %7 = tpu.matmul %6, %3, %cst_8 {dimension_numbers = #tpu.dot_dimension_numbers<[1], [0], [0], [1], [0, 0, 1, 1], [], []>} : vector<1x32xf32>, vector<32x8xf32>, vector<1x8xf32> -> vector<1x8xf32>
    %cst_9 = arith.constant 0.001953125 : f32
    %8 = vector.broadcast %cst_9 : f32 to vector<1x8xf32>
    %9 = arith.mulf %7, %8 : vector<1x8xf32>
    %cst_10 = arith.constant dense<0.000000e+00> : vector<1x32xf32>
    %10 = tpu.matmul %9, %4, %cst_10 {dimension_numbers = #tpu.dot_dimension_numbers<[1], [0], [0], [1], [0, 0, 1, 1], [], []>} : vector<1x8xf32>, vector<8x32xf32>, vector<1x32xf32> -> vector<1x32xf32>
    %11 = vector.broadcast %10 : vector<1x32xf32> to vector<128x32xf32>
    %12 = arith.subf %2, %11 : vector<128x32xf32>
    %13 = arith.mulf %12, %12 : vector<128x32xf32>
    %cst_11 = arith.constant dense<0.000000e+00> : vector<32xf32>
    %14 = vector.multi_reduction <add>, %13, %cst_11 [0] : vector<128x32xf32> to vector<32xf32>
    %15 = vector.shape_cast %14 : vector<32xf32> to vector<1x32xf32>
    %cst_12 = arith.constant dense<0.000000e+00> : vector<1x8xf32>
    %16 = tpu.matmul %15, %3, %cst_12 {dimension_numbers = #tpu.dot_dimension_numbers<[1], [0], [0], [1], [0, 0, 1, 1], [], []>} : vector<1x32xf32>, vector<32x8xf32>, vector<1x8xf32> -> vector<1x8xf32>
    %cst_13 = arith.constant 0.001953125 : f32
    %17 = vector.broadcast %cst_13 : f32 to vector<1x8xf32>
    %18 = arith.mulf %16, %17 : vector<1x8xf32>
    %c0_14 = arith.constant 0 : index
    %c0_15 = arith.constant 0 : index
    %19 = vector.load %arg5[%c0_14, %c0_15] : memref<1x8xf32, #tpu.memory_space<vmem>>, vector<1x8xf32>
    %cst_16 = arith.constant 9.99999974E-6 : f32
    %20 = vector.broadcast %cst_16 : f32 to vector<1x8xf32>
    %21 = arith.addf %18, %20 : vector<1x8xf32>
    %22 = math.rsqrt %21 : vector<1x8xf32>
    %23 = arith.mulf %19, %22 : vector<1x8xf32>
    %cst_17 = arith.constant dense<0.000000e+00> : vector<1x32xf32>
    %24 = tpu.matmul %23, %4, %cst_17 {dimension_numbers = #tpu.dot_dimension_numbers<[1], [0], [0], [1], [0, 0, 1, 1], [], []>} : vector<1x8xf32>, vector<8x32xf32>, vector<1x32xf32> -> vector<1x32xf32>
    %c0_18 = arith.constant 0 : index
    %c0_19 = arith.constant 0 : index
    %25 = vector.load %arg6[%c0_18, %c0_19] : memref<1x8xf32, #tpu.memory_space<vmem>>, vector<1x8xf32>
    %cst_20 = arith.constant dense<0.000000e+00> : vector<1x32xf32>
    %26 = tpu.matmul %25, %4, %cst_20 {dimension_numbers = #tpu.dot_dimension_numbers<[1], [0], [0], [1], [0, 0, 1, 1], [], []>} : vector<1x8xf32>, vector<8x32xf32>, vector<1x32xf32> -> vector<1x32xf32>
    %27 = vector.broadcast %24 : vector<1x32xf32> to vector<128x32xf32>
    %28 = arith.mulf %12, %27 : vector<128x32xf32>
    %29 = vector.broadcast %26 : vector<1x32xf32> to vector<128x32xf32>
    %30 = arith.addf %28, %29 : vector<128x32xf32>
    %cst_21 = arith.constant 0.000000e+00 : f32
    %31 = vector.broadcast %cst_21 : f32 to vector<128x32xf32>
    %32 = arith.maximumf %30, %31 : vector<128x32xf32>
    %c0_22 = arith.constant 0 : index
    %c0_23 = arith.constant 0 : index
    %33 = vector.load %arg7[%c0_22, %c0_23] : memref<128x32xf32, #tpu.memory_space<vmem>>, vector<128x32xf32>
    tpu.vector_store %arg7[%c0_22, %c0_23], %32 {strides = array<i32>} : memref<128x32xf32, #tpu.memory_space<vmem>>, vector<128x32xf32>,
    return
  }
  func.func @transform_0(%arg0: i32) -> (i32, i32) {
    %c0_i32 = arith.constant 0 : i32
    %c0_i32_0 = arith.constant 0 : i32
    %c0_i32_1 = arith.constant 0 : i32
    return %c0_i32, %c0_i32_0 : i32, i32
  }
  func.func @transform_1(%arg0: i32) -> (i32, i32) {
    %c0_i32 = arith.constant 0 : i32
    %c0_i32_0 = arith.constant 0 : i32
    %c0_i32_1 = arith.constant 0 : i32
    return %c0_i32, %c0_i32_0 : i32, i32
  }
  func.func @transform_2(%arg0: i32) -> (i32, i32) {
    %c0_i32 = arith.constant 0 : i32
    %c0_i32_0 = arith.constant 0 : i32
    %c0_i32_1 = arith.constant 0 : i32
    return %c0_i32, %c0_i32_0 : i32, i32
  }
  func.func @transform_3(%arg0: i32) -> (i32, i32) {
    %c0_i32 = arith.constant 0 : i32
    %c0_i32_0 = arith.constant 0 : i32
    %c0_i32_1 = arith.constant 0 : i32
    return %c0_i32, %c0_i32_0 : i32, i32
  }
  func.func @transform_4(%arg0: i32) -> (i32, i32) {
    %c0_i32 = arith.constant 0 : i32
    %c0_i32_0 = arith.constant 0 : i32
    %c0_i32_1 = arith.constant 0 : i32
    return %c0_i32, %c0_i32_0 : i32, i32
  }
  func.func @transform_5(%arg0: i32) -> (i32, i32) {
    %c0_i32 = arith.constant 0 : i32
    %c0_i32_0 = arith.constant 0 : i32
    %c0_i32_1 = arith.constant 0 : i32
    return %c0_i32, %c0_i32_0 : i32, i32
  }
  func.func @transform_6(%arg0: i32) -> (i32, i32) {
    %c0_i32 = arith.constant 0 : i32
    %c0_i32_0 = arith.constant 0 : i32
    %c0_i32_1 = arith.constant 0 : i32
    return %c0_i32, %c0_i32_0 : i32, i32
  }
}

module attributes {stable_mosaic.version = 11 : i64} {
  func.func @_matmul_tanh_kernel(%arg0: i32, %arg1: memref<512x72xbf16, #tpu.memory_space<vmem>>, %arg2: memref<72x12xbf16, #tpu.memory_space<vmem>>, %arg3: memref<512x12xf32, #tpu.memory_space<vmem>>) attributes {dimension_semantics = [#tpu.dimension_semantics<arbitrary>], iteration_bounds = array<i64: 1>, scalar_prefetch = 0 : i64, scratch_operands = 0 : i64, tpu.core_type = #tpu.core_type<tc>, window_params = [{pipeline_mode = #tpu.pipeline_mode<synchronous>, transform_indices = @transform_0, window_bounds = array<i64: 512, 72>}, {pipeline_mode = #tpu.pipeline_mode<synchronous>, transform_indices = @transform_1, window_bounds = array<i64: 72, 12>}, {pipeline_mode = #tpu.pipeline_mode<synchronous>, transform_indices = @transform_2, window_bounds = array<i64: 512, 12>}]} {
    %c0 = arith.constant 0 : index
    %c0_0 = arith.constant 0 : index
    %0 = vector.load %arg1[%c0, %c0_0] : memref<512x72xbf16, #tpu.memory_space<vmem>>, vector<512x72xbf16>
    %c0_1 = arith.constant 0 : index
    %c0_2 = arith.constant 0 : index
    %1 = vector.load %arg2[%c0_1, %c0_2] : memref<72x12xbf16, #tpu.memory_space<vmem>>, vector<72x12xbf16>
    %cst = arith.constant dense<0.000000e+00> : vector<512x12xf32>
    %2 = tpu.matmul %0, %1, %cst {dimension_numbers = #tpu.dot_dimension_numbers<[1], [0], [0], [1], [0, 0, 1, 1], [], []>} : vector<512x72xbf16>, vector<72x12xbf16>, vector<512x12xf32> -> vector<512x12xf32>
    %3 = math.tanh %2 : vector<512x12xf32>
    %c0_3 = arith.constant 0 : index
    %c0_4 = arith.constant 0 : index
    %4 = vector.load %arg3[%c0_3, %c0_4] : memref<512x12xf32, #tpu.memory_space<vmem>>, vector<512x12xf32>
    tpu.vector_store %arg3[%c0_3, %c0_4], %3 {strides = array<i32>} : memref<512x12xf32, #tpu.memory_space<vmem>>, vector<512x12xf32>,
    return
  }
  func.func @transform_0(%arg0: i32) -> (i32, i32) {
    %c0_i32 = arith.constant 0 : i32
    %c0_i32_0 = arith.constant 0 : i32
    %c0_i32_1 = arith.constant 0 : i32
    return %c0_i32, %c0_i32_0 : i32, i32
  }
  func.func @transform_1(%arg0: i32) -> (i32, i32) {
    %c0_i32 = arith.constant 0 : i32
    %c0_i32_0 = arith.constant 0 : i32
    %c0_i32_1 = arith.constant 0 : i32
    return %c0_i32, %c0_i32_0 : i32, i32
  }
  func.func @transform_2(%arg0: i32) -> (i32, i32) {
    %c0_i32 = arith.constant 0 : i32
    %c0_i32_0 = arith.constant 0 : i32
    %c0_i32_1 = arith.constant 0 : i32
    return %c0_i32, %c0_i32_0 : i32, i32
  }
}

</mosaic_0001>

<bundles_post_ra>
// kernel: generator_stage2.7
= control target key start
LH: loop header
LB: loop body
LE: loop exit
PB: predicated region body
PF: predicated region fallthrough
CT: control target
= control target key end

     0   :  { %vm98_vm0 = vcmask 392192   ;;  %vm786_vm1 = vcmask 130048   ;;  %vm787_vm14 = vcmask 130048   ;;  %s781_s1 = inlined_call_operand.vmem [shape: bf16[48,16], index: 1, kind: input, shape index: {}]   ;;  %s782_s0 = inlined_call_operand.vmem [shape: bf16[128,48], index: 0, kind: input, shape index: {}]   ;;  %s783_s2 = inlined_call_operand.vmem [shape: f32[1,16], index: 2, kind: input, shape index: {}]   ;;  %s784_s3 = inlined_call_operand.vmem [shape: f32[1,16], index: 3, kind: input, shape index: {}]   ;;  %s785_s4 = inlined_call_operand.vmem [shape: f32[128,16], index: 4, kind: output, shape index: {}]  }
   0x1   :  { %v505_v0 = vld [vmem:[%s781_s1 + $0x10] sm:$0xff]   ;;  %v506_v1 = vld [vmem:[%s781_s1 + $0x8] sm:$0xff]   ;;  %v508_v2 = vld [vmem:[%s782_s0] sm:$0xff]  }
   0x2   :  { %477 = vmatprep.subr.bf16.mxu0 %v505_v0  ;;  %499 = vmatprep.subr.bf16.mxu1 %v505_v0  ;;  %v507_v3 = vld [vmem:[%s781_s1] sm:$0xff]   ;;  %v509_v5 = vld [vmem:[%s782_s0 + $0x8] sm:$0xff]   ;;  %v510_v7 = vld [vmem:[%s782_s0 + $0x10] sm:$0xff]  }
   0x3   :  { %478 = vmatpush3.bf16.msra.mxu0 %v505_v0  ;;  %502 = vmatpush3.bf16.msra.mxu1 %v505_v0  ;;  %v512_v4 = vld [vmem:[%s782_s0 + $0x20] sm:$0xff]   ;;  %v513_v6 = vld [vmem:[%s782_s0 + $0x28] sm:$0xff]   ;;  %v514_v8 = vld [vmem:[%s782_s0 + $0x30] sm:$0xff]  }
   0x4   :  { %479 = vmatprep.subr.bf16.mxu0 %v506_v1  ;;  %500 = vmatprep.subr.bf16.mxu1 %v506_v1  ;;  %v511_v9 = vld [vmem:[%s782_s0 + $0x18] sm:$0xff]  }
   0x5   :  { %483 = vmatprep.mubr.msk.bf16.mxu0 %vm98_vm0, %v508_v2  ;;  %491 = vmatprep.mubr.msk.bf16.mxu1 %vm98_vm0, %v512_v4  ;;  %v515_v10 = vld [vmem:[%s782_s0 + $0x38] sm:$0xff]  }
   0x7   :  { %480 = vmatpush3.bf16.msra.mxu0 %v506_v1  ;;  %503 = vmatpush3.bf16.msra.mxu1 %v506_v1 }
   0x8   :  { %481 = vmatprep.subr.bf16.mxu0 %v507_v3  ;;  %501 = vmatprep.subr.bf16.mxu1 %v507_v3 }
   0xb   :  { %482 = vmatpush3.bf16.msra.mxu0 %v507_v3  ;;  %504 = vmatpush3.bf16.msra.mxu1 %v507_v3 }
   0xe   :  { %484 = vmatmul.mubr.msk.bf16.vlgmr.msra.gmra.mxu0 %vm98_vm0, %v509_v5  ;;  %492 = vmatmul.mubr.msk.bf16.vlgmr.msra.gmra.mxu1 %vm98_vm0, %v513_v6 }
   0xf   :  { %487 = vmatprep.mubr.msk.bf16.mxu0 %vm98_vm0, %v510_v7  ;;  %495 = vmatprep.mubr.msk.bf16.mxu1 %vm98_vm0, %v514_v8 }
  0x16   :  { %488 = vmatmul.mubr.msk.bf16.gmra.mxu0 %vm98_vm0, %v511_v9  ;;  %496 = vmatmul.mubr.msk.bf16.gmra.mxu1 %vm98_vm0, %v515_v10 }
  0xce   :  { %v485_v11 = vpop.f32.mrf.mxu0  ;;  %v584_v12 = vpop.f32.mrf.mxu1 }
  0xcf   :  { %v224_v22 = vsel %vm786_vm1, %v485_v11, 0.0  ;;  %v240_v45 = vsel %vm786_vm1, %v584_v12, 0.0 }
  0xd0   :  { %v157_v13 = vpop.f32.mrf.mxu0  ;;  %v586_v15 = vpop.f32.mrf.mxu1 }
  0xd1   :  { %v221_v17 = vsel %vm786_vm1, %v157_v13, 0.0  ;;  %v236_v40 = vsel %vm786_vm1, %v586_v15, 0.0 }
  0xd2   :  { %v486_v14 = vpop.f32.mrf.mxu0  ;;  %v590_v21 = vpop.f32.mrf.mxu1 }
  0xd3   :  { %v226_v25 = vsel %vm786_vm1, %v486_v14, 0.0  ;;  %v242_v47 = vsel %vm786_vm1, %v590_v21, 0.0 }
  0xd4   :  { %v160_v16 = vpop.f32.mrf.mxu0  ;;  %v192_v28 = vpop.f32.mrf.mxu1 }
  0xd5   :  { %v222_v18 = vsel %vm786_vm1, %v160_v16, 0.0  ;;  %v238_v42 = vsel %vm786_vm1, %v192_v28, 0.0 }
  0xd6   :  { %v223_v19 = vadd.f32 %v222_v18, %v221_v17  ;;  %v489_v20 = vpop.f32.mrf.mxu0  ;;  %v596_v34 = vpop.f32.mrf.mxu1 }
  0xd7   :  { %v232_v35 = vsel %vm786_vm1, %v489_v20, 0.0  ;;  %v248_v54 = vsel %vm786_vm1, %v596_v34, 0.0 }
  0xd8   :  { %v225_v23 = vadd.f32 %v224_v22, %v223_v19  ;;  %v173_v24 = vpop.f32.mrf.mxu0  ;;  %v600_v39 = vpop.f32.mrf.mxu1 }
  0xd9   :  { %v228_v29 = vsel %vm786_vm1, %v173_v24, 0.0  ;;  %v244_v50 = vsel %vm786_vm1, %v600_v39, 0.0 }
  0xda   :  { %v227_v26 = vadd.f32 %v226_v25, %v225_v23  ;;  %v490_v27 = vpop.f32.mrf.mxu0  ;;  %v605_v44 = vpop.f32.mrf.mxu1 }
  0xdb   :  { %v234_v37 = vsel %vm786_vm1, %v490_v27, 0.0  ;;  %v250_v56 = vsel %vm786_vm1, %v605_v44, 0.0 }
  0xdc   :  { %v229_v30 = vadd.f32 %v228_v29, %v227_v26  ;;  %v176_v31 = vpop.f32.mrf.mxu0  ;;  %v208_v49 = vpop.f32.mrf.mxu1 }
  0xdd   :  { %v230_v32 = vsel %vm786_vm1, %v176_v31, 0.0  ;;  %v246_v52 = vsel %vm786_vm1, %v208_v49, 0.0 }
  0xde   :  { %v231_v33 = vadd.f32 %v230_v32, %v229_v30 }
  0xe0   :  { %v233_v36 = vadd.f32 %v232_v35, %v231_v33 }
  0xe2   :  { %v235_v38 = vadd.f32 %v234_v37, %v233_v36 }
  0xe4   :  { %v237_v41 = vadd.f32 %v236_v40, %v235_v38 }
  0xe6   :  { %v239_v43 = vadd.f32 %v238_v42, %v237_v41 }
  0xe8   :  { %v241_v46 = vadd.f32 %v240_v45, %v239_v43 }
  0xea   :  { %v243_v48 = vadd.f32 %v242_v47, %v241_v46 }
  0xec   :  { %v245_v51 = vadd.f32 %v244_v50, %v243_v48 }
  0xee   :  { %v247_v53 = vadd.f32 %v246_v52, %v245_v51 }
  0xf0   :  { %v249_v55 = vadd.f32 %v248_v54, %v247_v53 }
  0xf2   :  { %v251_v57 = vadd.f32 %v250_v56, %v249_v55 }
  0xf4   :  { %v252_v58 = vrot.slane %v251_v57, 4 }
  0xf6   :  { %v253_v59 = vadd.f32 %v252_v58, %v251_v57 }
  0xf8   :  { %v254_v60 = vrot.slane %v253_v59, 2 }
  0xfa   :  { %v255_v61 = vadd.f32 %v254_v60, %v253_v59 }
  0xfc   :  { %v256_v62 = vrot.slane %v255_v61, 1 }
  0xfe   :  { %v257_v63 = vadd.f32 %v256_v62, %v255_v61 }
 0x100   :  { %v258_v0 = vmul.f32 0.0078125, %v257_v63 }
 0x102   :  { %v618_v1 = vsub.f32 %v157_v13, %v258_v0  ;;  %v620_v2 = vsub.f32 %v160_v16, %v258_v0  ;;  %v622_v3 = vsub.f32 %v485_v11, %v258_v0  ;;  %v624_v4 = vsub.f32 %v486_v14, %v258_v0 }
 0x103   :  { %v630_v7 = vsub.f32 %v173_v24, %v258_v0  ;;  %v634_v9 = vsub.f32 %v176_v31, %v258_v0  ;;  %v640_v16 = vsub.f32 %v489_v20, %v258_v0  ;;  %v645_v22 = vsub.f32 %v490_v27, %v258_v0 }
 0x104   :  { %v275_v5 = vmul.f32 %v618_v1, %v618_v1  ;;  %v276_v6 = vmul.f32 %v620_v2, %v620_v2  ;;  %v277_v8 = vmul.f32 %v622_v3, %v622_v3  ;;  %v278_v10 = vmul.f32 %v624_v4, %v624_v4 }
 0x105   :  { %v279_v17 = vmul.f32 %v630_v7, %v630_v7  ;;  %v280_v23 = vmul.f32 %v634_v9, %v634_v9  ;;  %v651_v26 = vsub.f32 %v586_v15, %v258_v0  ;;  %v281_v20 = vmul.f32 %v640_v16, %v640_v16 }
 0x106   :  { %v291_v11 = vsel %vm786_vm1, %v275_v5, 0.0  ;;  %v292_v13 = vsel %vm786_vm1, %v276_v6, 0.0  ;;  %v294_v18 = vsel %vm786_vm1, %v277_v8, 0.0  ;;  %v296_v24 = vsel %vm786_vm1, %v278_v10, 0.0 }
 0x107   :  { %v293_v14 = vadd.f32 %v292_v13, %v291_v11  ;;  %v298_v29 = vsel %vm786_vm1, %v279_v17, 0.0  ;;  %v656_v31 = vsub.f32 %v192_v28, %v258_v0  ;;  %v282_v27 = vmul.f32 %v645_v22, %v645_v22 }
 0x108   :  { %v300_v32 = vsel %vm786_vm1, %v280_v23, 0.0  ;;  %v662_v35 = vsub.f32 %v584_v12, %v258_v0  ;;  %v283_v15 = vmul.f32 %v651_v26, %v651_v26  ;;  %v302_v36 = vsel %vm786_vm1, %v281_v20, 0.0 }
 0x109   :  { %v295_v19 = vadd.f32 %v294_v18, %v293_v14  ;;  %v270_v38 = vsub.f32 %v590_v21, %v258_v0  ;;  %v284_v28 = vmul.f32 %v656_v31, %v656_v31  ;;  %v304_v40 = vsel %vm786_vm1, %v282_v27, 0.0 }
 0x10a   :  { %v271_v42 = vsub.f32 %v600_v39, %v258_v0  ;;  %v285_v12 = vmul.f32 %v662_v35, %v662_v35  ;;  %v306_v43 = vsel %vm786_vm1, %v283_v15, 0.0  ;;  %v272_v46 = vsub.f32 %v208_v49, %v258_v0 }
 0x10b   :  { %v297_v25 = vadd.f32 %v296_v24, %v295_v19  ;;  %v286_v47 = vmul.f32 %v270_v38, %v270_v38  ;;  %v308_v48 = vsel %vm786_vm1, %v284_v28, 0.0  ;;  %v273_v21 = vsub.f32 %v596_v34, %v258_v0  ;;  %v329_v19 = vld [vmem:[%s783_s2] sm:$0x1] }
 0x10c   :  { %v287_v51 = vmul.f32 %v271_v42, %v271_v42  ;;  %v310_v52 = vsel %vm786_vm1, %v285_v12, 0.0  ;;  %v274_v54 = vsub.f32 %v605_v44, %v258_v0  ;;  %v288_v39 = vmul.f32 %v272_v46, %v272_v46  ;;  %v465_v28 = vld [vmem:[%s784_s3] ss:$0 sm:$0xff] }
 0x10d   :  { %v299_v30 = vadd.f32 %v298_v29, %v297_v25  ;;  %v312_v55 = vsel %vm786_vm1, %v286_v47, 0.0  ;;  %v289_v57 = vmul.f32 %v273_v21, %v273_v21  ;;  %v334_v17 = vlaneseq }
 0x10e   :  { %v314_v58 = vsel %vm786_vm1, %v287_v51, 0.0  ;;  %v290_v59 = vmul.f32 %v274_v54, %v274_v54  ;;  %v316_v60 = vsel %vm786_vm1, %v288_v39, 0.0 }
 0x10f   :  { %v301_v33 = vadd.f32 %v300_v32, %v299_v30  ;;  %v318_v34 = vsel %vm786_vm1, %v289_v57, 0.0  ;;  %v335_v18 = vshrl.u32 %v334_v17, 7 }
 0x110   :  { %v320_v63 = vsel %vm786_vm1, %v290_v59, 0.0  ;;  %vm788_vm1 = vmmov %vm787_vm14 }
 0x111   :  { %v303_v37 = vadd.f32 %v302_v36, %v301_v33  ;;  %v336_v23 = vsub.s32 0, %v335_v18 }
 0x113   :  { %v305_v41 = vadd.f32 %v304_v40, %v303_v37 }
 0x115   :  { %v307_v45 = vadd.f32 %v306_v43, %v305_v41 }
 0x117   :  { %v309_v50 = vadd.f32 %v308_v48, %v307_v45 }
 0x119   :  { %v311_v53 = vadd.f32 %v310_v52, %v309_v50 }
 0x11b   :  { %v313_v56 = vadd.f32 %v312_v55, %v311_v53 }
 0x11d   :  { %v315_v49 = vadd.f32 %v314_v58, %v313_v56 }
 0x11f   :  { %v317_v61 = vadd.f32 %v316_v60, %v315_v49 }
 0x121   :  { %v319_v62 = vadd.f32 %v318_v34, %v317_v61 }
 0x123   :  { %v321_v5 = vadd.f32 %v320_v63, %v319_v62 }
 0x125   :  { %v322_v6 = vrot.slane %v321_v5, 4 }
 0x127   :  { %v323_v44 = vadd.f32 %v322_v6, %v321_v5 }
 0x129   :  { %v324_v0 = vrot.slane %v323_v44, 2 }
 0x12b   :  { %v325_v8 = vadd.f32 %v324_v0, %v323_v44 }
 0x12d   :  { %v326_v10 = vrot.slane %v325_v8, 1 }
 0x12f   :  { %v327_v11 = vadd.f32 %v326_v10, %v325_v8 }
 0x131   :  { %v328_v13 = vmul.f32 0.0078125, %v327_v11 }
 0x133   :  { %v330_v14 = vadd.f32 1e-05, %v328_v13 }
 0x135   :  { %516 = vrsqrt.f32 %v330_v14 }
 0x142   :  { %v517_v24 = vpop.eup %516 }
 0x143   :  { %v332_v25 = vmul.f32 %v517_v24, %v329_v19 }
 0x145   :  { %v337_v20 = vrot.slane %v332_v25, %v336_v23 }
 0x147   :  { %v339_v29 = vmul.f32 %v337_v20, %v618_v1  ;;  %v340_v30 = vmul.f32 %v337_v20, %v620_v2  ;;  %v341_v27 = vmul.f32 %v337_v20, %v622_v3  ;;  %v342_v32 = vmul.f32 %v337_v20, %v624_v4 }
 0x148   :  { %v343_v33 = vmul.f32 %v337_v20, %v630_v7  ;;  %v344_v15 = vmul.f32 %v337_v20, %v634_v9  ;;  %v345_v36 = vmul.f32 %v337_v20, %v640_v16  ;;  %v346_v37 = vmul.f32 %v337_v20, %v645_v22 }
 0x149   :  { %v347_v1 = vmul.f32 %v337_v20, %v651_v26  ;;  %v348_v2 = vmul.f32 %v337_v20, %v656_v31  ;;  %v349_v3 = vmul.f32 %v337_v20, %v662_v35  ;;  %v350_v40 = vmul.f32 %v337_v20, %v270_v38 }
 0x14a   :  { %v351_v4 = vmul.f32 %v337_v20, %v271_v42  ;;  %v352_v41 = vmul.f32 %v337_v20, %v272_v46  ;;  %v353_v7 = vmul.f32 %v337_v20, %v273_v21  ;;  %v354_v12 = vmul.f32 %v337_v20, %v274_v54 }
 0x14b   :  { %v362_v9 = vadd.f32 %v465_v28, %v339_v29  ;;  %v363_v43 = vadd.f32 %v465_v28, %v340_v30  ;;  %v364_v16 = vadd.f32 %v465_v28, %v341_v27  ;;  %v365_v45 = vadd.f32 %v465_v28, %v342_v32 }
 0x14c   :  { %v366_v22 = vadd.f32 %v465_v28, %v343_v33  ;;  %v367_v47 = vadd.f32 %v465_v28, %v344_v15  ;;  %v368_v48 = vadd.f32 %v465_v28, %v345_v36  ;;  %v369_v50 = vadd.f32 %v465_v28, %v346_v37 }
 0x14d   :  { %v370_v51 = vadd.f32 %v465_v28, %v347_v1  ;;  %v371_v52 = vadd.f32 %v465_v28, %v348_v2  ;;  %v372_v26 = vadd.f32 %v465_v28, %v349_v3  ;;  %v373_v53 = vadd.f32 %v465_v28, %v350_v40 }
 0x14e   :  { %v374_v31 = vadd.f32 %v465_v28, %v351_v4  ;;  %v375_v39 = vadd.f32 %v465_v28, %v352_v41  ;;  %v376_v35 = vadd.f32 %v465_v28, %v353_v7  ;;  %v377_v38 = vadd.f32 %v465_v28, %v354_v12 }
 0x14f   :  { %vm378_vm2 = vcmp.ge.f32.partialorder %v362_v9, 0.0  ;;  %vm379_vm3 = vcmp.ge.f32.partialorder %v363_v43, 0.0  ;;  %vm380_vm4 = vcmp.ge.f32.partialorder %v364_v16, 0.0  ;;  %vm381_vm5 = vcmp.ge.f32.partialorder %v365_v45, 0.0 }
 0x150   :  { %vm382_vm6 = vcmp.ge.f32.partialorder %v366_v22, 0.0  ;;  %vm383_vm7 = vcmp.ge.f32.partialorder %v367_v47, 0.0  ;;  %vm384_vm8 = vcmp.ge.f32.partialorder %v368_v48, 0.0  ;;  %vm385_vm9 = vcmp.ge.f32.partialorder %v369_v50, 0.0 }
 0x151   :  { %vm386_vm10 = vcmp.ge.f32.partialorder %v370_v51, 0.0  ;;  %vm387_vm11 = vcmp.ge.f32.partialorder %v371_v52, 0.0  ;;  %vm388_vm12 = vcmp.ge.f32.partialorder %v372_v26, 0.0  ;;  %vm389_vm13 = vcmp.ge.f32.partialorder %v373_v53, 0.0 }
 0x152   :  { %vm391_vm15 = vcmp.ge.f32.partialorder %v375_v39, 0.0  ;;  %vm392_vm0 = vcmp.ge.f32.partialorder %v376_v35, 0.0  ;;  %v394_v42 = vmul.f32 0.2, %v362_v9  ;;  %v395_v46 = vmul.f32 0.2, %v363_v43 }
 0x153   :  { %v396_v21 = vmul.f32 0.2, %v364_v16  ;;  %v397_v54 = vmul.f32 0.2, %v365_v45  ;;  %v398_v55 = vmul.f32 0.2, %v366_v22 }
 0x154   :  { %v399_v56 = vmul.f32 0.2, %v367_v47  ;;  %v400_v57 = vmul.f32 0.2, %v368_v48  ;;  %v401_v58 = vmul.f32 0.2, %v369_v50  ;;  %v410_v59 = vsel %vm378_vm2, %v362_v9, %v394_v42  ;;  %vm789_vm2 = vmmov %vm788_vm1 }
 0x155   :  { %v402_v49 = vmul.f32 0.2, %v370_v51  ;;  %v403_v60 = vmul.f32 0.2, %v371_v52  ;;  %v404_v61 = vmul.f32 0.2, %v372_v26  ;;  %v411_v62 = vsel %vm379_vm3, %v363_v43, %v395_v46  ;;  %vm790_vm3 = vmmov %vm788_vm1 }
 0x156   :  { %v405_v34 = vmul.f32 0.2, %v373_v53  ;;  %426 = vst.msk [vmem:[%s785_s4] sm:$0xff] %vm787_vm14, %v410_v59  ;;  %v406_v63 = vmul.f32 0.2, %v374_v31  ;;  %v412_v44 = vsel %vm380_vm4, %v364_v16, %v396_v21  ;;  %v413_v8 = vsel %vm381_vm5, %v365_v45, %v397_v54  ;;  %vm791_vm4 = vmmov %vm788_vm1 }
 0x157   :  { %v407_v5 = vmul.f32 0.2, %v375_v39  ;;  %v408_v6 = vmul.f32 0.2, %v376_v35  ;;  %427 = vst.msk [vmem:[%s785_s4 + $0x8] sm:$0xff] %vm788_vm1, %v411_v62  ;;  %v414_v10 = vsel %vm382_vm6, %v366_v22, %v398_v55  ;;  %v415_v11 = vsel %vm383_vm7, %v367_v47, %v399_v56  ;;  %429 = vst.msk [vmem:[%s785_s4 + $0x18] sm:$0xff] %vm788_vm1, %v413_v8 }
 0x158   :  { %v409_v0 = vmul.f32 0.2, %v377_v38  ;;  %428 = vst.msk [vmem:[%s785_s4 + $0x10] sm:$0xff] %vm789_vm2, %v412_v44  ;;  %v416_v13 = vsel %vm384_vm8, %v368_v48, %v400_v57  ;;  %v417_v14 = vsel %vm385_vm9, %v369_v50, %v401_v58  ;;  %v418_v17 = vsel %vm386_vm10, %v370_v51, %v402_v49  ;;  %vm793_vm6 = vmmov %vm788_vm1 }
 0x159   :  { %v419_v18 = vsel %vm387_vm11, %v371_v52, %v403_v60  ;;  %430 = vst.msk [vmem:[%s785_s4 + $0x20] sm:$0xff] %vm790_vm3, %v414_v10  ;;  %v420_v19 = vsel %vm388_vm12, %v372_v26, %v404_v61  ;;  %v421_v23 = vsel %vm389_vm13, %v373_v53, %v405_v34  ;;  %vm792_vm5 = vcmp.ge.f32.partialorder %v374_v31, 0.0  ;;  %vm794_vm7 = vmmov %vm788_vm1 }
 0x15a   :  { %431 = vst.msk [vmem:[%s785_s4 + $0x28] sm:$0xff] %vm791_vm4, %v415_v11  ;;  %v422_v24 = vsel %vm792_vm5, %v374_v31, %v406_v63  ;;  %v423_v25 = vsel %vm391_vm15, %v375_v39, %v407_v5  ;;  %vm795_vm8 = vmmov %vm788_vm1  ;;  %v424_v20 = vsel %vm392_vm0, %v376_v35, %v408_v6  ;;  %vm797_vm10 = vcmp.ge.f32.partialorder %v377_v38, 0.0 }
 0x15b   :  { %432 = vst.msk [vmem:[%s785_s4 + $0x30] sm:$0xff] %vm793_vm6, %v416_v13  ;;  %vm796_vm9 = vmmov %vm788_vm1  ;;  %v425_v29 = vsel %vm797_vm10, %v377_v38, %v409_v0 }
 0x15c   :  { %433 = vst.msk [vmem:[%s785_s4 + $0x38] sm:$0xff] %vm794_vm7, %v417_v14  ;;  %vm798_vm11 = vmmov %vm788_vm1 }
 0x15d   :  { %434 = vst.msk [vmem:[%s785_s4 + $0x40] sm:$0xff] %vm795_vm8, %v418_v17  ;;  %vm799_vm12 = vmmov %vm788_vm1 }
 0x15e   :  { %435 = vst.msk [vmem:[%s785_s4 + $0x48] sm:$0xff] %vm796_vm9, %v419_v18  ;;  %vm800_vm13 = vmmov %vm788_vm1 }
 0x15f   :  { %436 = vst.msk [vmem:[%s785_s4 + $0x50] sm:$0xff] %vm798_vm11, %v420_v19  ;;  %vm801_vm14 = vmmov %vm788_vm1 }
 0x160   :  { %437 = vst.msk [vmem:[%s785_s4 + $0x58] sm:$0xff] %vm799_vm12, %v421_v23  ;;  %vm802_vm15 = vmmov %vm788_vm1 }
 0x161   :  { %438 = vst.msk [vmem:[%s785_s4 + $0x60] sm:$0xff] %vm800_vm13, %v422_v24  ;;  %vm803_vm0 = vmmov %vm788_vm1 }
 0x162   :  { %439 = vst.msk [vmem:[%s785_s4 + $0x68] sm:$0xff] %vm801_vm14, %v423_v25 }
 0x163   :  { %440 = vst.msk [vmem:[%s785_s4 + $0x70] sm:$0xff] %vm802_vm15, %v424_v20 }
 0x164   :  { %441 = vst.msk [vmem:[%s785_s4 + $0x78] sm:$0xff] %vm803_vm0, %v425_v29 }

// kernel: generator_stage2.8
= control target key start
LH: loop header
LB: loop body
LE: loop exit
PB: predicated region body
PF: predicated region fallthrough
CT: control target
= control target key end

     0   :  { %vm219_vm0 = vcmask 261120   ;;  %s505_s1 = inlined_call_operand.vmem [shape: bf16[256,32], index: 1, kind: input, shape index: {}]   ;;  %s506_s0 = inlined_call_operand.vmem [shape: bf16[32,256], index: 0, kind: input, shape index: {}]   ;;  %s507_s2 = inlined_call_operand.vmem [shape: f32[1,32], index: 2, kind: input, shape index: {}]   ;;  %s508_s3 = inlined_call_operand.vmem [shape: f32[1,32], index: 3, kind: input, shape index: {}]   ;;  %s509_s4 = inlined_call_operand.vmem [shape: f32[32,32], index: 4, kind: output, shape index: {}]  }
   0x1   :  { %v366_v0 = vld [vmem:[%s505_s1 + $0x78] sm:$0xff]   ;;  %v368_v2 = vld [vmem:[%s505_s1 + $0x70] sm:$0xff]   ;;  %v370_v4 = vld [vmem:[%s505_s1 + $0x68] sm:$0xff]  }
   0x2   :  { %v367_v1 = vld [vmem:[%s505_s1 + $0x38] sm:$0xff]   ;;  %322 = vmatprep.subr.bf16.mxu0 %v366_v0  ;;  %350 = vmatprep.subr.bf16.mxu1 %v366_v0  ;;  %v369_v3 = vld [vmem:[%s505_s1 + $0x30] sm:$0xff]   ;;  %v371_v5 = vld [vmem:[%s505_s1 + $0x28] sm:$0xff]  }
   0x3   :  { %323 = vmatpush3.bf16.msra.mxu0 %v367_v1  ;;  %358 = vmatpush3.bf16.msra.mxu1 %v367_v1  ;;  %v372_v6 = vld [vmem:[%s505_s1 + $0x60] sm:$0xff]   ;;  %v374_v8 = vld [vmem:[%s505_s1 + $0x58] sm:$0xff]   ;;  %v376_v10 = vld [vmem:[%s505_s1 + $0x50] sm:$0xff]  }
   0x4   :  { %324 = vmatprep.subr.bf16.mxu0 %v368_v2  ;;  %351 = vmatprep.subr.bf16.mxu1 %v368_v2  ;;  %v373_v7 = vld [vmem:[%s505_s1 + $0x20] sm:$0xff]   ;;  %v375_v9 = vld [vmem:[%s505_s1 + $0x18] sm:$0xff]   ;;  %v377_v13 = vld [vmem:[%s505_s1 + $0x10] sm:$0xff]  }
   0x5   :  { %v384_v11 = vld [vmem:[%s506_s0 + $0x4] ss:$8 sps:$4 sm:$0xff]   ;;  %v387_v12 = vld [vmem:[%s506_s0 + $0x14] ss:$8 sps:$4 sm:$0xff]   ;;  %v382_v18 = vld [vmem:[%s506_s0] ss:$8 sps:$4 sm:$0xff]  }
   0x6   :  { %v378_v14 = vld [vmem:[%s505_s1 + $0x48] sm:$0xff]   ;;  %202 = vmatprep.mubr.bf16.mxu0 %v384_v11  ;;  %210 = vmatprep.mubr.bf16.mxu1 %v387_v12  ;;  %v380_v16 = vld [vmem:[%s505_s1 + $0x40] sm:$0xff]   ;;  %v385_v19 = vld [vmem:[%s506_s0 + $0x10] ss:$8 sps:$4 sm:$0xff]  }
   0x7   :  { %325 = vmatpush3.bf16.msra.mxu0 %v369_v3  ;;  %359 = vmatpush3.bf16.msra.mxu1 %v369_v3  ;;  %v379_v15 = vld [vmem:[%s505_s1 + $0x8] sm:$0xff]   ;;  %v381_v17 = vld [vmem:[%s505_s1] sm:$0xff]  }
   0x8   :  { %326 = vmatprep.subr.bf16.mxu0 %v370_v4  ;;  %352 = vmatprep.subr.bf16.mxu1 %v370_v4  ;;  %v321_v12 = vld [vmem:[%s508_s3] ss:$0 sm:$0xff] }
   0xb   :  { %327 = vmatpush3.bf16.msra.mxu0 %v371_v5  ;;  %360 = vmatpush3.bf16.msra.mxu1 %v371_v5  ;;  %v261_v5 = vlaneseq }
   0xc   :  { %328 = vmatprep.subr.bf16.mxu0 %v372_v6  ;;  %353 = vmatprep.subr.bf16.mxu1 %v372_v6 }
   0xd   :  { %v262_v6 = vshrl.u32 %v261_v5, 7 }
   0xf   :  { %329 = vmatpush3.bf16.msra.mxu0 %v373_v7  ;;  %361 = vmatpush3.bf16.msra.mxu1 %v373_v7  ;;  %v256_v7 = vld [vmem:[%s507_s2] sm:$0x1] }
  0x10   :  { %330 = vmatprep.subr.bf16.mxu0 %v374_v8  ;;  %354 = vmatprep.subr.bf16.mxu1 %v374_v8  ;;  %v263_v8 = vsub.s32 0, %v262_v6 }
  0x13   :  { %331 = vmatpush3.bf16.msra.mxu0 %v375_v9  ;;  %362 = vmatpush3.bf16.msra.mxu1 %v375_v9 }
  0x14   :  { %332 = vmatprep.subr.bf16.mxu0 %v376_v10  ;;  %355 = vmatprep.subr.bf16.mxu1 %v376_v10 }
  0x17   :  { %333 = vmatpush3.bf16.msra.mxu0 %v377_v13  ;;  %363 = vmatpush3.bf16.msra.mxu1 %v377_v13 }
  0x18   :  { %334 = vmatprep.subr.bf16.mxu0 %v378_v14  ;;  %356 = vmatprep.subr.bf16.mxu1 %v378_v14 }
  0x1b   :  { %335 = vmatpush3.bf16.msra.mxu0 %v379_v15  ;;  %364 = vmatpush3.bf16.msra.mxu1 %v379_v15 }
  0x1c   :  { %336 = vmatprep.subr.bf16.mxu0 %v380_v16  ;;  %357 = vmatprep.subr.bf16.mxu1 %v380_v16 }
  0x1f   :  { %337 = vmatpush3.bf16.msra.mxu0 %v381_v17  ;;  %365 = vmatpush3.bf16.msra.mxu1 %v381_v17 }
  0x22   :  { %203 = vmatmul.mubr.bf16.vlgmr.msra.gmra.mxu0 %v382_v18  ;;  %211 = vmatmul.mubr.bf16.vlgmr.msra.gmra.mxu1 %v385_v19 }
  0xe2   :  { %v338_v20 = vpop.f32.mrf.mxu0  ;;  %v344_v21 = vpop.f32.mrf.mxu1 }
  0xe4   :  { %v339_v22 = vpop.f32.mrf.mxu0  ;;  %v345_v23 = vpop.f32.mrf.mxu1 }
  0xe5   :  { %v340_v26 = vadd.f32 %v339_v22, %v338_v20  ;;  %v346_v29 = vadd.f32 %v345_v23, %v344_v21 }
  0xe6   :  { %v341_v24 = vpop.f32.mrf.mxu0  ;;  %v347_v25 = vpop.f32.mrf.mxu1 }
  0xe7   :  { %v220_v31 = vsel %vm219_vm0, %v340_v26, 0.0  ;;  %v223_v35 = vsel %vm219_vm0, %v346_v29, 0.0 }
  0xe8   :  { %v342_v27 = vpop.f32.mrf.mxu0  ;;  %v348_v28 = vpop.f32.mrf.mxu1 }
  0xe9   :  { %v343_v30 = vadd.f32 %v342_v27, %v341_v24  ;;  %v349_v33 = vadd.f32 %v348_v28, %v347_v25 }
  0xeb   :  { %v221_v32 = vsel %vm219_vm0, %v343_v30, 0.0  ;;  %v225_v37 = vsel %vm219_vm0, %v349_v33, 0.0 }
  0xec   :  { %v222_v34 = vadd.f32 %v221_v32, %v220_v31 }
  0xee   :  { %v224_v36 = vadd.f32 %v223_v35, %v222_v34 }
  0xf0   :  { %v226_v38 = vadd.f32 %v225_v37, %v224_v36 }
  0xf2   :  { %v227_v39 = vrot.slane %v226_v38, 4 }
  0xf4   :  { %v228_v40 = vadd.f32 %v227_v39, %v226_v38 }
  0xf6   :  { %v229_v41 = vrot.slane %v228_v40, 2 }
  0xf8   :  { %v230_v42 = vadd.f32 %v229_v41, %v228_v40 }
  0xfa   :  { %v231_v43 = vrot.slane %v230_v42, 1 }
  0xfc   :  { %v232_v44 = vadd.f32 %v231_v43, %v230_v42 }
  0xfe   :  { %v233_v45 = vmul.f32 0.03125, %v232_v44 }
 0x100   :  { %v234_v46 = vsub.f32 %v340_v26, %v233_v45  ;;  %v235_v47 = vsub.f32 %v343_v30, %v233_v45  ;;  %v236_v48 = vsub.f32 %v346_v29, %v233_v45  ;;  %v237_v49 = vsub.f32 %v349_v33, %v233_v45 }
 0x102   :  { %v238_v50 = vmul.f32 %v234_v46, %v234_v46  ;;  %v239_v51 = vmul.f32 %v235_v47, %v235_v47  ;;  %v240_v52 = vmul.f32 %v236_v48, %v236_v48  ;;  %v241_v53 = vmul.f32 %v237_v49, %v237_v49 }
 0x104   :  { %v242_v54 = vsel %vm219_vm0, %v238_v50, 0.0  ;;  %v243_v55 = vsel %vm219_vm0, %v239_v51, 0.0  ;;  %v245_v57 = vsel %vm219_vm0, %v240_v52, 0.0  ;;  %v247_v59 = vsel %vm219_vm0, %v241_v53, 0.0 }
 0x105   :  { %v244_v56 = vadd.f32 %v243_v55, %v242_v54 }
 0x107   :  { %v246_v58 = vadd.f32 %v245_v57, %v244_v56 }
 0x109   :  { %v248_v60 = vadd.f32 %v247_v59, %v246_v58 }
 0x10b   :  { %v249_v61 = vrot.slane %v248_v60, 4 }
 0x10d   :  { %v250_v62 = vadd.f32 %v249_v61, %v248_v60 }
 0x10f   :  { %v251_v63 = vrot.slane %v250_v62, 2 }
 0x111   :  { %v252_v0 = vadd.f32 %v251_v63, %v250_v62 }
 0x113   :  { %v253_v1 = vrot.slane %v252_v0, 1 }
 0x115   :  { %v254_v2 = vadd.f32 %v253_v1, %v252_v0 }
 0x117   :  { %v255_v3 = vmul.f32 0.03125, %v254_v2 }
 0x119   :  { %v257_v4 = vadd.f32 1e-05, %v255_v3 }
 0x11b   :  { %388 = vrsqrt.f32 %v257_v4 }
 0x128   :  { %v389_v9 = vpop.eup %388 }
 0x129   :  { %v259_v10 = vmul.f32 %v389_v9, %v256_v7 }
 0x12b   :  { %v264_v11 = vrot.slane %v259_v10, %v263_v8 }
 0x12d   :  { %v266_v13 = vmul.f32 %v264_v11, %v234_v46  ;;  %v267_v14 = vmul.f32 %v264_v11, %v235_v47  ;;  %v268_v15 = vmul.f32 %v264_v11, %v236_v48  ;;  %v269_v16 = vmul.f32 %v264_v11, %v237_v49 }
 0x12f   :  { %v277_v17 = vadd.f32 %v321_v12, %v266_v13  ;;  %v278_v18 = vadd.f32 %v321_v12, %v267_v14  ;;  %v279_v19 = vadd.f32 %v321_v12, %v268_v15  ;;  %v280_v20 = vadd.f32 %v321_v12, %v269_v16 }
 0x131   :  { %vm281_vm1 = vcmp.ge.f32.partialorder %v277_v17, 0.0  ;;  %vm282_vm2 = vcmp.ge.f32.partialorder %v278_v18, 0.0  ;;  %vm283_vm3 = vcmp.ge.f32.partialorder %v279_v19, 0.0  ;;  %vm284_vm4 = vcmp.ge.f32.partialorder %v280_v20, 0.0 }
 0x132   :  { %v285_v21 = vmul.f32 0.2, %v277_v17  ;;  %v286_v22 = vmul.f32 0.2, %v278_v18  ;;  %v287_v23 = vmul.f32 0.2, %v279_v19 }
 0x133   :  { %v288_v24 = vmul.f32 0.2, %v280_v20 }
 0x134   :  { %v289_v25 = vsel %vm281_vm1, %v277_v17, %v285_v21  ;;  %v290_v26 = vsel %vm282_vm2, %v278_v18, %v286_v22  ;;  %v291_v27 = vsel %vm283_vm3, %v279_v19, %v287_v23 }
 0x135   :  { %v292_v28 = vsel %vm284_vm4, %v280_v20, %v288_v24  ;;  %293 = vst.msk [vmem:[%s509_s4] sm:$0xff] %vm219_vm0, %v289_v25  ;;  %294 = vst.msk [vmem:[%s509_s4 + $0x8] sm:$0xff] %vm219_vm0, %v290_v26 }
 0x136   :  { %295 = vst.msk [vmem:[%s509_s4 + $0x10] sm:$0xff] %vm219_vm0, %v291_v27  ;;  %296 = vst.msk [vmem:[%s509_s4 + $0x18] sm:$0xff] %vm219_vm0, %v292_v28 }

// kernel: generator_stage2.9
= control target key start
LH: loop header
LB: loop body
LE: loop exit
PB: predicated region body
PF: predicated region fallthrough
CT: control target
= control target key end

     0   :  { %vm200_vm0 = vcmask 261120   ;;  %s602_s1 = inlined_call_operand.vmem [shape: bf16[288,32], index: 1, kind: input, shape index: {}]   ;;  %s603_s0 = inlined_call_operand.vmem [shape: bf16[32,288], index: 0, kind: input, shape index: {}]   ;;  %s604_s2 = inlined_call_operand.vmem [shape: f32[1,32], index: 2, kind: input, shape index: {}]   ;;  %s605_s3 = inlined_call_operand.vmem [shape: f32[1,32], index: 3, kind: input, shape index: {}]   ;;  %s606_s4 = inlined_call_operand.vmem [shape: f32[32,32], index: 4, kind: output, shape index: {}]  }
   0x1   :  { %v445_v0 = vld [vmem:[%s602_s1 + $0x78] sm:$0xff]   ;;  %v447_v2 = vld [vmem:[%s602_s1 + $0x70] sm:$0xff]   ;;  %v449_v4 = vld [vmem:[%s602_s1 + $0x68] sm:$0xff]  }
   0x2   :  { %v446_v1 = vld [vmem:[%s602_s1 + $0x38] sm:$0xff]   ;;  %405 = vmatprep.subr.bf16.mxu0 %v445_v0  ;;  %v448_v3 = vld [vmem:[%s602_s1 + $0x30] sm:$0xff]   ;;  %v450_v5 = vld [vmem:[%s602_s1 + $0x28] sm:$0xff]  }
   0x3   :  { %406 = vmatpush3.bf16.msra.mxu0 %v446_v1  ;;  %v451_v6 = vld [vmem:[%s602_s1 + $0x60] sm:$0xff]   ;;  %v453_v8 = vld [vmem:[%s602_s1 + $0x58] sm:$0xff]   ;;  %v458_v9 = vld [vmem:[%s602_s1 + $0x88] sm:$0xff]  }
   0x4   :  { %407 = vmatprep.subr.bf16.mxu0 %v447_v2  ;;  %v452_v7 = vld [vmem:[%s602_s1 + $0x20] sm:$0xff]   ;;  %v454_v10 = vld [vmem:[%s602_s1 + $0x18] sm:$0xff]   ;;  %v455_v11 = vld [vmem:[%s602_s1 + $0x50] sm:$0xff]   ;;  %437 = vmatprep.subr.bf16.mxu1 %v458_v9 }
   0x5   :  { %438 = vmatpush3.bf16.msra.mxu1 %v458_v9  ;;  %v461_v12 = vld [vmem:[%s602_s1 + $0x80] sm:$0xff]   ;;  %v456_v13 = vld [vmem:[%s602_s1 + $0x10] sm:$0xff]   ;;  %v457_v14 = vld [vmem:[%s602_s1 + $0x48] sm:$0xff]  }
   0x6   :  { %439 = vmatprep.subr.bf16.mxu1 %v461_v12  ;;  %v465_v15 = vld [vmem:[%s603_s0 + $0x4] ss:$12 sps:$4 sm:$0xff]   ;;  %v466_v16 = vld [vmem:[%s603_s0 + $0x8] ss:$12 sps:$4 sm:$0xff]   ;;  %v467_v17 = vld [vmem:[%s603_s0 + $0x20] ss:$12 sps:$4 sm:$0xff]  }
   0x7   :  { %408 = vmatpush3.bf16.msra.mxu0 %v448_v3  ;;  %239 = vmatprep.mubr.bf16.mxu0 %v465_v15  ;;  %v459_v18 = vld [vmem:[%s602_s1 + $0x8] sm:$0xff]   ;;  %v460_v19 = vld [vmem:[%s602_s1 + $0x40] sm:$0xff]  }
   0x8   :  { %409 = vmatprep.subr.bf16.mxu0 %v449_v4  ;;  %441 = vmatprep.mubr.msk.bf16.mxu1 %vm200_vm0, %v466_v16  ;;  %v462_v20 = vld [vmem:[%s602_s1] sm:$0xff]   ;;  %v468_v22 = vld [vmem:[%s603_s0 + $0x1c] ss:$12 sps:$4 sm:$0xff]  }
   0x9   :  { %440 = vmatpush3.bf16.msra.mxu1 %v461_v12  ;;  %v463_v21 = vld [vmem:[%s603_s0] ss:$12 sps:$4 sm:$0xff]   ;;  %v470_v23 = vld [vmem:[%s603_s0 + $0x18] ss:$12 sps:$4 sm:$0xff]  }
   0xb   :  { %410 = vmatpush3.bf16.msra.mxu0 %v450_v5 }
   0xc   :  { %411 = vmatprep.subr.bf16.mxu0 %v451_v6  ;;  %442 = vmatmul.mubr.msk.bf16.vlgmr.msra.gmra.mxu1 %vm200_vm0, %v467_v17  ;;  %v346_v17 = vlaneseq }
   0xf   :  { %412 = vmatpush3.bf16.msra.mxu0 %v452_v7 }
  0x10   :  { %413 = vmatprep.subr.bf16.mxu0 %v453_v8 }
  0x13   :  { %414 = vmatpush3.bf16.msra.mxu0 %v454_v10 }
  0x14   :  { %415 = vmatprep.subr.bf16.mxu0 %v455_v11 }
  0x17   :  { %416 = vmatpush3.bf16.msra.mxu0 %v456_v13 }
  0x18   :  { %417 = vmatprep.subr.bf16.mxu0 %v457_v14 }
  0x1b   :  { %418 = vmatpush3.bf16.msra.mxu0 %v459_v18  ;;  %v347_v18 = vshrl.u32 %v346_v17, 7 }
  0x1c   :  { %419 = vmatprep.subr.bf16.mxu0 %v460_v19  ;;  %v341_v19 = vld [vmem:[%s604_s2] sm:$0x1] }
  0x1f   :  { %420 = vmatpush3.bf16.msra.mxu0 %v462_v20  ;;  %v348_v20 = vsub.s32 0, %v347_v18 }
  0x22   :  { %240 = vmatmul.mubr.bf16.vlgmr.msra.gmra.mxu0 %v463_v21 }
  0x23   :  { %247 = vmatprep.mubr.bf16.mxu0 %v468_v22 }
  0x2a   :  { %248 = vmatmul.mubr.bf16.gmra.mxu0 %v470_v23 }
  0xcc   :  { %v443_v24 = vpop.f32.mrf.mxu1 }
  0xce   :  { %v290_v26 = vpop.f32.mrf.mxu1 }
  0xd0   :  { %v444_v29 = vpop.f32.mrf.mxu1 }
  0xd2   :  { %v293_v33 = vpop.f32.mrf.mxu1 }
  0xe2   :  { %v421_v25 = vpop.f32.mrf.mxu0 }
  0xe4   :  { %v422_v27 = vpop.f32.mrf.mxu0 }
  0xe5   :  { %v423_v31 = vadd.f32 %v422_v27, %v421_v25 }
  0xe6   :  { %v424_v28 = vpop.f32.mrf.mxu0 }
  0xe7   :  { %v291_v37 = vadd.f32 %v423_v31, %v290_v26 }
  0xe8   :  { %v425_v30 = vpop.f32.mrf.mxu0 }
  0xe9   :  { %v426_v32 = vadd.f32 %v425_v30, %v424_v28  ;;  %v305_v43 = vsel %vm200_vm0, %v291_v37, 0.0 }
  0xea   :  { %v427_v34 = vpop.f32.mrf.mxu0 }
  0xeb   :  { %v294_v35 = vadd.f32 %v426_v32, %v293_v33 }
  0xec   :  { %v428_v36 = vpop.f32.mrf.mxu0 }
  0xed   :  { %v429_v38 = vadd.f32 %v428_v36, %v427_v34  ;;  %v306_v40 = vsel %vm200_vm0, %v294_v35, 0.0 }
  0xee   :  { %v430_v39 = vpop.f32.mrf.mxu0  ;;  %v307_v46 = vadd.f32 %v306_v40, %v305_v43 }
  0xef   :  { %v299_v41 = vadd.f32 %v443_v24, %v429_v38  ;;  %v404_v24 = vld [vmem:[%s605_s3] ss:$0 sm:$0xff] }
  0xf0   :  { %v431_v42 = vpop.f32.mrf.mxu0 }
  0xf1   :  { %v308_v44 = vsel %vm200_vm0, %v299_v41, 0.0  ;;  %v432_v45 = vadd.f32 %v431_v42, %v430_v39 }
  0xf2   :  { %v309_v48 = vadd.f32 %v308_v44, %v307_v46 }
  0xf3   :  { %v302_v47 = vadd.f32 %v444_v29, %v432_v45 }
  0xf5   :  { %v310_v49 = vsel %vm200_vm0, %v302_v47, 0.0 }
  0xf6   :  { %v311_v50 = vadd.f32 %v310_v49, %v309_v48 }
  0xf8   :  { %v312_v51 = vrot.slane %v311_v50, 4 }
  0xfa   :  { %v313_v52 = vadd.f32 %v312_v51, %v311_v50 }
  0xfc   :  { %v314_v53 = vrot.slane %v313_v52, 2 }
  0xfe   :  { %v315_v54 = vadd.f32 %v314_v53, %v313_v52 }
 0x100   :  { %v316_v55 = vrot.slane %v315_v54, 1 }
 0x102   :  { %v317_v56 = vadd.f32 %v316_v55, %v315_v54 }
 0x104   :  { %v318_v57 = vmul.f32 0.03125, %v317_v56 }
 0x106   :  { %v319_v58 = vsub.f32 %v291_v37, %v318_v57  ;;  %v320_v59 = vsub.f32 %v294_v35, %v318_v57  ;;  %v321_v60 = vsub.f32 %v299_v41, %v318_v57  ;;  %v322_v61 = vsub.f32 %v302_v47, %v318_v57 }
 0x108   :  { %v323_v62 = vmul.f32 %v319_v58, %v319_v58  ;;  %v324_v63 = vmul.f32 %v320_v59, %v320_v59  ;;  %v325_v0 = vmul.f32 %v321_v60, %v321_v60  ;;  %v326_v1 = vmul.f32 %v322_v61, %v322_v61 }
 0x10a   :  { %v327_v2 = vsel %vm200_vm0, %v323_v62, 0.0  ;;  %v328_v3 = vsel %vm200_vm0, %v324_v63, 0.0  ;;  %v330_v5 = vsel %vm200_vm0, %v325_v0, 0.0  ;;  %v332_v7 = vsel %vm200_vm0, %v326_v1, 0.0 }
 0x10b   :  { %v329_v4 = vadd.f32 %v328_v3, %v327_v2 }
 0x10d   :  { %v331_v6 = vadd.f32 %v330_v5, %v329_v4 }
 0x10f   :  { %v333_v8 = vadd.f32 %v332_v7, %v331_v6 }
 0x111   :  { %v334_v9 = vrot.slane %v333_v8, 4 }
 0x113   :  { %v335_v10 = vadd.f32 %v334_v9, %v333_v8 }
 0x115   :  { %v336_v11 = vrot.slane %v335_v10, 2 }
 0x117   :  { %v337_v12 = vadd.f32 %v336_v11, %v335_v10 }
 0x119   :  { %v338_v13 = vrot.slane %v337_v12, 1 }
 0x11b   :  { %v339_v14 = vadd.f32 %v338_v13, %v337_v12 }
 0x11d   :  { %v340_v15 = vmul.f32 0.03125, %v339_v14 }
 0x11f   :  { %v342_v16 = vadd.f32 1e-05, %v340_v15 }
 0x121   :  { %471 = vrsqrt.f32 %v342_v16 }
 0x12e   :  { %v472_v21 = vpop.eup %471 }
 0x12f   :  { %v344_v22 = vmul.f32 %v472_v21, %v341_v19 }
 0x131   :  { %v349_v23 = vrot.slane %v344_v22, %v348_v20 }
 0x133   :  { %v351_v25 = vmul.f32 %v349_v23, %v319_v58  ;;  %v352_v26 = vmul.f32 %v349_v23, %v320_v59  ;;  %v353_v27 = vmul.f32 %v349_v23, %v321_v60  ;;  %v354_v28 = vmul.f32 %v349_v23, %v322_v61 }
 0x135   :  { %v362_v29 = vadd.f32 %v404_v24, %v351_v25  ;;  %v363_v30 = vadd.f32 %v404_v24, %v352_v26  ;;  %v364_v31 = vadd.f32 %v404_v24, %v353_v27  ;;  %v365_v32 = vadd.f32 %v404_v24, %v354_v28 }
 0x137   :  { %v366_v33 = vmax.f32 %v362_v29, 0.0  ;;  %v367_v34 = vmax.f32 %v363_v30, 0.0  ;;  %v368_v35 = vmax.f32 %v364_v31, 0.0  ;;  %v369_v36 = vmax.f32 %v365_v32, 0.0 }
 0x139   :  { %370 = vst.msk [vmem:[%s606_s4] sm:$0xff] %vm200_vm0, %v366_v33  ;;  %371 = vst.msk [vmem:[%s606_s4 + $0x8] sm:$0xff] %vm200_vm0, %v367_v34 }
 0x13a   :  { %372 = vst.msk [vmem:[%s606_s4 + $0x10] sm:$0xff] %vm200_vm0, %v368_v35  ;;  %373 = vst.msk [vmem:[%s606_s4 + $0x18] sm:$0xff] %vm200_vm0, %v369_v36 }

// kernel: generator_stage2.10
= control target key start
LH: loop header
LB: loop body
LE: loop exit
PB: predicated region body
PF: predicated region fallthrough
CT: control target
= control target key end

     0   :  { %vm203_vm0 = vcmask 261120   ;;  %s630_s1 = inlined_call_operand.vmem [shape: bf16[288,32], index: 1, kind: input, shape index: {}]   ;;  %s631_s0 = inlined_call_operand.vmem [shape: bf16[32,288], index: 0, kind: input, shape index: {}]   ;;  %s632_s2 = inlined_call_operand.vmem [shape: f32[1,32], index: 2, kind: input, shape index: {}]   ;;  %s633_s3 = inlined_call_operand.vmem [shape: f32[1,32], index: 3, kind: input, shape index: {}]   ;;  %s634_s4 = inlined_call_operand.vmem [shape: f32[32,32], index: 4, kind: input, shape index: {}]   ;;  %s635_s5 = inlined_call_operand.vmem [shape: f32[32,32], index: 5, kind: output, shape index: {}]  }
   0x1   :  { %v456_v0 = vld [vmem:[%s630_s1 + $0x78] sm:$0xff]   ;;  %v458_v2 = vld [vmem:[%s630_s1 + $0x70] sm:$0xff]   ;;  %v460_v4 = vld [vmem:[%s630_s1 + $0x68] sm:$0xff]  }
   0x2   :  { %v457_v1 = vld [vmem:[%s630_s1 + $0x38] sm:$0xff]   ;;  %416 = vmatprep.subr.bf16.mxu0 %v456_v0  ;;  %v459_v3 = vld [vmem:[%s630_s1 + $0x30] sm:$0xff]   ;;  %v461_v5 = vld [vmem:[%s630_s1 + $0x28] sm:$0xff]  }
   0x3   :  { %417 = vmatpush3.bf16.msra.mxu0 %v457_v1  ;;  %v462_v6 = vld [vmem:[%s630_s1 + $0x60] sm:$0xff]   ;;  %v464_v8 = vld [vmem:[%s630_s1 + $0x58] sm:$0xff]   ;;  %v469_v9 = vld [vmem:[%s630_s1 + $0x88] sm:$0xff]  }
   0x4   :  { %418 = vmatprep.subr.bf16.mxu0 %v458_v2  ;;  %v463_v7 = vld [vmem:[%s630_s1 + $0x20] sm:$0xff]   ;;  %v465_v10 = vld [vmem:[%s630_s1 + $0x18] sm:$0xff]   ;;  %v466_v11 = vld [vmem:[%s630_s1 + $0x50] sm:$0xff]   ;;  %448 = vmatprep.subr.bf16.mxu1 %v469_v9 }
   0x5   :  { %449 = vmatpush3.bf16.msra.mxu1 %v469_v9  ;;  %v472_v12 = vld [vmem:[%s630_s1 + $0x80] sm:$0xff]   ;;  %v467_v13 = vld [vmem:[%s630_s1 + $0x10] sm:$0xff]   ;;  %v468_v14 = vld [vmem:[%s630_s1 + $0x48] sm:$0xff]  }
   0x6   :  { %450 = vmatprep.subr.bf16.mxu1 %v472_v12  ;;  %v476_v15 = vld [vmem:[%s631_s0 + $0x4] ss:$12 sps:$4 sm:$0xff]   ;;  %v477_v16 = vld [vmem:[%s631_s0 + $0x8] ss:$12 sps:$4 sm:$0xff]   ;;  %v478_v17 = vld [vmem:[%s631_s0 + $0x20] ss:$12 sps:$4 sm:$0xff]  }
   0x7   :  { %419 = vmatpush3.bf16.msra.mxu0 %v459_v3  ;;  %242 = vmatprep.mubr.bf16.mxu0 %v476_v15  ;;  %v470_v18 = vld [vmem:[%s630_s1 + $0x8] sm:$0xff]   ;;  %v471_v19 = vld [vmem:[%s630_s1 + $0x40] sm:$0xff]  }
   0x8   :  { %420 = vmatprep.subr.bf16.mxu0 %v460_v4  ;;  %452 = vmatprep.mubr.msk.bf16.mxu1 %vm203_vm0, %v477_v16  ;;  %v473_v20 = vld [vmem:[%s630_s1] sm:$0xff]   ;;  %v479_v22 = vld [vmem:[%s631_s0 + $0x1c] ss:$12 sps:$4 sm:$0xff]  }
   0x9   :  { %451 = vmatpush3.bf16.msra.mxu1 %v472_v12  ;;  %v474_v21 = vld [vmem:[%s631_s0] ss:$12 sps:$4 sm:$0xff]   ;;  %v481_v23 = vld [vmem:[%s631_s0 + $0x18] ss:$12 sps:$4 sm:$0xff]  }
   0xb   :  { %421 = vmatpush3.bf16.msra.mxu0 %v461_v5 }
   0xc   :  { %422 = vmatprep.subr.bf16.mxu0 %v462_v6  ;;  %453 = vmatmul.mubr.msk.bf16.vlgmr.msra.gmra.mxu1 %vm203_vm0, %v478_v17  ;;  %v349_v17 = vlaneseq }
   0xf   :  { %423 = vmatpush3.bf16.msra.mxu0 %v463_v7 }
  0x10   :  { %424 = vmatprep.subr.bf16.mxu0 %v464_v8 }
  0x13   :  { %425 = vmatpush3.bf16.msra.mxu0 %v465_v10 }
  0x14   :  { %426 = vmatprep.subr.bf16.mxu0 %v466_v11 }
  0x17   :  { %427 = vmatpush3.bf16.msra.mxu0 %v467_v13 }
  0x18   :  { %428 = vmatprep.subr.bf16.mxu0 %v468_v14 }
  0x1b   :  { %429 = vmatpush3.bf16.msra.mxu0 %v470_v18  ;;  %v350_v18 = vshrl.u32 %v349_v17, 7 }
  0x1c   :  { %430 = vmatprep.subr.bf16.mxu0 %v471_v19  ;;  %v344_v19 = vld [vmem:[%s632_s2] sm:$0x1] }
  0x1f   :  { %431 = vmatpush3.bf16.msra.mxu0 %v473_v20  ;;  %v351_v20 = vsub.s32 0, %v350_v18 }
  0x22   :  { %243 = vmatmul.mubr.bf16.vlgmr.msra.gmra.mxu0 %v474_v21 }
  0x23   :  { %250 = vmatprep.mubr.bf16.mxu0 %v479_v22 }
  0x2a   :  { %251 = vmatmul.mubr.bf16.gmra.mxu0 %v481_v23 }
  0xcc   :  { %v454_v24 = vpop.f32.mrf.mxu1 }
  0xce   :  { %v293_v26 = vpop.f32.mrf.mxu1 }
  0xd0   :  { %v455_v29 = vpop.f32.mrf.mxu1 }
  0xd2   :  { %v296_v33 = vpop.f32.mrf.mxu1 }
  0xe2   :  { %v432_v25 = vpop.f32.mrf.mxu0 }
  0xe4   :  { %v433_v27 = vpop.f32.mrf.mxu0 }
  0xe5   :  { %v434_v31 = vadd.f32 %v433_v27, %v432_v25 }
  0xe6   :  { %v435_v28 = vpop.f32.mrf.mxu0 }
  0xe7   :  { %v294_v37 = vadd.f32 %v434_v31, %v293_v26  ;;  %v371_v31 = vld [vmem:[%s634_s4 + $0x10] sm:$0xff] }
  0xe8   :  { %v436_v30 = vpop.f32.mrf.mxu0 }
  0xe9   :  { %v437_v32 = vadd.f32 %v436_v30, %v435_v28  ;;  %v308_v43 = vsel %vm203_vm0, %v294_v37, 0.0  ;;  %v370_v30 = vld [vmem:[%s634_s4 + $0x8] sm:$0xff] }
  0xea   :  { %v438_v34 = vpop.f32.mrf.mxu0 }
  0xeb   :  { %v297_v35 = vadd.f32 %v437_v32, %v296_v33  ;;  %v372_v32 = vld [vmem:[%s634_s4 + $0x18] sm:$0xff] }
  0xec   :  { %v439_v36 = vpop.f32.mrf.mxu0 }
  0xed   :  { %v440_v38 = vadd.f32 %v439_v36, %v438_v34  ;;  %v309_v40 = vsel %vm203_vm0, %v297_v35, 0.0 }
  0xee   :  { %v441_v39 = vpop.f32.mrf.mxu0  ;;  %v310_v46 = vadd.f32 %v309_v40, %v308_v43 }
  0xef   :  { %v302_v41 = vadd.f32 %v454_v24, %v440_v38  ;;  %v415_v24 = vld [vmem:[%s633_s3] ss:$0 sm:$0xff] }
  0xf0   :  { %v442_v42 = vpop.f32.mrf.mxu0 }
  0xf1   :  { %v311_v44 = vsel %vm203_vm0, %v302_v41, 0.0  ;;  %v443_v45 = vadd.f32 %v442_v42, %v441_v39 }
  0xf2   :  { %v312_v48 = vadd.f32 %v311_v44, %v310_v46 }
  0xf3   :  { %v305_v47 = vadd.f32 %v455_v29, %v443_v45  ;;  %v369_v29 = vld [vmem:[%s634_s4] sm:$0xff] }
  0xf5   :  { %v313_v49 = vsel %vm203_vm0, %v305_v47, 0.0 }
  0xf6   :  { %v314_v50 = vadd.f32 %v313_v49, %v312_v48 }
  0xf8   :  { %v315_v51 = vrot.slane %v314_v50, 4 }
  0xfa   :  { %v316_v52 = vadd.f32 %v315_v51, %v314_v50 }
  0xfc   :  { %v317_v53 = vrot.slane %v316_v52, 2 }
  0xfe   :  { %v318_v54 = vadd.f32 %v317_v53, %v316_v52 }
 0x100   :  { %v319_v55 = vrot.slane %v318_v54, 1 }
 0x102   :  { %v320_v56 = vadd.f32 %v319_v55, %v318_v54 }
 0x104   :  { %v321_v57 = vmul.f32 0.03125, %v320_v56 }
 0x106   :  { %v322_v58 = vsub.f32 %v294_v37, %v321_v57  ;;  %v323_v59 = vsub.f32 %v297_v35, %v321_v57  ;;  %v324_v60 = vsub.f32 %v302_v41, %v321_v57  ;;  %v325_v61 = vsub.f32 %v305_v47, %v321_v57 }
 0x108   :  { %v326_v62 = vmul.f32 %v322_v58, %v322_v58  ;;  %v327_v63 = vmul.f32 %v323_v59, %v323_v59  ;;  %v328_v0 = vmul.f32 %v324_v60, %v324_v60  ;;  %v329_v1 = vmul.f32 %v325_v61, %v325_v61 }
 0x10a   :  { %v330_v2 = vsel %vm203_vm0, %v326_v62, 0.0  ;;  %v331_v3 = vsel %vm203_vm0, %v327_v63, 0.0  ;;  %v333_v5 = vsel %vm203_vm0, %v328_v0, 0.0  ;;  %v335_v7 = vsel %vm203_vm0, %v329_v1, 0.0 }
 0x10b   :  { %v332_v4 = vadd.f32 %v331_v3, %v330_v2 }
 0x10d   :  { %v334_v6 = vadd.f32 %v333_v5, %v332_v4 }
 0x10f   :  { %v336_v8 = vadd.f32 %v335_v7, %v334_v6 }
 0x111   :  { %v337_v9 = vrot.slane %v336_v8, 4 }
 0x113   :  { %v338_v10 = vadd.f32 %v337_v9, %v336_v8 }
 0x115   :  { %v339_v11 = vrot.slane %v338_v10, 2 }
 0x117   :  { %v340_v12 = vadd.f32 %v339_v11, %v338_v10 }
 0x119   :  { %v341_v13 = vrot.slane %v340_v12, 1 }
 0x11b   :  { %v342_v14 = vadd.f32 %v341_v13, %v340_v12 }
 0x11d   :  { %v343_v15 = vmul.f32 0.03125, %v342_v14 }
 0x11f   :  { %v345_v16 = vadd.f32 1e-05, %v343_v15 }
 0x121   :  { %482 = vrsqrt.f32 %v345_v16 }
 0x12e   :  { %v483_v21 = vpop.eup %482 }
 0x12f   :  { %v347_v22 = vmul.f32 %v483_v21, %v344_v19 }
 0x131   :  { %v352_v23 = vrot.slane %v347_v22, %v351_v20 }
 0x133   :  { %v354_v25 = vmul.f32 %v352_v23, %v322_v58  ;;  %v355_v26 = vmul.f32 %v352_v23, %v323_v59  ;;  %v356_v27 = vmul.f32 %v352_v23, %v324_v60  ;;  %v357_v28 = vmul.f32 %v352_v23, %v325_v61 }
 0x135   :  { %v365_v33 = vadd.f32 %v415_v24, %v354_v25  ;;  %v366_v34 = vadd.f32 %v415_v24, %v355_v26  ;;  %v367_v35 = vadd.f32 %v415_v24, %v356_v27  ;;  %v368_v36 = vadd.f32 %v415_v24, %v357_v28 }
 0x137   :  { %v373_v37 = vadd.f32 %v369_v29, %v365_v33  ;;  %v374_v38 = vadd.f32 %v370_v30, %v366_v34  ;;  %v375_v39 = vadd.f32 %v371_v31, %v367_v35  ;;  %v376_v40 = vadd.f32 %v372_v32, %v368_v36 }
 0x139   :  { %v377_v41 = vmax.f32 %v373_v37, 0.0  ;;  %v378_v42 = vmax.f32 %v374_v38, 0.0  ;;  %v379_v43 = vmax.f32 %v375_v39, 0.0  ;;  %v380_v44 = vmax.f32 %v376_v40, 0.0 }
 0x13b   :  { %381 = vst.msk [vmem:[%s635_s5] sm:$0xff] %vm203_vm0, %v377_v41  ;;  %382 = vst.msk [vmem:[%s635_s5 + $0x8] sm:$0xff] %vm203_vm0, %v378_v42 }
 0x13c   :  { %383 = vst.msk [vmem:[%s635_s5 + $0x10] sm:$0xff] %vm203_vm0, %v379_v43  ;;  %384 = vst.msk [vmem:[%s635_s5 + $0x18] sm:$0xff] %vm203_vm0, %v380_v44 }

// kernel: generator_stage2.11
= control target key start
LH: loop header
LB: loop body
LE: loop exit
PB: predicated region body
PF: predicated region fallthrough
CT: control target
= control target key end

     0   :  { %vm206_vm0 = vcmask 261120   ;;  %v948_v24 = vmov 0.0   ;;  %vm949_vm1 = vmmov 0   ;;  %vm321_vm2 = vcmask 523264   ;;  %s1191_s1 = inlined_call_operand.vmem [shape: bf16[288,64], index: 1, kind: input, shape index: {}]   ;;  %s1192_s0 = inlined_call_operand.vmem [shape: bf16[32,288], index: 0, kind: input, shape index: {}]   ;;  %s1193_s2 = inlined_call_operand.vmem [shape: f32[64,16], index: 2, kind: input, shape index: {}]   ;;  %s1194_s3 = inlined_call_operand.vmem [shape: f32[16,64], index: 3, kind: input, shape index: {}]   ;;  %s1195_s5 = inlined_call_operand.vmem [shape: f32[1,16], index: 5, kind: input, shape index: {}]   ;;  %s1196_s4 = inlined_call_operand.vmem [shape: f32[1,16], index: 4, kind: input, shape index: {}]   ;;  %s1197_s6 = inlined_call_operand.vmem [shape: f32[32,64], index: 6, kind: output, shape index: {}]  }
   0x1   :  { %v920_v0 = vld [vmem:[%s1191_s1 + $0x78] sm:$0xff]   ;;  %v922_v2 = vld [vmem:[%s1191_s1 + $0x70] sm:$0xff]   ;;  %v924_v4 = vld [vmem:[%s1191_s1 + $0x68] sm:$0xff]   ;;  %vm409_vm3 = vcmask 130048  }
   0x2   :  { %v921_v1 = vld [vmem:[%s1191_s1 + $0x38] sm:$0xff]   ;;  %792 = vmatprep.subr.bf16.mxu0 %v920_v0  ;;  %v923_v3 = vld [vmem:[%s1191_s1 + $0x30] sm:$0xff]   ;;  %v925_v5 = vld [vmem:[%s1191_s1 + $0x28] sm:$0xff]  }
   0x3   :  { %793 = vmatpush3.bf16.msra.mxu0 %v921_v1  ;;  %v926_v6 = vld [vmem:[%s1191_s1 + $0x60] sm:$0xff]   ;;  %v928_v8 = vld [vmem:[%s1191_s1 + $0x58] sm:$0xff]   ;;  %v933_v9 = vld [vmem:[%s1191_s1 + $0x88] sm:$0xff]  }
   0x4   :  { %794 = vmatprep.subr.bf16.mxu0 %v922_v2  ;;  %v927_v7 = vld [vmem:[%s1191_s1 + $0x20] sm:$0xff]   ;;  %v929_v10 = vld [vmem:[%s1191_s1 + $0x18] sm:$0xff]   ;;  %v930_v11 = vld [vmem:[%s1191_s1 + $0x50] sm:$0xff]   ;;  %851 = vmatprep.subr.bf16.mxu1 %v933_v9 }
   0x5   :  { %852 = vmatpush3.bf16.msra.mxu1 %v933_v9  ;;  %v936_v12 = vld [vmem:[%s1191_s1 + $0x80] sm:$0xff]   ;;  %v931_v13 = vld [vmem:[%s1191_s1 + $0x10] sm:$0xff]   ;;  %v932_v14 = vld [vmem:[%s1191_s1 + $0x48] sm:$0xff]  }
   0x6   :  { %853 = vmatprep.subr.bf16.mxu1 %v936_v12  ;;  %v940_v15 = vld [vmem:[%s1192_s0 + $0x4] ss:$12 sps:$4 sm:$0xff]   ;;  %v941_v16 = vld [vmem:[%s1192_s0 + $0x8] ss:$12 sps:$4 sm:$0xff]   ;;  %v942_v17 = vld [vmem:[%s1192_s0 + $0x20] ss:$12 sps:$4 sm:$0xff]  }
   0x7   :  { %795 = vmatpush3.bf16.msra.mxu0 %v923_v3  ;;  %245 = vmatprep.mubr.bf16.mxu0 %v940_v15  ;;  %v934_v18 = vld [vmem:[%s1191_s1 + $0x8] sm:$0xff]   ;;  %v935_v19 = vld [vmem:[%s1191_s1 + $0x40] sm:$0xff]   ;;  %v1061_v25 = vld [vmem:[%s1193_s2 + $0x38] sm:$0xff] }
   0x8   :  { %796 = vmatprep.subr.bf16.mxu0 %v924_v4  ;;  %855 = vmatprep.mubr.msk.bf16.mxu1 %vm206_vm0, %v941_v16  ;;  %v937_v20 = vld [vmem:[%s1191_s1] sm:$0xff]   ;;  %v943_v22 = vld [vmem:[%s1192_s0 + $0x1c] ss:$12 sps:$4 sm:$0xff]   ;;  %v1069_v26 = vld [vmem:[%s1193_s2 + $0x30] sm:$0xff] }
   0x9   :  { %854 = vmatpush3.bf16.msra.mxu1 %v936_v12  ;;  %v938_v21 = vld [vmem:[%s1192_s0] ss:$12 sps:$4 sm:$0xff]   ;;  %v945_v23 = vld [vmem:[%s1192_s0 + $0x18] ss:$12 sps:$4 sm:$0xff]   ;;  %v1097_v30 = vld [vmem:[%s1193_s2 + $0x10] sm:$0xff] }
   0xa   :  { %859 = vmatprep.subr.mxu1 %v948_v24  ;;  %v1076_v27 = vld [vmem:[%s1193_s2 + $0x28] sm:$0xff]  ;;  %v1083_v28 = vld [vmem:[%s1193_s2 + $0x20] sm:$0xff]  ;;  %v1090_v29 = vld [vmem:[%s1193_s2 + $0x18] sm:$0xff] }
   0xb   :  { %797 = vmatpush3.bf16.msra.mxu0 %v925_v5  ;;  %v1104_v31 = vld [vmem:[%s1193_s2 + $0x8] sm:$0xff]  ;;  %v1111_v32 = vld [vmem:[%s1193_s2] sm:$0xff] }
   0xc   :  { %798 = vmatprep.subr.bf16.mxu0 %v926_v6  ;;  %856 = vmatmul.mubr.msk.bf16.vlgmr.msra.gmra.mxu1 %vm206_vm0, %v942_v17  ;;  %v1122_v33 = vld [vmem:[%s1194_s3 + $0x8] sm:$0xff]  ;;  %v319_v3 = vld [vmem:[%s1194_s3] sm:$0xff] }
   0xd   :  { %860 = vmatpush3.msra.mxu1 %v1061_v25  ;;  %875 = vmatprep.mubr.msk.f32.mxu1 %vm949_vm1, %v948_v24 }
   0xe   :  { %861 = vmatprep.subr.mxu1 %v948_v24 }
   0xf   :  { %799 = vmatpush3.bf16.msra.mxu0 %v927_v7  ;;  %862 = vmatpush3.msra.mxu1 %v1069_v26  ;;  %v483_v7 = vlaneseq }
  0x10   :  { %800 = vmatprep.subr.bf16.mxu0 %v928_v8  ;;  %863 = vmatprep.subr.mxu1 %v948_v24 }
  0x11   :  { %864 = vmatpush3.msra.mxu1 %v1076_v27  ;;  %v484_v8 = vshrl.u32 %v483_v7, 7 }
  0x12   :  { %865 = vmatprep.subr.mxu1 %v948_v24 }
  0x13   :  { %801 = vmatpush3.bf16.msra.mxu0 %v929_v10  ;;  %866 = vmatpush3.msra.mxu1 %v1083_v28  ;;  %v485_v9 = vsub.s32 0, %v484_v8 }
  0x14   :  { %802 = vmatprep.subr.bf16.mxu0 %v930_v11  ;;  %867 = vmatprep.subr.mxu1 %v948_v24 }
  0x15   :  { %868 = vmatpush3.msra.mxu1 %v1090_v29 }
  0x16   :  { %869 = vmatprep.subr.mxu1 %v948_v24 }
  0x17   :  { %803 = vmatpush3.bf16.msra.mxu0 %v931_v13  ;;  %870 = vmatpush3.msra.mxu1 %v1097_v30 }
  0x18   :  { %804 = vmatprep.subr.bf16.mxu0 %v932_v14  ;;  %871 = vmatprep.subr.mxu1 %v948_v24 }
  0x19   :  { %872 = vmatpush3.msra.mxu1 %v1104_v31 }
  0x1a   :  { %873 = vmatprep.subr.mxu1 %v948_v24 }
  0x1b   :  { %805 = vmatpush3.bf16.msra.mxu0 %v934_v18  ;;  %874 = vmatpush3.msra.mxu1 %v1111_v32 }
  0x1c   :  { %806 = vmatprep.subr.bf16.mxu0 %v935_v19  ;;  %878 = vmatprep.subr.mxu1 %v948_v24 }
  0x1f   :  { %807 = vmatpush3.bf16.msra.mxu0 %v937_v20 }
  0x20   :  { %904 = vmatprep.subr.mxu0 %v948_v24 }
  0x22   :  { %246 = vmatmul.mubr.bf16.vlgmr.msra.gmra.mxu0 %v938_v21 }
  0x23   :  { %253 = vmatprep.mubr.bf16.mxu0 %v943_v22  ;;  %905 = vmatpush3.msra.mxu0 %v1122_v33 }
  0x24   :  { %906 = vmatprep.subr.mxu0 %v948_v24 }
  0x25   :  { %907 = vmatpush3.msra.mxu0 %v319_v3 }
  0x2a   :  { %254 = vmatmul.mubr.bf16.gmra.mxu0 %v945_v23 }
  0x2b   :  { %908 = vmatprep.mubr.msk.f32.mxu0 %vm949_vm1, %v948_v24 }
  0xcc   :  { %v857_v34 = vpop.f32.mrf.mxu1 }
  0xce   :  { %v296_v36 = vpop.f32.mrf.mxu1 }
  0xd0   :  { %v858_v39 = vpop.f32.mrf.mxu1 }
  0xd2   :  { %v299_v43 = vpop.f32.mrf.mxu1 }
  0xe2   :  { %v808_v35 = vpop.f32.mrf.mxu0 }
  0xe4   :  { %v809_v37 = vpop.f32.mrf.mxu0 }
  0xe5   :  { %v810_v41 = vadd.f32 %v809_v37, %v808_v35 }
  0xe6   :  { %v811_v38 = vpop.f32.mrf.mxu0 }
  0xe7   :  { %v297_v47 = vadd.f32 %v810_v41, %v296_v36  ;;  %v659_v36 = vld [vmem:[%s1195_s5] sm:$0x1] }
  0xe8   :  { %v812_v40 = vpop.f32.mrf.mxu0 }
  0xe9   :  { %v813_v42 = vadd.f32 %v812_v40, %v811_v38  ;;  %v322_v53 = vsel %vm321_vm2, %v297_v47, 0.0 }
  0xea   :  { %v814_v44 = vpop.f32.mrf.mxu0 }
  0xeb   :  { %v300_v45 = vadd.f32 %v813_v42, %v299_v43 }
  0xec   :  { %v815_v46 = vpop.f32.mrf.mxu0 }
  0xed   :  { %v816_v48 = vadd.f32 %v815_v46, %v814_v44  ;;  %v323_v50 = vsel %vm321_vm2, %v300_v45, 0.0 }
  0xee   :  { %v817_v49 = vpop.f32.mrf.mxu0  ;;  %v324_v56 = vadd.f32 %v323_v50, %v322_v53 }
  0xef   :  { %v305_v51 = vadd.f32 %v857_v34, %v816_v48 }
  0xf0   :  { %v818_v52 = vpop.f32.mrf.mxu0 }
  0xf1   :  { %v325_v54 = vsel %vm321_vm2, %v305_v51, 0.0  ;;  %v819_v55 = vadd.f32 %v818_v52, %v817_v49 }
  0xf2   :  { %v326_v58 = vadd.f32 %v325_v54, %v324_v56 }
  0xf3   :  { %v308_v57 = vadd.f32 %v858_v39, %v819_v55 }
  0xf5   :  { %v327_v59 = vsel %vm321_vm2, %v308_v57, 0.0 }
  0xf6   :  { %v328_v60 = vadd.f32 %v327_v59, %v326_v58 }
  0xf8   :  { %v329_v61 = vrot.slane %v328_v60, 4 }
  0xfa   :  { %v330_v62 = vadd.f32 %v329_v61, %v328_v60 }
  0xfc   :  { %v331_v63 = vrot.slane %v330_v62, 2 }
  0xfe   :  { %v332_v0 = vadd.f32 %v331_v63, %v330_v62 }
 0x100   :  { %v333_v1 = vrot.slane %v332_v0, 1 }
 0x102   :  { %v334_v2 = vadd.f32 %v333_v1, %v332_v0 }
 0x104   :  { %876 = vmatmul.mubr.msk.f32.vlgmr.msra.gmra.mxu1 %vm321_vm2, %v334_v2 }
 0x105   :  { %879 = vmatpush3.msra.mxu1 %v1122_v33  ;;  %882 = vmatprep.mubr.msk.f32.mxu1 %vm949_vm1, %v948_v24 }
 0x106   :  { %880 = vmatprep.subr.mxu1 %v948_v24 }
 0x107   :  { %881 = vmatpush3.msra.mxu1 %v319_v3 }
 0x108   :  { %885 = vmatprep.subr.mxu1 %v948_v24 }
 0x1c4   :  { %v404_v4 = vpop.f32.mrf.mxu1 }
 0x1c5   :  { %v408_v5 = vmul.f32 0.0078125, %v404_v4 }
 0x1c6   :  { %v877_v6 = vpop.f32.mrf.mxu1 }
 0x1c7   :  { %883 = vmatmul.mubr.msk.f32.vlgmr.msra.gmra.mxu1 %vm409_vm3, %v408_v5 }
 0x1c8   :  { %886 = vmatpush3.msra.mxu1 %v1061_v25  ;;  %901 = vmatprep.mubr.msk.f32.mxu1 %vm949_vm1, %v948_v24 }
 0x1c9   :  { %887 = vmatprep.subr.mxu1 %v948_v24 }
 0x1ca   :  { %888 = vmatpush3.msra.mxu1 %v1069_v26 }
 0x1cb   :  { %889 = vmatprep.subr.mxu1 %v948_v24 }
 0x1cc   :  { %890 = vmatpush3.msra.mxu1 %v1076_v27 }
 0x1cd   :  { %891 = vmatprep.subr.mxu1 %v948_v24 }
 0x1ce   :  { %892 = vmatpush3.msra.mxu1 %v1083_v28 }
 0x1cf   :  { %893 = vmatprep.subr.mxu1 %v948_v24 }
 0x1d0   :  { %894 = vmatpush3.msra.mxu1 %v1090_v29 }
 0x1d1   :  { %895 = vmatprep.subr.mxu1 %v948_v24 }
 0x1d2   :  { %896 = vmatpush3.msra.mxu1 %v1097_v30 }
 0x1d3   :  { %897 = vmatprep.subr.mxu1 %v948_v24 }
 0x1d4   :  { %898 = vmatpush3.msra.mxu1 %v1104_v31 }
 0x1d5   :  { %899 = vmatprep.subr.mxu1 %v948_v24 }
 0x1d6   :  { %900 = vmatpush3.msra.mxu1 %v1111_v32 }
 0x1d7   :  { %911 = vmatprep.subr.mxu1 %v948_v24 }
 0x287   :  { %v479_v10 = vpop.f32.mrf.mxu1 }
 0x288   :  { %v486_v11 = vrot.slane %v479_v10, %v485_v9 }
 0x289   :  { %v884_v12 = vpop.f32.mrf.mxu1 }
 0x28a   :  { %v487_v13 = vsub.f32 %v297_v47, %v486_v11  ;;  %v488_v14 = vsub.f32 %v300_v45, %v486_v11  ;;  %v489_v15 = vsub.f32 %v305_v51, %v486_v11  ;;  %v490_v16 = vsub.f32 %v308_v57, %v486_v11 }
 0x28c   :  { %v491_v17 = vmul.f32 %v487_v13, %v487_v13  ;;  %v492_v18 = vmul.f32 %v488_v14, %v488_v14  ;;  %v493_v19 = vmul.f32 %v489_v15, %v489_v15  ;;  %v494_v20 = vmul.f32 %v490_v16, %v490_v16 }
 0x28e   :  { %v495_v21 = vsel %vm321_vm2, %v491_v17, 0.0  ;;  %v496_v22 = vsel %vm321_vm2, %v492_v18, 0.0  ;;  %v498_v25 = vsel %vm321_vm2, %v493_v19, 0.0  ;;  %v500_v27 = vsel %vm321_vm2, %v494_v20, 0.0 }
 0x28f   :  { %v497_v23 = vadd.f32 %v496_v22, %v495_v21 }
 0x291   :  { %v499_v26 = vadd.f32 %v498_v25, %v497_v23 }
 0x293   :  { %v501_v28 = vadd.f32 %v500_v27, %v499_v26 }
 0x295   :  { %v502_v29 = vrot.slane %v501_v28, 4 }
 0x297   :  { %v503_v30 = vadd.f32 %v502_v29, %v501_v28 }
 0x299   :  { %v504_v31 = vrot.slane %v503_v30, 2 }
 0x29b   :  { %v505_v32 = vadd.f32 %v504_v31, %v503_v30 }
 0x29d   :  { %v506_v34 = vrot.slane %v505_v32, 1 }
 0x29f   :  { %v507_v35 = vadd.f32 %v506_v34, %v505_v32 }
 0x2a1   :  { %902 = vmatmul.mubr.msk.f32.vlgmr.msra.gmra.mxu1 %vm321_vm2, %v507_v35 }
 0x2a2   :  { %912 = vmatpush3.msra.mxu1 %v1122_v33  ;;  %915 = vmatprep.mubr.msk.f32.mxu1 %vm949_vm1, %v948_v24  ;;  %v582_v33 = vld [vmem:[%s1196_s4] sm:$0x1] }
 0x2a3   :  { %913 = vmatprep.subr.mxu1 %v948_v24 }
 0x2a4   :  { %914 = vmatpush3.msra.mxu1 %v319_v3 }
 0x2a5   :  { %916 = vmatmul.mubr.msk.f32.vlgmr.msra.gmra.mxu1 %vm409_vm3, %v659_v36 }
 0x361   :  { %v577_v37 = vpop.f32.mrf.mxu1 }
 0x362   :  { %v581_v38 = vmul.f32 0.0078125, %v577_v37 }
 0x363   :  { %v903_v39 = vpop.f32.mrf.mxu1 }
 0x364   :  { %v583_v40 = vadd.f32 1e-05, %v581_v38 }
 0x365   :  { %v729_v24 = vpop.f32.mrf.mxu1 }
 0x366   :  { %946 = vrsqrt.f32 %v583_v40  ;;  %v744_v46 = vrot.slane %v729_v24, %v485_v9 }
 0x367   :  { %v917_v43 = vpop.f32.mrf.mxu1 }
 0x373   :  { %v947_v41 = vpop.eup %946 }
 0x374   :  { %v585_v42 = vmul.f32 %v947_v41, %v582_v33 }
 0x376   :  { %909 = vmatmul.mubr.msk.f32.vlgmr.msra.gmra.mxu0 %vm409_vm3, %v585_v42 }
 0x436   :  { %v655_v44 = vpop.f32.mrf.mxu0 }
 0x437   :  { %v736_v45 = vrot.slane %v655_v44, %v485_v9 }
 0x438   :  { %v910_v47 = vpop.f32.mrf.mxu0 }
 0x439   :  { %v737_v48 = vmul.f32 %v736_v45, %v487_v13  ;;  %v738_v49 = vmul.f32 %v736_v45, %v488_v14  ;;  %v739_v50 = vmul.f32 %v736_v45, %v489_v15  ;;  %v740_v51 = vmul.f32 %v736_v45, %v490_v16 }
 0x43b   :  { %v745_v52 = vadd.f32 %v744_v46, %v737_v48  ;;  %v746_v53 = vadd.f32 %v744_v46, %v738_v49  ;;  %v747_v54 = vadd.f32 %v744_v46, %v739_v50  ;;  %v748_v55 = vadd.f32 %v744_v46, %v740_v51 }
 0x43d   :  { %v749_v56 = vmax.f32 %v745_v52, 0.0  ;;  %v750_v57 = vmax.f32 %v746_v53, 0.0  ;;  %v751_v58 = vmax.f32 %v747_v54, 0.0  ;;  %v752_v59 = vmax.f32 %v748_v55, 0.0 }
 0x43f   :  { %753 = vst.msk [vmem:[%s1197_s6] sm:$0xff] %vm321_vm2, %v749_v56  ;;  %754 = vst.msk [vmem:[%s1197_s6 + $0x8] sm:$0xff] %vm321_vm2, %v750_v57 }
 0x440   :  { %755 = vst.msk [vmem:[%s1197_s6 + $0x10] sm:$0xff] %vm321_vm2, %v751_v58  ;;  %756 = vst.msk [vmem:[%s1197_s6 + $0x18] sm:$0xff] %vm321_vm2, %v752_v59 }

// kernel: generator_stage2.12
= control target key start
LH: loop header
LB: loop body
LE: loop exit
PB: predicated region body
PF: predicated region fallthrough
CT: control target
= control target key end

     0   :  { %v1018_v0 = vmov 0   ;;  %vm184_vm0 = vcmask 130048   ;;  %v1019_v26 = vmov 0.0   ;;  %vm1020_vm1 = vmmov 0   ;;  %s1447_s1 = inlined_call_operand.vmem [shape: bf16[144,32], index: 1, kind: input, shape index: {}]   ;;  %s1448_s0 = inlined_call_operand.vmem [shape: bf16[128,144], index: 0, kind: input, shape index: {}]   ;;  %s1449_s2 = inlined_call_operand.vmem [shape: f32[32,8], index: 2, kind: input, shape index: {}]   ;;  %s1450_s3 = inlined_call_operand.vmem [shape: f32[8,32], index: 3, kind: input, shape index: {}]   ;;  %s1451_s4 = inlined_call_operand.vmem [shape: f32[1,8], index: 4, kind: input, shape index: {}]   ;;  %s1452_s5 = inlined_call_operand.vmem [shape: f32[1,8], index: 5, kind: input, shape index: {}]   ;;  %s1453_s6 = inlined_call_operand.vmem [shape: f32[128,32], index: 6, kind: output, shape index: {}]  }
   0x1   :  { %209 = vmatprep.subr.bf16.mxu0 %v1018_v0  ;;  %v983_v1 = vld [vmem:[%s1447_s1 + $0x38] sm:$0xff]   ;;  %962 = vmatprep.subr.bf16.mxu1 %v1018_v0  ;;  %v984_v2 = vld [vmem:[%s1447_s1 + $0x30] sm:$0xff]   ;;  %v985_v3 = vld [vmem:[%s1447_s1 + $0x28] sm:$0xff]   ;;  %vm311_vm2 = vcmask 261120   ;;  %vm423_vm3 = vcmask 64512  }
   0x2   :  { %210 = vmatpush1.bf16.msra.mxu0 %v983_v1  ;;  %971 = vmatpush1.bf16.msra.mxu1 %v983_v1  ;;  %v986_v4 = vld [vmem:[%s1447_s1 + $0x20] sm:$0xff]   ;;  %v987_v6 = vld [vmem:[%s1447_s1 + $0x18] sm:$0xff]   ;;  %v988_v8 = vld [vmem:[%s1447_s1 + $0x10] sm:$0xff]  }
   0x3   :  { %211 = vmatprep.subr.bf16.mxu0 %v1018_v0  ;;  %963 = vmatprep.subr.bf16.mxu1 %v1018_v0  ;;  %v994_v5 = vld [vmem:[%s1448_s0 + $0x4] ss:$8 sps:$4 sm:$0xff]   ;;  %v992_v12 = vld [vmem:[%s1448_s0] ss:$8 sps:$4 sm:$0xff]   ;;  %v995_v14 = vld [vmem:[%s1448_s0 + $0x14] ss:$8 sps:$4 sm:$0xff]  }
   0x4   :  { %896 = vmatprep.mubr.msk.bf16.mxu0 %vm184_vm0, %v994_v5  ;;  %v1009_v7 = vld [vmem:[%s1448_s0 + $0x64] ss:$8 sps:$4 sm:$0xff]   ;;  %v1007_v13 = vld [vmem:[%s1448_s0 + $0x60] ss:$8 sps:$4 sm:$0xff]   ;;  %v1013_v15 = vld [vmem:[%s1448_s0 + $0x74] ss:$8 sps:$4 sm:$0xff]  }
   0x5   :  { %902 = vmatprep.mubr.msk.bf16.mxu1 %vm184_vm0, %v1009_v7  ;;  %v989_v9 = vld [vmem:[%s1447_s1 + $0x8] sm:$0xff]   ;;  %v990_v10 = vld [vmem:[%s1447_s1] sm:$0xff]   ;;  %v997_v16 = vld [vmem:[%s1448_s0 + $0x10] ss:$8 sps:$4 sm:$0xff]  }
   0x6   :  { %212 = vmatpush1.bf16.msra.mxu0 %v984_v2  ;;  %972 = vmatpush1.bf16.msra.mxu1 %v984_v2  ;;  %v991_v11 = vld [vmem:[%s1447_s1 + $0x40] sm:$0xff]   ;;  %v1015_v17 = vld [vmem:[%s1448_s0 + $0x70] ss:$8 sps:$4 sm:$0xff]   ;;  %v1001_v20 = vld [vmem:[%s1448_s0 + $0x34] ss:$8 sps:$4 sm:$0xff]  }
   0x7   :  { %213 = vmatprep.subr.bf16.mxu0 %v1018_v0  ;;  %964 = vmatprep.subr.bf16.mxu1 %v1018_v0  ;;  %v998_v18 = vld [vmem:[%s1448_s0 + $0x24] ss:$8 sps:$4 sm:$0xff]   ;;  %v1000_v19 = vld [vmem:[%s1448_s0 + $0x20] ss:$8 sps:$4 sm:$0xff]   ;;  %v1003_v21 = vld [vmem:[%s1448_s0 + $0x30] ss:$8 sps:$4 sm:$0xff]  }
   0x8   :  { %v1004_v22 = vld [vmem:[%s1448_s0 + $0x44] ss:$8 sps:$4 sm:$0xff]   ;;  %v1006_v23 = vld [vmem:[%s1448_s0 + $0x40] ss:$8 sps:$4 sm:$0xff]   ;;  %v1010_v24 = vld [vmem:[%s1448_s0 + $0x54] ss:$8 sps:$4 sm:$0xff]  }
   0x9   :  { %v1012_v25 = vld [vmem:[%s1448_s0 + $0x50] ss:$8 sps:$4 sm:$0xff]   ;;  %v1157_v29 = vld [vmem:[%s1449_s2 + $0x8] sm:$0xff]  ;;  %v1164_v30 = vld [vmem:[%s1449_s2] sm:$0xff] }
   0xa   :  { %214 = vmatpush1.bf16.msra.mxu0 %v985_v3  ;;  %973 = vmatpush1.bf16.msra.mxu1 %v985_v3  ;;  %v1143_v27 = vld [vmem:[%s1449_s2 + $0x18] sm:$0xff]  ;;  %v1150_v28 = vld [vmem:[%s1449_s2 + $0x10] sm:$0xff] }
   0xb   :  { %215 = vmatprep.subr.bf16.mxu0 %v1018_v0  ;;  %965 = vmatprep.subr.bf16.mxu1 %v1018_v0 }
   0xe   :  { %216 = vmatpush1.bf16.msra.mxu0 %v986_v4  ;;  %974 = vmatpush1.bf16.msra.mxu1 %v986_v4 }
   0xf   :  { %217 = vmatprep.subr.bf16.mxu0 %v1018_v0  ;;  %966 = vmatprep.subr.bf16.mxu1 %v1018_v0 }
  0x12   :  { %218 = vmatpush1.bf16.msra.mxu0 %v987_v6  ;;  %975 = vmatpush1.bf16.msra.mxu1 %v987_v6 }
  0x13   :  { %219 = vmatprep.subr.bf16.mxu0 %v1018_v0  ;;  %967 = vmatprep.subr.bf16.mxu1 %v1018_v0 }
  0x16   :  { %220 = vmatpush1.bf16.msra.mxu0 %v988_v8  ;;  %976 = vmatpush1.bf16.msra.mxu1 %v988_v8 }
  0x17   :  { %221 = vmatprep.subr.bf16.mxu0 %v1018_v0  ;;  %968 = vmatprep.subr.bf16.mxu1 %v1018_v0 }
  0x1a   :  { %222 = vmatpush1.bf16.msra.mxu0 %v989_v9  ;;  %977 = vmatpush1.bf16.msra.mxu1 %v989_v9 }
  0x1b   :  { %223 = vmatprep.subr.bf16.mxu0 %v1018_v0  ;;  %969 = vmatprep.subr.bf16.mxu1 %v1018_v0 }
  0x1e   :  { %224 = vmatpush1.bf16.msra.mxu0 %v990_v10  ;;  %978 = vmatpush1.bf16.msra.mxu1 %v990_v10 }
  0x1f   :  { %239 = vmatprep.subr.bf16.mxu0 %v1018_v0  ;;  %970 = vmatprep.subr.bf16.mxu1 %v1018_v0 }
  0x22   :  { %240 = vmatpush2.bf16.msra.mxu0 %v991_v11  ;;  %979 = vmatpush2.bf16.msra.mxu1 %v991_v11 }
  0x23   :  { %925 = vmatprep.subr.mxu1 %v1019_v26 }
  0x25   :  { %242 = vmatmul.mubr.bf16.vlgmr.msra.gmra.mxu0 %v992_v12  ;;  %290 = vmatmul.mubr.bf16.vlgmr.msra.gmra.mxu1 %v1007_v13 }
  0x26   :  { %897 = vmatprep.mubr.msk.bf16.mxu0 %vm184_vm0, %v995_v14  ;;  %903 = vmatprep.mubr.msk.bf16.mxu1 %vm184_vm0, %v1013_v15 }
  0x27   :  { %926 = vmatpush3.msra.mxu1 %v1143_v27 }
  0x28   :  { %927 = vmatprep.subr.mxu1 %v1019_v26 }
  0x29   :  { %928 = vmatpush3.msra.mxu1 %v1150_v28 }
  0x2a   :  { %929 = vmatprep.subr.mxu1 %v1019_v26 }
  0x2b   :  { %930 = vmatpush3.msra.mxu1 %v1157_v29 }
  0x2c   :  { %931 = vmatprep.subr.mxu1 %v1019_v26 }
  0x2d   :  { %250 = vmatmul.mubr.bf16.gmra.mxu0 %v997_v16  ;;  %298 = vmatmul.mubr.bf16.gmra.mxu1 %v1015_v17 }
  0x2e   :  { %898 = vmatprep.mubr.msk.bf16.mxu0 %vm184_vm0, %v998_v18  ;;  %932 = vmatpush3.msra.mxu1 %v1164_v30 }
  0x2f   :  { %933 = vmatprep.mubr.msk.f32.mxu1 %vm1020_vm1, %v1019_v26  ;;  %936 = vmatprep.subr.mxu1 %v1019_v26 }
  0x35   :  { %258 = vmatmul.mubr.bf16.gmra.mxu0 %v1000_v19 }
  0x36   :  { %899 = vmatprep.mubr.msk.bf16.mxu0 %vm184_vm0, %v1001_v20 }
  0x3d   :  { %266 = vmatmul.mubr.bf16.gmra.mxu0 %v1003_v21 }
  0x3e   :  { %900 = vmatprep.mubr.msk.bf16.mxu0 %vm184_vm0, %v1004_v22 }
  0x45   :  { %274 = vmatmul.mubr.bf16.gmra.mxu0 %v1006_v23 }
  0x46   :  { %901 = vmatprep.mubr.msk.bf16.mxu0 %vm184_vm0, %v1010_v24 }
  0x4d   :  { %282 = vmatmul.mubr.bf16.gmra.mxu0 %v1012_v25 }
  0xe5   :  { %v1170_v31 = vpop.f32.mrf.mxu0  ;;  %v1172_v32 = vpop.f32.mrf.mxu1 }
  0xe6   :  { %v312_v53 = vsel %vm311_vm2, %v1170_v31, 0.0  ;;  %v335_v22 = vsel %vm311_vm2, %v1172_v32, 0.0 }
  0xe7   :  { %v245_v33 = vpop.f32.mrf.mxu0  ;;  %v293_v34 = vpop.f32.mrf.mxu1 }
  0xe9   :  { %v1174_v35 = vpop.f32.mrf.mxu0  ;;  %v1176_v36 = vpop.f32.mrf.mxu1 }
  0xea   :  { %v313_v51 = vsel %vm311_vm2, %v1174_v35, 0.0  ;;  %v337_v24 = vsel %vm311_vm2, %v1176_v36, 0.0 }
  0xeb   :  { %v248_v37 = vpop.f32.mrf.mxu0  ;;  %v296_v38 = vpop.f32.mrf.mxu1  ;;  %v314_v55 = vadd.f32 %v313_v51, %v312_v53  ;;  %v1237_v51 = vld [vmem:[%s1450_s3] sm:$0xff] }
  0xed   :  { %v1178_v39 = vpop.f32.mrf.mxu0  ;;  %v1180_v40 = vpop.f32.mrf.mxu1 }
  0xee   :  { %v315_v54 = vsel %vm311_vm2, %v1178_v39, 0.0  ;;  %v339_v33 = vsel %vm311_vm2, %v1180_v40, 0.0 }
  0xef   :  { %v253_v41 = vpop.f32.mrf.mxu0  ;;  %v301_v42 = vpop.f32.mrf.mxu1  ;;  %v316_v58 = vadd.f32 %v315_v54, %v314_v55 }
  0xf1   :  { %v1182_v43 = vpop.f32.mrf.mxu0  ;;  %v1184_v44 = vpop.f32.mrf.mxu1 }
  0xf2   :  { %v317_v57 = vsel %vm311_vm2, %v1182_v43, 0.0  ;;  %v341_v37 = vsel %vm311_vm2, %v1184_v44, 0.0 }
  0xf3   :  { %v256_v45 = vpop.f32.mrf.mxu0  ;;  %v304_v46 = vpop.f32.mrf.mxu1  ;;  %v318_v61 = vadd.f32 %v317_v57, %v316_v58 }
  0xf5   :  { %v1186_v47 = vpop.f32.mrf.mxu0 }
  0xf6   :  { %v319_v60 = vsel %vm311_vm2, %v1186_v47, 0.0 }
  0xf7   :  { %v261_v48 = vpop.f32.mrf.mxu0  ;;  %v320_v0 = vadd.f32 %v319_v60, %v318_v61 }
  0xf9   :  { %v1188_v49 = vpop.f32.mrf.mxu0 }
  0xfa   :  { %v321_v63 = vsel %vm311_vm2, %v1188_v49, 0.0 }
  0xfb   :  { %v264_v50 = vpop.f32.mrf.mxu0  ;;  %v322_v3 = vadd.f32 %v321_v63, %v320_v0 }
  0xfd   :  { %v1192_v52 = vpop.f32.mrf.mxu0 }
  0xfe   :  { %v323_v2 = vsel %vm311_vm2, %v1192_v52, 0.0 }
  0xff   :  { %v269_v56 = vpop.f32.mrf.mxu0  ;;  %v324_v6 = vadd.f32 %v323_v2, %v322_v3 }
 0x100   :  { %v497_v56 = vlaneseq }
 0x101   :  { %v1200_v59 = vpop.f32.mrf.mxu0 }
 0x102   :  { %v325_v5 = vsel %vm311_vm2, %v1200_v59, 0.0  ;;  %v498_v57 = vshrl.u32 %v497_v56, 7 }
 0x103   :  { %v272_v62 = vpop.f32.mrf.mxu0  ;;  %v326_v9 = vadd.f32 %v325_v5, %v324_v6 }
 0x105   :  { %v1206_v1 = vpop.f32.mrf.mxu0 }
 0x106   :  { %v327_v8 = vsel %vm311_vm2, %v1206_v1, 0.0 }
 0x107   :  { %v277_v4 = vpop.f32.mrf.mxu0  ;;  %v328_v12 = vadd.f32 %v327_v8, %v326_v9 }
 0x109   :  { %v1212_v7 = vpop.f32.mrf.mxu0 }
 0x10a   :  { %v329_v11 = vsel %vm311_vm2, %v1212_v7, 0.0 }
 0x10b   :  { %v280_v10 = vpop.f32.mrf.mxu0  ;;  %v330_v15 = vadd.f32 %v329_v11, %v328_v12 }
 0x10d   :  { %v1218_v13 = vpop.f32.mrf.mxu0 }
 0x10e   :  { %v331_v14 = vsel %vm311_vm2, %v1218_v13, 0.0 }
 0x10f   :  { %v285_v16 = vpop.f32.mrf.mxu0  ;;  %v332_v17 = vadd.f32 %v331_v14, %v330_v15 }
 0x111   :  { %v1222_v18 = vpop.f32.mrf.mxu0 }
 0x112   :  { %v333_v19 = vsel %vm311_vm2, %v1222_v18, 0.0 }
 0x113   :  { %v334_v20 = vadd.f32 %v333_v19, %v332_v17  ;;  %v288_v21 = vpop.f32.mrf.mxu0 }
 0x115   :  { %v336_v23 = vadd.f32 %v335_v22, %v334_v20 }
 0x117   :  { %v338_v25 = vadd.f32 %v337_v24, %v336_v23 }
 0x119   :  { %v340_v34 = vadd.f32 %v339_v33, %v338_v25 }
 0x11b   :  { %v342_v38 = vadd.f32 %v341_v37, %v340_v34 }
 0x11d   :  { %v343_v41 = vrot.slane %v342_v38, 4 }
 0x11f   :  { %v344_v42 = vadd.f32 %v343_v41, %v342_v38 }
 0x121   :  { %v345_v45 = vrot.slane %v344_v42, 2 }
 0x123   :  { %v346_v46 = vadd.f32 %v345_v45, %v344_v42 }
 0x125   :  { %v347_v48 = vrot.slane %v346_v46, 1 }
 0x127   :  { %v348_v50 = vadd.f32 %v347_v48, %v346_v46 }
 0x129   :  { %934 = vmatmul.mubr.msk.f32.vlgmr.msra.gmra.mxu1 %vm311_vm2, %v348_v50 }
 0x12a   :  { %937 = vmatpush3.msra.mxu1 %v1237_v51  ;;  %938 = vmatprep.mubr.msk.f32.mxu1 %vm1020_vm1, %v1019_v26 }
 0x12b   :  { %941 = vmatprep.subr.mxu1 %v1019_v26 }
 0x1e9   :  { %v418_v53 = vpop.f32.mrf.mxu1 }
 0x1ea   :  { %v422_v54 = vmul.f32 0.001953125, %v418_v53 }
 0x1eb   :  { %v935_v55 = vpop.f32.mrf.mxu1 }
 0x1ec   :  { %939 = vmatmul.mubr.msk.f32.vlgmr.msra.gmra.mxu1 %vm423_vm3, %v422_v54 }
 0x1ed   :  { %942 = vmatpush3.msra.mxu1 %v1143_v27  ;;  %949 = vmatprep.mubr.msk.f32.mxu1 %vm1020_vm1, %v1019_v26  ;;  %v1255_v27 = vsub.s32 0, %v498_v57 }
 0x1ee   :  { %943 = vmatprep.subr.mxu1 %v1019_v26 }
 0x1ef   :  { %944 = vmatpush3.msra.mxu1 %v1150_v28 }
 0x1f0   :  { %945 = vmatprep.subr.mxu1 %v1019_v26 }
 0x1f1   :  { %946 = vmatpush3.msra.mxu1 %v1157_v29 }
 0x1f2   :  { %947 = vmatprep.subr.mxu1 %v1019_v26 }
 0x1f3   :  { %948 = vmatpush3.msra.mxu1 %v1164_v30 }
 0x1f4   :  { %952 = vmatprep.subr.mxu1 %v1019_v26 }
 0x2ac   :  { %v493_v58 = vpop.f32.mrf.mxu1 }
 0x2ad   :  { %v500_v60 = vrot.slane %v493_v58, %v1255_v27 }
 0x2ae   :  { %v940_v61 = vpop.f32.mrf.mxu1 }
 0x2af   :  { %v1259_v28 = vsub.f32 %v1170_v31, %v500_v60  ;;  %v1262_v62 = vsub.f32 %v1174_v35, %v500_v60  ;;  %v1265_v29 = vsub.f32 %v1178_v39, %v500_v60  ;;  %v1268_v30 = vsub.f32 %v1182_v43, %v500_v60 }
 0x2b0   :  { %v1275_v2 = vsub.f32 %v1186_v47, %v500_v60  ;;  %v1280_v35 = vsub.f32 %v1188_v49, %v500_v60  ;;  %v1287_v5 = vsub.f32 %v1192_v52, %v500_v60  ;;  %v1293_v49 = vsub.f32 %v1200_v59, %v500_v60 }
 0x2b1   :  { %v517_v63 = vmul.f32 %v1259_v28, %v1259_v28  ;;  %v518_v0 = vmul.f32 %v1262_v62, %v1262_v62  ;;  %v519_v31 = vmul.f32 %v1265_v29, %v1265_v29  ;;  %v520_v39 = vmul.f32 %v1268_v30, %v1268_v30 }
 0x2b2   :  { %v521_v47 = vmul.f32 %v1275_v2, %v1275_v2  ;;  %v522_v9 = vmul.f32 %v1280_v35, %v1280_v35  ;;  %v1299_v12 = vsub.f32 %v1206_v1, %v500_v60  ;;  %v523_v52 = vmul.f32 %v1287_v5, %v1287_v5 }
 0x2b3   :  { %v533_v43 = vsel %vm311_vm2, %v517_v63, 0.0  ;;  %v534_v3 = vsel %vm311_vm2, %v518_v0, 0.0  ;;  %v536_v6 = vsel %vm311_vm2, %v519_v31, 0.0  ;;  %v538_v10 = vsel %vm311_vm2, %v520_v39, 0.0 }
 0x2b4   :  { %v535_v4 = vadd.f32 %v534_v3, %v533_v43  ;;  %v540_v14 = vsel %vm311_vm2, %v521_v47, 0.0  ;;  %v1305_v16 = vsub.f32 %v1212_v7, %v500_v60  ;;  %v524_v59 = vmul.f32 %v1293_v49, %v1293_v49 }
 0x2b5   :  { %v542_v17 = vsel %vm311_vm2, %v522_v9, 0.0  ;;  %v1311_v20 = vsub.f32 %v1218_v13, %v500_v60  ;;  %v525_v1 = vmul.f32 %v1299_v12, %v1299_v12  ;;  %v544_v21 = vsel %vm311_vm2, %v523_v52, 0.0 }
 0x2b6   :  { %v537_v8 = vadd.f32 %v536_v6, %v535_v4  ;;  %v1317_v23 = vsub.f32 %v1222_v18, %v500_v60  ;;  %v526_v7 = vmul.f32 %v1305_v16, %v1305_v16  ;;  %v546_v24 = vsel %vm311_vm2, %v524_v59, 0.0 }
 0x2b7   :  { %v1323_v33 = vsub.f32 %v1172_v32, %v500_v60  ;;  %v527_v13 = vmul.f32 %v1311_v20, %v1311_v20  ;;  %v548_v34 = vsel %vm311_vm2, %v525_v1, 0.0  ;;  %v1329_v38 = vsub.f32 %v1176_v36, %v500_v60 }
 0x2b8   :  { %v539_v11 = vadd.f32 %v538_v10, %v537_v8  ;;  %v528_v18 = vmul.f32 %v1317_v23, %v1317_v23  ;;  %v550_v41 = vsel %vm311_vm2, %v526_v7, 0.0  ;;  %v1335_v45 = vsub.f32 %v1180_v40, %v500_v60 }
 0x2b9   :  { %v529_v32 = vmul.f32 %v1323_v33, %v1323_v33  ;;  %v552_v46 = vsel %vm311_vm2, %v527_v13, 0.0  ;;  %v516_v50 = vsub.f32 %v1184_v44, %v500_v60  ;;  %v530_v36 = vmul.f32 %v1329_v38, %v1329_v38 }
 0x2ba   :  { %v541_v15 = vadd.f32 %v540_v14, %v539_v11  ;;  %v554_v53 = vsel %vm311_vm2, %v528_v18, 0.0  ;;  %v531_v55 = vmul.f32 %v1335_v45, %v1335_v45  ;;  %v644_v11 = vld [vmem:[%s1451_s4] sm:$0x1] }
 0x2bb   :  { %v556_v40 = vsel %vm311_vm2, %v529_v32, 0.0  ;;  %v532_v57 = vmul.f32 %v516_v50, %v516_v50  ;;  %v558_v58 = vsel %vm311_vm2, %v530_v36, 0.0 }
 0x2bc   :  { %v543_v19 = vadd.f32 %v542_v17, %v541_v15  ;;  %v560_v63 = vsel %vm311_vm2, %v531_v55, 0.0  ;;  %v721_v15 = vld [vmem:[%s1452_s5] sm:$0x1] }
 0x2bd   :  { %v562_v44 = vsel %vm311_vm2, %v532_v57, 0.0 }
 0x2be   :  { %v545_v22 = vadd.f32 %v544_v21, %v543_v19 }
 0x2c0   :  { %v547_v25 = vadd.f32 %v546_v24, %v545_v22 }
 0x2c2   :  { %v549_v37 = vadd.f32 %v548_v34, %v547_v25 }
 0x2c4   :  { %v551_v42 = vadd.f32 %v550_v41, %v549_v37 }
 0x2c6   :  { %v553_v48 = vadd.f32 %v552_v46, %v551_v42 }
 0x2c8   :  { %v555_v54 = vadd.f32 %v554_v53, %v553_v48 }
 0x2ca   :  { %v557_v56 = vadd.f32 %v556_v40, %v555_v54 }
 0x2cc   :  { %v559_v61 = vadd.f32 %v558_v58, %v557_v56 }
 0x2ce   :  { %v561_v0 = vadd.f32 %v560_v63, %v559_v61 }
 0x2d0   :  { %v563_v60 = vadd.f32 %v562_v44, %v561_v0 }
 0x2d2   :  { %v564_v31 = vrot.slane %v563_v60, 4 }
 0x2d4   :  { %v565_v39 = vadd.f32 %v564_v31, %v563_v60 }
 0x2d6   :  { %v566_v43 = vrot.slane %v565_v39, 2 }
 0x2d8   :  { %v567_v3 = vadd.f32 %v566_v43, %v565_v39 }
 0x2da   :  { %v568_v4 = vrot.slane %v567_v3, 1 }
 0x2dc   :  { %v569_v47 = vadd.f32 %v568_v4, %v567_v3 }
 0x2de   :  { %950 = vmatmul.mubr.msk.f32.vlgmr.msra.gmra.mxu1 %vm311_vm2, %v569_v47 }
 0x2df   :  { %953 = vmatpush3.msra.mxu1 %v1237_v51  ;;  %954 = vmatprep.mubr.msk.f32.mxu1 %vm1020_vm1, %v1019_v26 }
 0x2e0   :  { %957 = vmatprep.subr.mxu1 %v1019_v26 }
 0x39e   :  { %v639_v6 = vpop.f32.mrf.mxu1 }
 0x39f   :  { %v643_v8 = vmul.f32 0.001953125, %v639_v6 }
 0x3a0   :  { %v951_v9 = vpop.f32.mrf.mxu1 }
 0x3a1   :  { %v645_v10 = vadd.f32 1e-05, %v643_v8 }
 0x3a3   :  { %1016 = vrsqrt.f32 %v645_v10 }
 0x3b0   :  { %v1017_v52 = vpop.eup %1016 }
 0x3b1   :  { %v647_v14 = vmul.f32 %v1017_v52, %v644_v11 }
 0x3b3   :  { %955 = vmatmul.mubr.msk.f32.vlgmr.msra.gmra.mxu1 %vm423_vm3, %v647_v14 }
 0x3b4   :  { %958 = vmatpush3.msra.mxu1 %v1237_v51  ;;  %959 = vmatprep.mubr.msk.f32.mxu1 %vm1020_vm1, %v1019_v26 }
 0x3b7   :  { %960 = vmatmul.mubr.msk.f32.vlgmr.msra.gmra.mxu1 %vm423_vm3, %v721_v15 }
 0x473   :  { %v717_v59 = vpop.f32.mrf.mxu1 }
 0x474   :  { %v798_v17 = vrot.slane %v717_v59, %v1255_v27 }
 0x475   :  { %v956_v19 = vpop.f32.mrf.mxu1 }
 0x476   :  { %v799_v1 = vmul.f32 %v798_v17, %v1259_v28  ;;  %v800_v22 = vmul.f32 %v798_v17, %v1262_v62  ;;  %v801_v51 = vmul.f32 %v798_v17, %v1265_v29  ;;  %v802_v7 = vmul.f32 %v798_v17, %v1268_v30 }
 0x477   :  { %v791_v21 = vpop.f32.mrf.mxu1  ;;  %v803_v26 = vmul.f32 %v798_v17, %v1275_v2  ;;  %v804_v24 = vmul.f32 %v798_v17, %v1280_v35  ;;  %v805_v25 = vmul.f32 %v798_v17, %v1287_v5  ;;  %v806_v13 = vmul.f32 %v798_v17, %v1293_v49 }
 0x478   :  { %v807_v34 = vmul.f32 %v798_v17, %v1299_v12  ;;  %v808_v28 = vmul.f32 %v798_v17, %v1305_v16  ;;  %v809_v18 = vmul.f32 %v798_v17, %v1311_v20  ;;  %v810_v62 = vmul.f32 %v798_v17, %v1317_v23 }
 0x479   :  { %v961_v37 = vpop.f32.mrf.mxu1  ;;  %v818_v29 = vrot.slane %v791_v21, %v1255_v27  ;;  %v811_v30 = vmul.f32 %v798_v17, %v1323_v33  ;;  %v812_v2 = vmul.f32 %v798_v17, %v1329_v38  ;;  %v813_v35 = vmul.f32 %v798_v17, %v1335_v45 }
 0x47a   :  { %v814_v5 = vmul.f32 %v798_v17, %v516_v50 }
 0x47b   :  { %v819_v41 = vadd.f32 %v818_v29, %v799_v1  ;;  %v820_v49 = vadd.f32 %v818_v29, %v800_v22  ;;  %v821_v42 = vadd.f32 %v818_v29, %v801_v51  ;;  %v822_v12 = vadd.f32 %v818_v29, %v802_v7 }
 0x47c   :  { %v823_v32 = vadd.f32 %v818_v29, %v803_v26  ;;  %v824_v46 = vadd.f32 %v818_v29, %v804_v24  ;;  %v825_v16 = vadd.f32 %v818_v29, %v805_v25  ;;  %v826_v48 = vadd.f32 %v818_v29, %v806_v13 }
 0x47d   :  { %v827_v20 = vadd.f32 %v818_v29, %v807_v34  ;;  %v828_v36 = vadd.f32 %v818_v29, %v808_v28  ;;  %v829_v23 = vadd.f32 %v818_v29, %v809_v18  ;;  %v830_v53 = vadd.f32 %v818_v29, %v810_v62 }
 0x47e   :  { %v831_v27 = vadd.f32 %v818_v29, %v811_v30  ;;  %v832_v54 = vadd.f32 %v818_v29, %v812_v2  ;;  %v833_v33 = vadd.f32 %v818_v29, %v813_v35  ;;  %v834_v55 = vadd.f32 %v818_v29, %v814_v5 }
 0x47f   :  { %v835_v38 = vmax.f32 %v819_v41, 0.0  ;;  %v836_v40 = vmax.f32 %v820_v49, 0.0  ;;  %v837_v45 = vmax.f32 %v821_v42, 0.0  ;;  %v838_v50 = vmax.f32 %v822_v12, 0.0 }
 0x480   :  { %v839_v56 = vmax.f32 %v823_v32, 0.0  ;;  %v840_v57 = vmax.f32 %v824_v46, 0.0  ;;  %v841_v58 = vmax.f32 %v825_v16, 0.0  ;;  %v842_v61 = vmax.f32 %v826_v48, 0.0 }
 0x481   :  { %v843_v63 = vmax.f32 %v827_v20, 0.0  ;;  %v844_v0 = vmax.f32 %v828_v36, 0.0  ;;  %v845_v44 = vmax.f32 %v829_v23, 0.0  ;;  %v846_v60 = vmax.f32 %v830_v53, 0.0  ;;  %851 = vst.msk [vmem:[%s1453_s6] sm:$0xff] %vm311_vm2, %v835_v38  ;;  %852 = vst.msk [vmem:[%s1453_s6 + $0x8] sm:$0xff] %vm311_vm2, %v836_v40 }
 0x482   :  { %853 = vst.msk [vmem:[%s1453_s6 + $0x10] sm:$0xff] %vm311_vm2, %v837_v45  ;;  %854 = vst.msk [vmem:[%s1453_s6 + $0x18] sm:$0xff] %vm311_vm2, %v838_v50  ;;  %v847_v31 = vmax.f32 %v831_v27, 0.0  ;;  %v848_v39 = vmax.f32 %v832_v54, 0.0  ;;  %v849_v43 = vmax.f32 %v833_v33, 0.0  ;;  %v850_v3 = vmax.f32 %v834_v55, 0.0 }
 0x483   :  { %855 = vst.msk [vmem:[%s1453_s6 + $0x20] sm:$0xff] %vm311_vm2, %v839_v56  ;;  %856 = vst.msk [vmem:[%s1453_s6 + $0x28] sm:$0xff] %vm311_vm2, %v840_v57 }
 0x484   :  { %857 = vst.msk [vmem:[%s1453_s6 + $0x30] sm:$0xff] %vm311_vm2, %v841_v58  ;;  %858 = vst.msk [vmem:[%s1453_s6 + $0x38] sm:$0xff] %vm311_vm2, %v842_v61 }
 0x485   :  { %859 = vst.msk [vmem:[%s1453_s6 + $0x40] sm:$0xff] %vm311_vm2, %v843_v63  ;;  %860 = vst.msk [vmem:[%s1453_s6 + $0x48] sm:$0xff] %vm311_vm2, %v844_v0 }
 0x486   :  { %861 = vst.msk [vmem:[%s1453_s6 + $0x50] sm:$0xff] %vm311_vm2, %v845_v44  ;;  %862 = vst.msk [vmem:[%s1453_s6 + $0x58] sm:$0xff] %vm311_vm2, %v846_v60 }
 0x487   :  { %863 = vst.msk [vmem:[%s1453_s6 + $0x60] sm:$0xff] %vm311_vm2, %v847_v31  ;;  %864 = vst.msk [vmem:[%s1453_s6 + $0x68] sm:$0xff] %vm311_vm2, %v848_v39 }
 0x488   :  { %865 = vst.msk [vmem:[%s1453_s6 + $0x70] sm:$0xff] %vm311_vm2, %v849_v43  ;;  %866 = vst.msk [vmem:[%s1453_s6 + $0x78] sm:$0xff] %vm311_vm2, %v850_v3 }

// kernel: generator_stage2.13
= control target key start
LH: loop header
LB: loop body
LE: loop exit
PB: predicated region body
PF: predicated region fallthrough
CT: control target
= control target key end

     0   :  { %vm369_vm0 = vcmask 1043456   ;;  %vm272_vm1 = vcmask 588800   ;;  %vm726_vm2 = vcmask 97280   ;;  %s1566_s1 = inlined_call_operand.vmem [shape: bf16[72,12], index: 1, kind: input, shape index: {}]   ;;  %s1567_s0 = inlined_call_operand.vmem [shape: bf16[512,72], index: 0, kind: input, shape index: {}]   ;;  %s1568_s2 = inlined_call_operand.vmem [shape: f32[512,12], index: 2, kind: output, shape index: {}]  }
   0x1   :  { %v987_v0 = vld [vmem:[%s1566_s1 + $0x20] ss:$0 sps:$4 sm:$0xff]   ;;  %v988_v1 = vld [vmem:[%s1566_s1 + $0x18] sm:$0xff]   ;;  %v989_v3 = vld [vmem:[%s1566_s1 + $0x10] sm:$0xff]  }
   0x2   :  { %985 = vmatprep.subr.msk.bf16.mxu0 %vm369_vm0, %v987_v0  ;;  %986 = vmatprep.subr.msk.bf16.mxu1 %vm369_vm0, %v987_v0  ;;  %v371_v2 = vsel %vm369_vm0, %v987_v0, 0  ;;  %v992_v4 = vld [vmem:[%s1567_s0] sm:$0xff]   ;;  %v990_v6 = vld [vmem:[%s1566_s1 + $0x8] sm:$0xff]   ;;  %v996_v10 = vld [vmem:[%s1567_s0 + $0x10] sm:$0xff]  }
   0x3   :  { %902 = vmatpush3.bf16.msra.mxu0 %v371_v2  ;;  %980 = vmatpush3.bf16.msra.mxu1 %v371_v2  ;;  %v993_v5 = vld [vmem:[%s1567_s0 + $0x80] sm:$0xff]   ;;  %v994_v8 = vld [vmem:[%s1567_s0 + $0x8] sm:$0xff]   ;;  %v997_v11 = vld [vmem:[%s1567_s0 + $0x90] sm:$0xff]  }
   0x4   :  { %903 = vmatprep.subr.bf16.mxu0 %v988_v1  ;;  %976 = vmatprep.subr.bf16.mxu1 %v988_v1  ;;  %v991_v7 = vld [vmem:[%s1566_s1] sm:$0xff]   ;;  %v995_v9 = vld [vmem:[%s1567_s0 + $0x88] sm:$0xff]   ;;  %v998_v12 = vld [vmem:[%s1567_s0 + $0x18] sm:$0xff]  }
   0x5   :  { %911 = vmatprep.mubr.msk.bf16.mxu0 %vm272_vm1, %v992_v4  ;;  %943 = vmatprep.mubr.msk.bf16.mxu1 %vm272_vm1, %v993_v5  ;;  %v999_v13 = vld [vmem:[%s1567_s0 + $0x98] sm:$0xff]   ;;  %v1000_v14 = vld [vmem:[%s1567_s0 + $0x20] sm:$0xff]   ;;  %v1002_v16 = vld [vmem:[%s1567_s0 + $0x28] sm:$0xff]  }
   0x6   :  { %v1001_v15 = vld [vmem:[%s1567_s0 + $0xa0] sm:$0xff]   ;;  %v1003_v17 = vld [vmem:[%s1567_s0 + $0xa8] sm:$0xff]   ;;  %v1004_v18 = vld [vmem:[%s1567_s0 + $0x30] sm:$0xff]  }
   0x7   :  { %904 = vmatpush3.bf16.msra.mxu0 %v988_v1  ;;  %981 = vmatpush3.bf16.msra.mxu1 %v988_v1  ;;  %v1005_v19 = vld [vmem:[%s1567_s0 + $0xb0] sm:$0xff]   ;;  %v1006_v20 = vld [vmem:[%s1567_s0 + $0x38] sm:$0xff]   ;;  %v1008_v22 = vld [vmem:[%s1567_s0 + $0x40] sm:$0xff]  }
   0x8   :  { %905 = vmatprep.subr.bf16.mxu0 %v989_v3  ;;  %977 = vmatprep.subr.bf16.mxu1 %v989_v3  ;;  %v1007_v21 = vld [vmem:[%s1567_s0 + $0xb8] sm:$0xff]   ;;  %v1009_v23 = vld [vmem:[%s1567_s0 + $0xc0] sm:$0xff]   ;;  %v1010_v24 = vld [vmem:[%s1567_s0 + $0x48] sm:$0xff]  }
   0x9   :  { %v1011_v25 = vld [vmem:[%s1567_s0 + $0xc8] sm:$0xff]   ;;  %v1012_v26 = vld [vmem:[%s1567_s0 + $0x50] sm:$0xff]   ;;  %v1014_v28 = vld [vmem:[%s1567_s0 + $0x58] sm:$0xff]  }
   0xa   :  { %v1013_v27 = vld [vmem:[%s1567_s0 + $0xd0] sm:$0xff]   ;;  %v1015_v29 = vld [vmem:[%s1567_s0 + $0xd8] sm:$0xff]   ;;  %v1016_v30 = vld [vmem:[%s1567_s0 + $0x60] sm:$0xff]  }
   0xb   :  { %906 = vmatpush3.bf16.msra.mxu0 %v989_v3  ;;  %982 = vmatpush3.bf16.msra.mxu1 %v989_v3  ;;  %v1017_v31 = vld [vmem:[%s1567_s0 + $0xe0] sm:$0xff]   ;;  %v1018_v32 = vld [vmem:[%s1567_s0 + $0x68] sm:$0xff]   ;;  %v1020_v34 = vld [vmem:[%s1567_s0 + $0x70] sm:$0xff]  }
   0xc   :  { %907 = vmatprep.subr.bf16.mxu0 %v990_v6  ;;  %978 = vmatprep.subr.bf16.mxu1 %v990_v6  ;;  %v1019_v33 = vld [vmem:[%s1567_s0 + $0xe8] sm:$0xff]   ;;  %v1021_v35 = vld [vmem:[%s1567_s0 + $0xf0] sm:$0xff]   ;;  %v1022_v36 = vld [vmem:[%s1567_s0 + $0x78] sm:$0xff]  }
   0xd   :  { %v1023_v37 = vld [vmem:[%s1567_s0 + $0xf8] sm:$0xff]  }
   0xf   :  { %908 = vmatpush3.bf16.msra.mxu0 %v990_v6  ;;  %983 = vmatpush3.bf16.msra.mxu1 %v990_v6 }
  0x10   :  { %909 = vmatprep.subr.bf16.mxu0 %v991_v7  ;;  %979 = vmatprep.subr.bf16.mxu1 %v991_v7 }
  0x13   :  { %910 = vmatpush3.bf16.msra.mxu0 %v991_v7  ;;  %984 = vmatpush3.bf16.msra.mxu1 %v991_v7 }
  0x16   :  { %912 = vmatmul.mubr.msk.bf16.vlgmr.msra.gmra.mxu0 %vm272_vm1, %v994_v8  ;;  %944 = vmatmul.mubr.msk.bf16.vlgmr.msra.gmra.mxu1 %vm272_vm1, %v995_v9 }
  0x17   :  { %915 = vmatprep.mubr.msk.bf16.mxu0 %vm272_vm1, %v996_v10  ;;  %947 = vmatprep.mubr.msk.bf16.mxu1 %vm272_vm1, %v997_v11 }
  0x1e   :  { %916 = vmatmul.mubr.msk.bf16.gmra.mxu0 %vm272_vm1, %v998_v12  ;;  %948 = vmatmul.mubr.msk.bf16.gmra.mxu1 %vm272_vm1, %v999_v13 }
  0x1f   :  { %919 = vmatprep.mubr.msk.bf16.mxu0 %vm272_vm1, %v1000_v14  ;;  %951 = vmatprep.mubr.msk.bf16.mxu1 %vm272_vm1, %v1001_v15 }
  0x26   :  { %920 = vmatmul.mubr.msk.bf16.gmra.mxu0 %vm272_vm1, %v1002_v16  ;;  %952 = vmatmul.mubr.msk.bf16.gmra.mxu1 %vm272_vm1, %v1003_v17 }
  0x27   :  { %923 = vmatprep.mubr.msk.bf16.mxu0 %vm272_vm1, %v1004_v18  ;;  %955 = vmatprep.mubr.msk.bf16.mxu1 %vm272_vm1, %v1005_v19 }
  0x2e   :  { %924 = vmatmul.mubr.msk.bf16.gmra.mxu0 %vm272_vm1, %v1006_v20  ;;  %956 = vmatmul.mubr.msk.bf16.gmra.mxu1 %vm272_vm1, %v1007_v21 }
  0x2f   :  { %927 = vmatprep.mubr.msk.bf16.mxu0 %vm272_vm1, %v1008_v22  ;;  %959 = vmatprep.mubr.msk.bf16.mxu1 %vm272_vm1, %v1009_v23 }
  0x36   :  { %928 = vmatmul.mubr.msk.bf16.gmra.mxu0 %vm272_vm1, %v1010_v24  ;;  %960 = vmatmul.mubr.msk.bf16.gmra.mxu1 %vm272_vm1, %v1011_v25 }
  0x37   :  { %931 = vmatprep.mubr.msk.bf16.mxu0 %vm272_vm1, %v1012_v26  ;;  %963 = vmatprep.mubr.msk.bf16.mxu1 %vm272_vm1, %v1013_v27 }
  0x3e   :  { %932 = vmatmul.mubr.msk.bf16.gmra.mxu0 %vm272_vm1, %v1014_v28  ;;  %964 = vmatmul.mubr.msk.bf16.gmra.mxu1 %vm272_vm1, %v1015_v29 }
  0x3f   :  { %935 = vmatprep.mubr.msk.bf16.mxu0 %vm272_vm1, %v1016_v30  ;;  %967 = vmatprep.mubr.msk.bf16.mxu1 %vm272_vm1, %v1017_v31 }
  0x46   :  { %936 = vmatmul.mubr.msk.bf16.gmra.mxu0 %vm272_vm1, %v1018_v32  ;;  %968 = vmatmul.mubr.msk.bf16.gmra.mxu1 %vm272_vm1, %v1019_v33 }
  0x47   :  { %939 = vmatprep.mubr.msk.bf16.mxu0 %vm272_vm1, %v1020_v34  ;;  %971 = vmatprep.mubr.msk.bf16.mxu1 %vm272_vm1, %v1021_v35 }
  0x4e   :  { %940 = vmatmul.mubr.msk.bf16.gmra.mxu0 %vm272_vm1, %v1022_v36  ;;  %972 = vmatmul.mubr.msk.bf16.gmra.mxu1 %vm272_vm1, %v1023_v37 }
  0xd6   :  { %v913_v38 = vpop.f32.mrf.mxu0  ;;  %v945_v39 = vpop.f32.mrf.mxu1 }
  0xd7   :  { %1024 = vtanh.f32 %v913_v38 }
  0xd8   :  { %1026 = vtanh.f32 %v945_v39  ;;  %v407_v40 = vpop.f32.mrf.mxu0  ;;  %v535_v41 = vpop.f32.mrf.mxu1 }
  0xd9   :  { %1028 = vtanh.f32 %v407_v40 }
  0xda   :  { %1030 = vtanh.f32 %v535_v41  ;;  %v914_v42 = vpop.f32.mrf.mxu0  ;;  %v946_v43 = vpop.f32.mrf.mxu1 }
  0xdb   :  { %1032 = vtanh.f32 %v914_v42 }
  0xdc   :  { %1034 = vtanh.f32 %v946_v43  ;;  %v410_v44 = vpop.f32.mrf.mxu0  ;;  %v538_v45 = vpop.f32.mrf.mxu1 }
  0xdd   :  { %1036 = vtanh.f32 %v410_v44 }
  0xde   :  { %1038 = vtanh.f32 %v538_v45  ;;  %v917_v46 = vpop.f32.mrf.mxu0  ;;  %v949_v47 = vpop.f32.mrf.mxu1 }
  0xdf   :  { %1040 = vtanh.f32 %v917_v46 }
  0xe0   :  { %1042 = vtanh.f32 %v949_v47  ;;  %v423_v48 = vpop.f32.mrf.mxu0  ;;  %v551_v49 = vpop.f32.mrf.mxu1 }
  0xe1   :  { %1044 = vtanh.f32 %v423_v48 }
  0xe2   :  { %1046 = vtanh.f32 %v551_v49  ;;  %v918_v50 = vpop.f32.mrf.mxu0  ;;  %v950_v51 = vpop.f32.mrf.mxu1 }
  0xe3   :  { %1048 = vtanh.f32 %v918_v50 }
  0xe4   :  { %v1025_v52 = vpop.eup %1024  ;;  %1050 = vtanh.f32 %v950_v51  ;;  %v426_v53 = vpop.f32.mrf.mxu0 }
  0xe5   :  { %v554_v54 = vpop.f32.mrf.mxu1  ;;  %v1027_v55 = vpop.eup %1026  ;;  %729 = vst.msk [vmem:[%s1568_s2 + $0x10] sm:$0xff] %vm726_vm2, %v1025_v52  ;;  %1052 = vtanh.f32 %v426_v53 }
  0xe6   :  { %v1029_v56 = vpop.eup %1028  ;;  %761 = vst.msk [vmem:[%s1568_s2 + $0x110] sm:$0xff] %vm726_vm2, %v1027_v55  ;;  %1054 = vtanh.f32 %v554_v54  ;;  %v921_v57 = vpop.f32.mrf.mxu0 }
  0xe7   :  { %v953_v58 = vpop.f32.mrf.mxu1  ;;  %v1031_v59 = vpop.eup %1030  ;;  %727 = vst.msk [vmem:[%s1568_s2] sm:$0xff] %vm726_vm2, %v1029_v56  ;;  %1056 = vtanh.f32 %v921_v57 }
  0xe8   :  { %v1033_v60 = vpop.eup %1032  ;;  %759 = vst.msk [vmem:[%s1568_s2 + $0x100] sm:$0xff] %vm726_vm2, %v1031_v59  ;;  %1058 = vtanh.f32 %v953_v58  ;;  %v439_v61 = vpop.f32.mrf.mxu0 }
  0xe9   :  { %v567_v62 = vpop.f32.mrf.mxu1  ;;  %v1035_v63 = vpop.eup %1034  ;;  %730 = vst.msk [vmem:[%s1568_s2 + $0x18] sm:$0xff] %vm726_vm2, %v1033_v60  ;;  %1060 = vtanh.f32 %v439_v61 }
  0xea   :  { %v1037_v0 = vpop.eup %1036  ;;  %762 = vst.msk [vmem:[%s1568_s2 + $0x118] sm:$0xff] %vm726_vm2, %v1035_v63  ;;  %1062 = vtanh.f32 %v567_v62  ;;  %v922_v1 = vpop.f32.mrf.mxu0 }
  0xeb   :  { %v954_v2 = vpop.f32.mrf.mxu1  ;;  %v1039_v3 = vpop.eup %1038  ;;  %728 = vst.msk [vmem:[%s1568_s2 + $0x8] sm:$0xff] %vm726_vm2, %v1037_v0  ;;  %1064 = vtanh.f32 %v922_v1 }
  0xec   :  { %v1041_v4 = vpop.eup %1040  ;;  %760 = vst.msk [vmem:[%s1568_s2 + $0x108] sm:$0xff] %vm726_vm2, %v1039_v3  ;;  %1066 = vtanh.f32 %v954_v2  ;;  %v442_v5 = vpop.f32.mrf.mxu0 }
  0xed   :  { %v570_v6 = vpop.f32.mrf.mxu1  ;;  %v1043_v7 = vpop.eup %1042  ;;  %733 = vst.msk [vmem:[%s1568_s2 + $0x30] sm:$0xff] %vm726_vm2, %v1041_v4  ;;  %1068 = vtanh.f32 %v442_v5 }
  0xee   :  { %v1045_v8 = vpop.eup %1044  ;;  %765 = vst.msk [vmem:[%s1568_s2 + $0x130] sm:$0xff] %vm726_vm2, %v1043_v7  ;;  %1070 = vtanh.f32 %v570_v6  ;;  %v925_v9 = vpop.f32.mrf.mxu0 }
  0xef   :  { %v957_v10 = vpop.f32.mrf.mxu1  ;;  %v1047_v11 = vpop.eup %1046  ;;  %731 = vst.msk [vmem:[%s1568_s2 + $0x20] sm:$0xff] %vm726_vm2, %v1045_v8  ;;  %1072 = vtanh.f32 %v925_v9 }
  0xf0   :  { %v1049_v12 = vpop.eup %1048  ;;  %763 = vst.msk [vmem:[%s1568_s2 + $0x120] sm:$0xff] %vm726_vm2, %v1047_v11  ;;  %1074 = vtanh.f32 %v957_v10  ;;  %v455_v13 = vpop.f32.mrf.mxu0 }
  0xf1   :  { %v583_v14 = vpop.f32.mrf.mxu1  ;;  %v1051_v15 = vpop.eup %1050  ;;  %734 = vst.msk [vmem:[%s1568_s2 + $0x38] sm:$0xff] %vm726_vm2, %v1049_v12  ;;  %1076 = vtanh.f32 %v455_v13 }
  0xf2   :  { %v1053_v16 = vpop.eup %1052  ;;  %766 = vst.msk [vmem:[%s1568_s2 + $0x138] sm:$0xff] %vm726_vm2, %v1051_v15  ;;  %1078 = vtanh.f32 %v583_v14  ;;  %v926_v17 = vpop.f32.mrf.mxu0 }
  0xf3   :  { %v958_v18 = vpop.f32.mrf.mxu1  ;;  %v1055_v19 = vpop.eup %1054  ;;  %732 = vst.msk [vmem:[%s1568_s2 + $0x28] sm:$0xff] %vm726_vm2, %v1053_v16  ;;  %1080 = vtanh.f32 %v926_v17 }
  0xf4   :  { %v1057_v20 = vpop.eup %1056  ;;  %764 = vst.msk [vmem:[%s1568_s2 + $0x128] sm:$0xff] %vm726_vm2, %v1055_v19  ;;  %1082 = vtanh.f32 %v958_v18  ;;  %v458_v21 = vpop.f32.mrf.mxu0 }
  0xf5   :  { %v586_v22 = vpop.f32.mrf.mxu1  ;;  %v1059_v23 = vpop.eup %1058  ;;  %737 = vst.msk [vmem:[%s1568_s2 + $0x50] sm:$0xff] %vm726_vm2, %v1057_v20  ;;  %1084 = vtanh.f32 %v458_v21 }
  0xf6   :  { %v1061_v24 = vpop.eup %1060  ;;  %769 = vst.msk [vmem:[%s1568_s2 + $0x150] sm:$0xff] %vm726_vm2, %v1059_v23  ;;  %1086 = vtanh.f32 %v586_v22  ;;  %v929_v25 = vpop.f32.mrf.mxu0 }
  0xf7   :  { %v961_v26 = vpop.f32.mrf.mxu1  ;;  %v1063_v27 = vpop.eup %1062  ;;  %735 = vst.msk [vmem:[%s1568_s2 + $0x40] sm:$0xff] %vm726_vm2, %v1061_v24  ;;  %1088 = vtanh.f32 %v929_v25 }
  0xf8   :  { %v1065_v28 = vpop.eup %1064  ;;  %767 = vst.msk [vmem:[%s1568_s2 + $0x140] sm:$0xff] %vm726_vm2, %v1063_v27  ;;  %1090 = vtanh.f32 %v961_v26  ;;  %v471_v29 = vpop.f32.mrf.mxu0 }
  0xf9   :  { %v599_v30 = vpop.f32.mrf.mxu1  ;;  %v1067_v31 = vpop.eup %1066  ;;  %738 = vst.msk [vmem:[%s1568_s2 + $0x58] sm:$0xff] %vm726_vm2, %v1065_v28  ;;  %1092 = vtanh.f32 %v471_v29 }
  0xfa   :  { %v1069_v32 = vpop.eup %1068  ;;  %770 = vst.msk [vmem:[%s1568_s2 + $0x158] sm:$0xff] %vm726_vm2, %v1067_v31  ;;  %1094 = vtanh.f32 %v599_v30  ;;  %v930_v33 = vpop.f32.mrf.mxu0 }
  0xfb   :  { %v962_v34 = vpop.f32.mrf.mxu1  ;;  %v1071_v35 = vpop.eup %1070  ;;  %736 = vst.msk [vmem:[%s1568_s2 + $0x48] sm:$0xff] %vm726_vm2, %v1069_v32  ;;  %1096 = vtanh.f32 %v930_v33 }
  0xfc   :  { %v1073_v36 = vpop.eup %1072  ;;  %768 = vst.msk [vmem:[%s1568_s2 + $0x148] sm:$0xff] %vm726_vm2, %v1071_v35  ;;  %1098 = vtanh.f32 %v962_v34  ;;  %v474_v37 = vpop.f32.mrf.mxu0 }
  0xfd   :  { %v602_v38 = vpop.f32.mrf.mxu1  ;;  %v1075_v39 = vpop.eup %1074  ;;  %741 = vst.msk [vmem:[%s1568_s2 + $0x70] sm:$0xff] %vm726_vm2, %v1073_v36  ;;  %1100 = vtanh.f32 %v474_v37 }
  0xfe   :  { %v1077_v40 = vpop.eup %1076  ;;  %773 = vst.msk [vmem:[%s1568_s2 + $0x170] sm:$0xff] %vm726_vm2, %v1075_v39  ;;  %1102 = vtanh.f32 %v602_v38  ;;  %v933_v41 = vpop.f32.mrf.mxu0 }
  0xff   :  { %v965_v42 = vpop.f32.mrf.mxu1  ;;  %v1079_v43 = vpop.eup %1078  ;;  %739 = vst.msk [vmem:[%s1568_s2 + $0x60] sm:$0xff] %vm726_vm2, %v1077_v40  ;;  %1104 = vtanh.f32 %v933_v41 }
 0x100   :  { %v1081_v44 = vpop.eup %1080  ;;  %771 = vst.msk [vmem:[%s1568_s2 + $0x160] sm:$0xff] %vm726_vm2, %v1079_v43  ;;  %1106 = vtanh.f32 %v965_v42  ;;  %v487_v45 = vpop.f32.mrf.mxu0 }
 0x101   :  { %v615_v46 = vpop.f32.mrf.mxu1  ;;  %v1083_v47 = vpop.eup %1082  ;;  %742 = vst.msk [vmem:[%s1568_s2 + $0x78] sm:$0xff] %vm726_vm2, %v1081_v44  ;;  %1108 = vtanh.f32 %v487_v45 }
 0x102   :  { %v1085_v48 = vpop.eup %1084  ;;  %774 = vst.msk [vmem:[%s1568_s2 + $0x178] sm:$0xff] %vm726_vm2, %v1083_v47  ;;  %1110 = vtanh.f32 %v615_v46  ;;  %v934_v49 = vpop.f32.mrf.mxu0 }
 0x103   :  { %v966_v50 = vpop.f32.mrf.mxu1  ;;  %v1087_v51 = vpop.eup %1086  ;;  %740 = vst.msk [vmem:[%s1568_s2 + $0x68] sm:$0xff] %vm726_vm2, %v1085_v48  ;;  %1112 = vtanh.f32 %v934_v49 }
 0x104   :  { %v1089_v52 = vpop.eup %1088  ;;  %772 = vst.msk [vmem:[%s1568_s2 + $0x168] sm:$0xff] %vm726_vm2, %v1087_v51  ;;  %1114 = vtanh.f32 %v966_v50  ;;  %v490_v53 = vpop.f32.mrf.mxu0 }
 0x105   :  { %v618_v54 = vpop.f32.mrf.mxu1  ;;  %v1091_v55 = vpop.eup %1090  ;;  %745 = vst.msk [vmem:[%s1568_s2 + $0x90] sm:$0xff] %vm726_vm2, %v1089_v52  ;;  %1116 = vtanh.f32 %v490_v53 }
 0x106   :  { %v1093_v56 = vpop.eup %1092  ;;  %777 = vst.msk [vmem:[%s1568_s2 + $0x190] sm:$0xff] %vm726_vm2, %v1091_v55  ;;  %1118 = vtanh.f32 %v618_v54  ;;  %v937_v57 = vpop.f32.mrf.mxu0 }
 0x107   :  { %v969_v58 = vpop.f32.mrf.mxu1  ;;  %v1095_v59 = vpop.eup %1094  ;;  %743 = vst.msk [vmem:[%s1568_s2 + $0x80] sm:$0xff] %vm726_vm2, %v1093_v56  ;;  %1120 = vtanh.f32 %v937_v57 }
 0x108   :  { %v1097_v60 = vpop.eup %1096  ;;  %775 = vst.msk [vmem:[%s1568_s2 + $0x180] sm:$0xff] %vm726_vm2, %v1095_v59  ;;  %1122 = vtanh.f32 %v969_v58  ;;  %v503_v61 = vpop.f32.mrf.mxu0 }
 0x109   :  { %v631_v62 = vpop.f32.mrf.mxu1  ;;  %v1099_v63 = vpop.eup %1098  ;;  %746 = vst.msk [vmem:[%s1568_s2 + $0x98] sm:$0xff] %vm726_vm2, %v1097_v60  ;;  %1124 = vtanh.f32 %v503_v61 }
 0x10a   :  { %v1101_v0 = vpop.eup %1100  ;;  %778 = vst.msk [vmem:[%s1568_s2 + $0x198] sm:$0xff] %vm726_vm2, %v1099_v63  ;;  %1126 = vtanh.f32 %v631_v62  ;;  %v938_v1 = vpop.f32.mrf.mxu0 }
 0x10b   :  { %v970_v2 = vpop.f32.mrf.mxu1  ;;  %v1103_v3 = vpop.eup %1102  ;;  %744 = vst.msk [vmem:[%s1568_s2 + $0x88] sm:$0xff] %vm726_vm2, %v1101_v0  ;;  %1128 = vtanh.f32 %v938_v1 }
 0x10c   :  { %v1105_v4 = vpop.eup %1104  ;;  %776 = vst.msk [vmem:[%s1568_s2 + $0x188] sm:$0xff] %vm726_vm2, %v1103_v3  ;;  %1130 = vtanh.f32 %v970_v2  ;;  %v506_v5 = vpop.f32.mrf.mxu0 }
 0x10d   :  { %v634_v6 = vpop.f32.mrf.mxu1  ;;  %v1107_v7 = vpop.eup %1106  ;;  %749 = vst.msk [vmem:[%s1568_s2 + $0xb0] sm:$0xff] %vm726_vm2, %v1105_v4  ;;  %1132 = vtanh.f32 %v506_v5 }
 0x10e   :  { %v1109_v8 = vpop.eup %1108  ;;  %781 = vst.msk [vmem:[%s1568_s2 + $0x1b0] sm:$0xff] %vm726_vm2, %v1107_v7  ;;  %1134 = vtanh.f32 %v634_v6  ;;  %v941_v9 = vpop.f32.mrf.mxu0 }
 0x10f   :  { %v973_v10 = vpop.f32.mrf.mxu1  ;;  %v1111_v11 = vpop.eup %1110  ;;  %747 = vst.msk [vmem:[%s1568_s2 + $0xa0] sm:$0xff] %vm726_vm2, %v1109_v8  ;;  %1136 = vtanh.f32 %v941_v9 }
 0x110   :  { %v1113_v12 = vpop.eup %1112  ;;  %779 = vst.msk [vmem:[%s1568_s2 + $0x1a0] sm:$0xff] %vm726_vm2, %v1111_v11  ;;  %1138 = vtanh.f32 %v973_v10  ;;  %v519_v13 = vpop.f32.mrf.mxu0 }
 0x111   :  { %v647_v14 = vpop.f32.mrf.mxu1  ;;  %v1115_v15 = vpop.eup %1114  ;;  %750 = vst.msk [vmem:[%s1568_s2 + $0xb8] sm:$0xff] %vm726_vm2, %v1113_v12  ;;  %1140 = vtanh.f32 %v519_v13 }
 0x112   :  { %v1117_v16 = vpop.eup %1116  ;;  %782 = vst.msk [vmem:[%s1568_s2 + $0x1b8] sm:$0xff] %vm726_vm2, %v1115_v15  ;;  %1142 = vtanh.f32 %v647_v14  ;;  %v942_v17 = vpop.f32.mrf.mxu0 }
 0x113   :  { %v974_v18 = vpop.f32.mrf.mxu1  ;;  %v1119_v19 = vpop.eup %1118  ;;  %748 = vst.msk [vmem:[%s1568_s2 + $0xa8] sm:$0xff] %vm726_vm2, %v1117_v16  ;;  %1144 = vtanh.f32 %v942_v17 }
 0x114   :  { %v1121_v20 = vpop.eup %1120  ;;  %780 = vst.msk [vmem:[%s1568_s2 + $0x1a8] sm:$0xff] %vm726_vm2, %v1119_v19  ;;  %1146 = vtanh.f32 %v974_v18  ;;  %v522_v21 = vpop.f32.mrf.mxu0 }
 0x115   :  { %v650_v22 = vpop.f32.mrf.mxu1  ;;  %v1123_v23 = vpop.eup %1122  ;;  %753 = vst.msk [vmem:[%s1568_s2 + $0xd0] sm:$0xff] %vm726_vm2, %v1121_v20  ;;  %1148 = vtanh.f32 %v522_v21 }
 0x116   :  { %v1125_v24 = vpop.eup %1124  ;;  %785 = vst.msk [vmem:[%s1568_s2 + $0x1d0] sm:$0xff] %vm726_vm2, %v1123_v23  ;;  %1150 = vtanh.f32 %v650_v22 }
 0x117   :  { %v1127_v25 = vpop.eup %1126  ;;  %751 = vst.msk [vmem:[%s1568_s2 + $0xc0] sm:$0xff] %vm726_vm2, %v1125_v24 }
 0x118   :  { %v1129_v26 = vpop.eup %1128  ;;  %783 = vst.msk [vmem:[%s1568_s2 + $0x1c0] sm:$0xff] %vm726_vm2, %v1127_v25 }
 0x119   :  { %v1131_v27 = vpop.eup %1130  ;;  %754 = vst.msk [vmem:[%s1568_s2 + $0xd8] sm:$0xff] %vm726_vm2, %v1129_v26 }
 0x11a   :  { %v1133_v28 = vpop.eup %1132  ;;  %786 = vst.msk [vmem:[%s1568_s2 + $0x1d8] sm:$0xff] %vm726_vm2, %v1131_v27 }
 0x11b   :  { %v1135_v29 = vpop.eup %1134  ;;  %752 = vst.msk [vmem:[%s1568_s2 + $0xc8] sm:$0xff] %vm726_vm2, %v1133_v28 }
 0x11c   :  { %v1137_v30 = vpop.eup %1136  ;;  %784 = vst.msk [vmem:[%s1568_s2 + $0x1c8] sm:$0xff] %vm726_vm2, %v1135_v29 }
 0x11d   :  { %v1139_v31 = vpop.eup %1138  ;;  %757 = vst.msk [vmem:[%s1568_s2 + $0xf0] sm:$0xff] %vm726_vm2, %v1137_v30 }
 0x11e   :  { %v1141_v32 = vpop.eup %1140  ;;  %789 = vst.msk [vmem:[%s1568_s2 + $0x1f0] sm:$0xff] %vm726_vm2, %v1139_v31 }
 0x11f   :  { %v1143_v33 = vpop.eup %1142  ;;  %755 = vst.msk [vmem:[%s1568_s2 + $0xe0] sm:$0xff] %vm726_vm2, %v1141_v32 }
 0x120   :  { %v1145_v34 = vpop.eup %1144  ;;  %787 = vst.msk [vmem:[%s1568_s2 + $0x1e0] sm:$0xff] %vm726_vm2, %v1143_v33 }
 0x121   :  { %v1147_v35 = vpop.eup %1146  ;;  %758 = vst.msk [vmem:[%s1568_s2 + $0xf8] sm:$0xff] %vm726_vm2, %v1145_v34 }
 0x122   :  { %v1149_v36 = vpop.eup %1148  ;;  %790 = vst.msk [vmem:[%s1568_s2 + $0x1f8] sm:$0xff] %vm726_vm2, %v1147_v35 }
 0x123   :  { %v1151_v37 = vpop.eup %1150  ;;  %756 = vst.msk [vmem:[%s1568_s2 + $0xe8] sm:$0xff] %vm726_vm2, %v1149_v36 }
 0x124   :  { %788 = vst.msk [vmem:[%s1568_s2 + $0x1e8] sm:$0xff] %vm726_vm2, %v1151_v37 }

</bundles_post_ra>
